<compile_context>
chip_gen: v7x
topology: tpu7x:2x2x1
jax: 0.10.0
libtpu: 0.0.40
codegen_flags: <defaults>
</compile_context>

<pallas_src>
import numpy as np

import jax
import jax.numpy as jnp
from jax.experimental import pallas as pl
from jax.experimental.pallas import tpu as pltpu

OUT_SIZE = 5              # out_size of the module (synthetic choice)
IN_SIZE = 3 * 32 * 32     # in_size implied by forward()
H1, H2 = 32, 22           # hidden_size1 / hidden_size2
KSIZE, PAD = 5, 3
C_IN, C_OUT = 3, 16
H_IMG = 32
H_PAD = H_IMG + 2 * PAD               # 38
H_CONV = H_PAD - KSIZE + 1            # 34 conv output spatial
H_POOL = H_CONV // 2                  # 17 pooled spatial
HALF = H_POOL * C_OUT                 # 272 = one (ow-parity) half of conv cols
FLAT = C_OUT * H_POOL * H_POOL        # 4624
XCOLS = C_IN * H_PAD                  # 114 channel-interleaved padded width
BCOLS = 2 * HALF                      # 544 conv output columns (even|odd ow)


# ---------------- Pallas kernels ----------------

def conv_pool_kernel(x_ref, band_ref, bias_ref, sel_ref, o_ref):
    """Fused Conv2d+bias+ReLU+MaxPool(2,2) for one image.

    x_ref    : (1, 38, 114)  zero-padded image, row h, cols = (w, ci) interleaved
    band_ref : (5, 114, 544) banded conv weights, one (114,544) block per kh;
               output cols ordered [even ow (272) | odd ow (272)], 16*pw + co
    bias_ref : (1, 272)      conv bias tiled per pooled column
    sel_ref  : (17, 33)      0/1 row-selection matrix (picks rows 0,2,...,32)
    o_ref    : (1, 17, 272)  pooled NHWC slab (ph, 16*pw + co)
    """
    x = x_ref[0]                                                  # (38, 114)
    acc = jnp.dot(x[0:H_CONV, :], band_ref[0],
                  preferred_element_type=jnp.float32)             # (34, 544)
    for kh in range(1, KSIZE):
        acc += jnp.dot(x[kh:kh + H_CONV, :], band_ref[kh],
                       preferred_element_type=jnp.float32)
    # max over width pairs (even ow half vs odd ow half)
    wmax = jnp.maximum(acc[:, :HALF], acc[:, HALF:])              # (34, 272)
    # max over height pairs, then keep rows 0,2,...,32 via tiny selection matmul
    hmax = jnp.maximum(wmax[:H_CONV - 1, :], wmax[1:, :])         # (33, 272)
    pooled = jnp.dot(sel_ref[...], hmax,
                     preferred_element_type=jnp.float32)          # (17, 272)
    # bias + ReLU commute with max-pool (same per-channel bias in every window)
    o_ref[0] = jnp.maximum(pooled + bias_ref[...], 0.0)


def mlp_kernel(x_ref, w1_ref, b1_ref, w2_ref, b2_ref, w3_ref, b3_ref, o_ref):
    h1 = jnp.dot(x_ref[...], w1_ref[...],
                 preferred_element_type=jnp.float32) + b1_ref[...]
    h1 = jnp.maximum(h1, 0.0)
    h2 = jnp.dot(h1, w2_ref[...],
                 preferred_element_type=jnp.float32) + b2_ref[...]
    h2 = jnp.maximum(h2, 0.0)
    o = jnp.dot(h2, w3_ref[...],
                preferred_element_type=jnp.float32) + b3_ref[...]
    o_ref[...] = pl.reciprocal(1.0 + jnp.exp(-o))                 # sigmoid


# ---------------- wrappers ----------------

_CP = pltpu.CompilerParams(dimension_semantics=("parallel",),
                           vmem_limit_bytes=32 * 1024 * 1024)


def conv_relu_pool(x2d, band, bias_row, sel):
    N = x2d.shape[0]
    return pl.pallas_call(
        conv_pool_kernel,
        out_shape=jax.ShapeDtypeStruct((N, H_POOL, HALF), jnp.float32),
        grid=(N,),
        in_specs=[
            pl.BlockSpec((1, H_PAD, XCOLS), lambda i: (i, 0, 0)),       # per-image
            pl.BlockSpec((KSIZE, XCOLS, BCOLS), lambda i: (0, 0, 0)),   # resident
            pl.BlockSpec((1, HALF), lambda i: (0, 0)),                  # resident
            pl.BlockSpec((H_POOL, H_CONV - 1), lambda i: (0, 0)),       # resident
        ],
        out_specs=pl.BlockSpec((1, H_POOL, HALF), lambda i: (i, 0, 0)),
        compiler_params=_CP,
    )(x2d, band, bias_row, sel)


def mlp(flat, w1, b1, w2, b2, w3, b3, *, batch_tile=256):
    N = flat.shape[0]
    bt = N if N <= batch_tile else batch_tile
    return pl.pallas_call(
        mlp_kernel,
        out_shape=jax.ShapeDtypeStruct((N, OUT_SIZE), jnp.float32),
        grid=(pl.cdiv(N, bt),),
        in_specs=[
            pl.BlockSpec((bt, FLAT), lambda i: (i, 0)),
            pl.BlockSpec((FLAT, H1), lambda i: (0, 0)),
            pl.BlockSpec((1, H1), lambda i: (0, 0)),
            pl.BlockSpec((H1, H2), lambda i: (0, 0)),
            pl.BlockSpec((1, H2), lambda i: (0, 0)),
            pl.BlockSpec((H2, OUT_SIZE), lambda i: (0, 0)),
            pl.BlockSpec((1, OUT_SIZE), lambda i: (0, 0)),
        ],
        out_specs=pl.BlockSpec((bt, OUT_SIZE), lambda i: (i, 0)),
        compiler_params=_CP,
    )(flat, w1, b1, w2, b2, w3, b3)


# ---------------- one-time host-side parameter repack ----------------

def prepare_kernel_params(params):
    """Repack PyTorch-layout params into kernel layouts (numpy, done once)."""
    w = np.asarray(params["conv_w"], np.float32)                  # (16,3,5,5) OIHW
    band = np.zeros((KSIZE, XCOLS, BCOLS), np.float32)
    for kh in range(KSIZE):
        for kw in range(KSIZE):
            wt = w[:, :, kh, kw].T                                # (ci, co)
            for ow in range(H_CONV):
                col = (ow // 2) * C_OUT + (0 if ow % 2 == 0 else HALF)
                row = C_IN * (ow + kw)
                band[kh, row:row + C_IN, col:col + C_OUT] = wt

    bias_row = np.tile(np.asarray(params["conv_b"], np.float32),
                       H_POOL).reshape(1, HALF)

    sel = np.zeros((H_POOL, H_CONV - 1), np.float32)
    sel[np.arange(H_POOL), 2 * np.arange(H_POOL)] = 1.0

    # Permute lin1 rows so the MLP consumes the NHWC-pooled slab directly
    # (absorbs torch's NCHW view(N,4624) flatten -> no runtime transpose).
    l1 = np.asarray(params["lin1_w"], np.float32).reshape(H1, C_OUT, H_POOL, H_POOL)
    w1 = np.transpose(l1, (2, 3, 1, 0)).reshape(FLAT, H1)         # rows = (ph,pw,co)

    return {
        "band": jnp.asarray(band),
        "conv_bias": jnp.asarray(bias_row),
        "sel": jnp.asarray(sel),
        "w1": jnp.asarray(w1),
        "b1": jnp.asarray(np.asarray(params["lin1_b"], np.float32).reshape(1, H1)),
        "w2": jnp.asarray(np.asarray(params["lin2_w"], np.float32).T),
        "b2": jnp.asarray(np.asarray(params["lin2_b"], np.float32).reshape(1, H2)),
        "w3": jnp.asarray(np.asarray(params["lin3_w"], np.float32).T),
        "b3": jnp.asarray(np.asarray(params["lin3_b"], np.float32).reshape(1, OUT_SIZE)),
    }


# ---------------- forward ----------------

def neuralnet_forward(x, kp):
    """x: (N, 3072) float32 -> (N, OUT_SIZE) float32."""
    N = x.shape[0]
    # view(N,3,32,32) -> NHWC -> zero-pad 3 -> channel-interleaved (N, 38, 114)
    x_img = x.reshape(N, C_IN, H_IMG, H_IMG)
    x_hwc = jnp.transpose(x_img, (0, 2, 3, 1))
    x_padded = jnp.pad(x_hwc, ((0, 0), (PAD, PAD), (PAD, PAD), (0, 0)))
    x2d = x_padded.reshape(N, H_PAD, XCOLS)

    pooled = conv_relu_pool(x2d, kp["band"], kp["conv_bias"], kp["sel"])  # (N,17,272)
    flat = pooled.reshape(N, FLAT)                   # free row-major NHWC flatten
    return mlp(flat, kp["w1"], kp["b1"], kp["w2"], kp["b2"], kp["w3"], kp["b3"])


# ---------------- pure-JAX reference for validation ----------------

def forward_ref(x, p):
    N = x.shape[0]
    xi = x.reshape(N, C_IN, H_IMG, H_IMG)
    conv = jax.lax.conv_general_dilated(
        xi, p["conv_w"], (1, 1), ((PAD, PAD), (PAD, PAD)),
        dimension_numbers=("NCHW", "OIHW", "NCHW"))
    conv = jnp.maximum(conv + p["conv_b"][None, :, None, None], 0.0)
    pooled = jax.lax.reduce_window(conv, -jnp.inf, jax.lax.max,
                                   (1, 1, 2, 2), (1, 1, 2, 2), "VALID")
    flat = pooled.reshape(N, FLAT)
    h1 = jnp.maximum(flat @ p["lin1_w"].T + p["lin1_b"], 0.0)
    h2 = jnp.maximum(h1 @ p["lin2_w"].T + p["lin2_b"], 0.0)
    o = h2 @ p["lin3_w"].T + p["lin3_b"]
    return 1.0 / (1.0 + jnp.exp(-o))


def init_params(key):
    ks = jax.random.split(key, 8)
    return {
        "conv_w": jax.random.normal(ks[0], (C_OUT, C_IN, KSIZE, KSIZE), jnp.float32) * 0.05,
        "conv_b": jax.random.normal(ks[1], (C_OUT,), jnp.float32) * 0.05,
        "lin1_w": jax.random.normal(ks[2], (H1, FLAT), jnp.float32) * 0.02,
        "lin1_b": jax.random.normal(ks[3], (H1,), jnp.float32) * 0.02,
        "lin2_w": jax.random.normal(ks[4], (H2, H1), jnp.float32) * 0.05,
        "lin2_b": jax.random.normal(ks[5], (H2,), jnp.float32) * 0.05,
        "lin3_w": jax.random.normal(ks[6], (OUT_SIZE, H2), jnp.float32) * 0.05,
        "lin3_b": jax.random.normal(ks[7], (OUT_SIZE,), jnp.float32) * 0.05,
    }


if __name__ == "__main__":
    key = jax.random.PRNGKey(0)
    k_x, k_p = jax.random.split(key)
    N = 2
    x = jax.random.normal(k_x, (N, IN_SIZE), jnp.float32)
    params = init_params(k_p)
    kparams = prepare_kernel_params(params)     # one-time host-side repack

    y = jax.jit(neuralnet_forward)(x, kparams)
    y = jax.block_until_ready(y)

    y_ref = forward_ref(x, params)
    assert y.shape == (N, OUT_SIZE), y.shape
    assert jnp.allclose(y, y_ref, atol=2e-3, rtol=2e-3), (y, y_ref)

    print("KERNEL_OK")
</pallas_src>

<mosaic_0001>
module attributes {stable_mosaic.version = 11 : i64} {
  func.func @conv_pool_kernel(%arg0: i32, %arg1: memref<1x38x114xf32, #tpu.memory_space<vmem>>, %arg2: memref<5x114x544xf32, #tpu.memory_space<vmem>>, %arg3: memref<1x272xf32, #tpu.memory_space<vmem>>, %arg4: memref<17x33xf32, #tpu.memory_space<vmem>>, %arg5: memref<1x17x272xf32, #tpu.memory_space<vmem>>) attributes {dimension_semantics = [#tpu.dimension_semantics<parallel>], iteration_bounds = array<i64: 2>, scalar_prefetch = 0 : i64, scratch_operands = 0 : i64, tpu.core_type = #tpu.core_type<tc>, window_params = [{transform_indices = @transform_0, window_bounds = array<i64: 1, 38, 114>}, {pipeline_mode = #tpu.pipeline_mode<synchronous>, transform_indices = @transform_1, window_bounds = array<i64: 5, 114, 544>}, {pipeline_mode = #tpu.pipeline_mode<synchronous>, transform_indices = @transform_2, window_bounds = array<i64: 1, 272>}, {pipeline_mode = #tpu.pipeline_mode<synchronous>, transform_indices = @transform_3, window_bounds = array<i64: 17, 33>}, {transform_indices = @transform_4, window_bounds = array<i64: 1, 17, 272>}]} {
    %c0 = arith.constant 0 : index
    %c0_0 = arith.constant 0 : index
    %c0_1 = arith.constant 0 : index
    %0 = vector.load %arg1[%c0, %c0_0, %c0_1] : memref<1x38x114xf32, #tpu.memory_space<vmem>>, vector<1x38x114xf32>
    %1 = vector.shape_cast %0 : vector<1x38x114xf32> to vector<38x114xf32>
    %2 = vector.extract_strided_slice %1 {offsets = [0, 0], sizes = [34, 114], strides = [1, 1]} : vector<38x114xf32> to vector<34x114xf32>
    %c0_2 = arith.constant 0 : index
    %c0_3 = arith.constant 0 : index
    %c0_4 = arith.constant 0 : index
    %3 = vector.load %arg2[%c0_2, %c0_3, %c0_4] : memref<5x114x544xf32, #tpu.memory_space<vmem>>, vector<1x114x544xf32>
    %4 = vector.shape_cast %3 : vector<1x114x544xf32> to vector<114x544xf32>
    %cst = arith.constant dense<0.000000e+00> : vector<34x544xf32>
    %5 = tpu.matmul %2, %4, %cst {dimension_numbers = #tpu.dot_dimension_numbers<[1], [0], [0], [1], [0, 0, 1, 1], [], []>} : vector<34x114xf32>, vector<114x544xf32>, vector<34x544xf32> -> vector<34x544xf32>
    %6 = vector.extract_strided_slice %1 {offsets = [1, 0], sizes = [34, 114], strides = [1, 1]} : vector<38x114xf32> to vector<34x114xf32>
    %c1 = arith.constant 1 : index
    %c0_5 = arith.constant 0 : index
    %c0_6 = arith.constant 0 : index
    %7 = vector.load %arg2[%c1, %c0_5, %c0_6] : memref<5x114x544xf32, #tpu.memory_space<vmem>>, vector<1x114x544xf32>
    %8 = vector.shape_cast %7 : vector<1x114x544xf32> to vector<114x544xf32>
    %cst_7 = arith.constant dense<0.000000e+00> : vector<34x544xf32>
    %9 = tpu.matmul %6, %8, %cst_7 {dimension_numbers = #tpu.dot_dimension_numbers<[1], [0], [0], [1], [0, 0, 1, 1], [], []>} : vector<34x114xf32>, vector<114x544xf32>, vector<34x544xf32> -> vector<34x544xf32>
    %10 = arith.addf %5, %9 : vector<34x544xf32>
    %11 = vector.extract_strided_slice %1 {offsets = [2, 0], sizes = [34, 114], strides = [1, 1]} : vector<38x114xf32> to vector<34x114xf32>
    %c2 = arith.constant 2 : index
    %c0_8 = arith.constant 0 : index
    %c0_9 = arith.constant 0 : index
    %12 = vector.load %arg2[%c2, %c0_8, %c0_9] : memref<5x114x544xf32, #tpu.memory_space<vmem>>, vector<1x114x544xf32>
    %13 = vector.shape_cast %12 : vector<1x114x544xf32> to vector<114x544xf32>
    %cst_10 = arith.constant dense<0.000000e+00> : vector<34x544xf32>
    %14 = tpu.matmul %11, %13, %cst_10 {dimension_numbers = #tpu.dot_dimension_numbers<[1], [0], [0], [1], [0, 0, 1, 1], [], []>} : vector<34x114xf32>, vector<114x544xf32>, vector<34x544xf32> -> vector<34x544xf32>
    %15 = arith.addf %10, %14 : vector<34x544xf32>
    %16 = vector.extract_strided_slice %1 {offsets = [3, 0], sizes = [34, 114], strides = [1, 1]} : vector<38x114xf32> to vector<34x114xf32>
    %c3 = arith.constant 3 : index
    %c0_11 = arith.constant 0 : index
    %c0_12 = arith.constant 0 : index
    %17 = vector.load %arg2[%c3, %c0_11, %c0_12] : memref<5x114x544xf32, #tpu.memory_space<vmem>>, vector<1x114x544xf32>
    %18 = vector.shape_cast %17 : vector<1x114x544xf32> to vector<114x544xf32>
    %cst_13 = arith.constant dense<0.000000e+00> : vector<34x544xf32>
    %19 = tpu.matmul %16, %18, %cst_13 {dimension_numbers = #tpu.dot_dimension_numbers<[1], [0], [0], [1], [0, 0, 1, 1], [], []>} : vector<34x114xf32>, vector<114x544xf32>, vector<34x544xf32> -> vector<34x544xf32>
    %20 = arith.addf %15, %19 : vector<34x544xf32>
    %21 = vector.extract_strided_slice %1 {offsets = [4, 0], sizes = [34, 114], strides = [1, 1]} : vector<38x114xf32> to vector<34x114xf32>
    %c4 = arith.constant 4 : index
    %c0_14 = arith.constant 0 : index
    %c0_15 = arith.constant 0 : index
    %22 = vector.load %arg2[%c4, %c0_14, %c0_15] : memref<5x114x544xf32, #tpu.memory_space<vmem>>, vector<1x114x544xf32>
    %23 = vector.shape_cast %22 : vector<1x114x544xf32> to vector<114x544xf32>
    %cst_16 = arith.constant dense<0.000000e+00> : vector<34x544xf32>
    %24 = tpu.matmul %21, %23, %cst_16 {dimension_numbers = #tpu.dot_dimension_numbers<[1], [0], [0], [1], [0, 0, 1, 1], [], []>} : vector<34x114xf32>, vector<114x544xf32>, vector<34x544xf32> -> vector<34x544xf32>
    %25 = arith.addf %20, %24 : vector<34x544xf32>
    %26 = vector.extract_strided_slice %25 {offsets = [0, 0], sizes = [34, 272], strides = [1, 1]} : vector<34x544xf32> to vector<34x272xf32>
    %27 = vector.extract_strided_slice %25 {offsets = [0, 272], sizes = [34, 272], strides = [1, 1]} : vector<34x544xf32> to vector<34x272xf32>
    %28 = arith.maximumf %26, %27 : vector<34x272xf32>
    %29 = vector.extract_strided_slice %28 {offsets = [0, 0], sizes = [33, 272], strides = [1, 1]} : vector<34x272xf32> to vector<33x272xf32>
    %30 = vector.extract_strided_slice %28 {offsets = [1, 0], sizes = [33, 272], strides = [1, 1]} : vector<34x272xf32> to vector<33x272xf32>
    %31 = arith.maximumf %29, %30 : vector<33x272xf32>
    %c0_17 = arith.constant 0 : index
    %c0_18 = arith.constant 0 : index
    %32 = vector.load %arg4[%c0_17, %c0_18] : memref<17x33xf32, #tpu.memory_space<vmem>>, vector<17x33xf32>
    %cst_19 = arith.constant dense<0.000000e+00> : vector<17x272xf32>
    %33 = tpu.matmul %32, %31, %cst_19 {dimension_numbers = #tpu.dot_dimension_numbers<[1], [0], [0], [1], [0, 0, 1, 1], [], []>} : vector<17x33xf32>, vector<33x272xf32>, vector<17x272xf32> -> vector<17x272xf32>
    %c0_20 = arith.constant 0 : index
    %c0_21 = arith.constant 0 : index
    %34 = vector.load %arg3[%c0_20, %c0_21] : memref<1x272xf32, #tpu.memory_space<vmem>>, vector<1x272xf32>
    %35 = vector.broadcast %34 : vector<1x272xf32> to vector<17x272xf32>
    %36 = arith.addf %33, %35 : vector<17x272xf32>
    %cst_22 = arith.constant 0.000000e+00 : f32
    %37 = vector.broadcast %cst_22 : f32 to vector<17x272xf32>
    %38 = arith.maximumf %36, %37 : vector<17x272xf32>
    %c0_23 = arith.constant 0 : index
    %c0_24 = arith.constant 0 : index
    %c0_25 = arith.constant 0 : index
    %39 = vector.load %arg5[%c0_23, %c0_24, %c0_25] : memref<1x17x272xf32, #tpu.memory_space<vmem>>, vector<1x17x272xf32>
    %40 = vector.shape_cast %39 : vector<1x17x272xf32> to vector<17x272xf32>
    %41 = vector.shape_cast %38 : vector<17x272xf32> to vector<1x17x272xf32>
    tpu.vector_store %arg5[%c0_23, %c0_24, %c0_25], %41 {strides = array<i32>} : memref<1x17x272xf32, #tpu.memory_space<vmem>>, vector<1x17x272xf32>,
    return
  }
  func.func @transform_0(%arg0: i32) -> (i32, i32, i32) {
    %c0_i32 = arith.constant 0 : i32
    %c0_i32_0 = arith.constant 0 : i32
    %c0_i32_1 = arith.constant 0 : i32
    return %arg0, %c0_i32, %c0_i32_0 : i32, i32, i32
  }
  func.func @transform_1(%arg0: i32) -> (i32, i32, i32) {
    %c0_i32 = arith.constant 0 : i32
    %c0_i32_0 = arith.constant 0 : i32
    %c0_i32_1 = arith.constant 0 : i32
    %c0_i32_2 = arith.constant 0 : i32
    return %c0_i32, %c0_i32_0, %c0_i32_1 : i32, i32, i32
  }
  func.func @transform_2(%arg0: i32) -> (i32, i32) {
    %c0_i32 = arith.constant 0 : i32
    %c0_i32_0 = arith.constant 0 : i32
    %c0_i32_1 = arith.constant 0 : i32
    return %c0_i32, %c0_i32_0 : i32, i32
  }
  func.func @transform_3(%arg0: i32) -> (i32, i32) {
    %c0_i32 = arith.constant 0 : i32
    %c0_i32_0 = arith.constant 0 : i32
    %c0_i32_1 = arith.constant 0 : i32
    return %c0_i32, %c0_i32_0 : i32, i32
  }
  func.func @transform_4(%arg0: i32) -> (i32, i32, i32) {
    %c0_i32 = arith.constant 0 : i32
    %c0_i32_0 = arith.constant 0 : i32
    %c0_i32_1 = arith.constant 0 : i32
    return %arg0, %c0_i32, %c0_i32_0 : i32, i32, i32
  }
}

module attributes {stable_mosaic.version = 11 : i64} {
  func.func @mlp_kernel(%arg0: i32, %arg1: memref<2x4624xf32, #tpu.memory_space<vmem>>, %arg2: memref<4624x32xf32, #tpu.memory_space<vmem>>, %arg3: memref<1x32xf32, #tpu.memory_space<vmem>>, %arg4: memref<32x22xf32, #tpu.memory_space<vmem>>, %arg5: memref<1x22xf32, #tpu.memory_space<vmem>>, %arg6: memref<22x5xf32, #tpu.memory_space<vmem>>, %arg7: memref<1x5xf32, #tpu.memory_space<vmem>>, %arg8: memref<2x5xf32, #tpu.memory_space<vmem>>) attributes {dimension_semantics = [#tpu.dimension_semantics<parallel>], iteration_bounds = array<i64: 1>, scalar_prefetch = 0 : i64, scratch_operands = 0 : i64, tpu.core_type = #tpu.core_type<tc>, window_params = [{transform_indices = @transform_0, window_bounds = array<i64: 2, 4624>}, {pipeline_mode = #tpu.pipeline_mode<synchronous>, transform_indices = @transform_1, window_bounds = array<i64: 4624, 32>}, {pipeline_mode = #tpu.pipeline_mode<synchronous>, transform_indices = @transform_2, window_bounds = array<i64: 1, 32>}, {pipeline_mode = #tpu.pipeline_mode<synchronous>, transform_indices = @transform_3, window_bounds = array<i64: 32, 22>}, {pipeline_mode = #tpu.pipeline_mode<synchronous>, transform_indices = @transform_4, window_bounds = array<i64: 1, 22>}, {pipeline_mode = #tpu.pipeline_mode<synchronous>, transform_indices = @transform_5, window_bounds = array<i64: 22, 5>}, {pipeline_mode = #tpu.pipeline_mode<synchronous>, transform_indices = @transform_6, window_bounds = array<i64: 1, 5>}, {transform_indices = @transform_7, window_bounds = array<i64: 2, 5>}]} {
    %c0 = arith.constant 0 : index
    %c0_0 = arith.constant 0 : index
    %0 = vector.load %arg1[%c0, %c0_0] : memref<2x4624xf32, #tpu.memory_space<vmem>>, vector<2x4624xf32>
    %c0_1 = arith.constant 0 : index
    %c0_2 = arith.constant 0 : index
    %1 = vector.load %arg2[%c0_1, %c0_2] : memref<4624x32xf32, #tpu.memory_space<vmem>>, vector<4624x32xf32>
    %cst = arith.constant dense<0.000000e+00> : vector<2x32xf32>
    %2 = tpu.matmul %0, %1, %cst {dimension_numbers = #tpu.dot_dimension_numbers<[1], [0], [0], [1], [0, 0, 1, 1], [], []>} : vector<2x4624xf32>, vector<4624x32xf32>, vector<2x32xf32> -> vector<2x32xf32>
    %c0_3 = arith.constant 0 : index
    %c0_4 = arith.constant 0 : index
    %3 = vector.load %arg3[%c0_3, %c0_4] : memref<1x32xf32, #tpu.memory_space<vmem>>, vector<1x32xf32>
    %4 = vector.broadcast %3 : vector<1x32xf32> to vector<2x32xf32>
    %5 = arith.addf %2, %4 : vector<2x32xf32>
    %cst_5 = arith.constant 0.000000e+00 : f32
    %6 = vector.broadcast %cst_5 : f32 to vector<2x32xf32>
    %7 = arith.maximumf %5, %6 : vector<2x32xf32>
    %c0_6 = arith.constant 0 : index
    %c0_7 = arith.constant 0 : index
    %8 = vector.load %arg4[%c0_6, %c0_7] : memref<32x22xf32, #tpu.memory_space<vmem>>, vector<32x22xf32>
    %cst_8 = arith.constant dense<0.000000e+00> : vector<2x22xf32>
    %9 = tpu.matmul %7, %8, %cst_8 {dimension_numbers = #tpu.dot_dimension_numbers<[1], [0], [0], [1], [0, 0, 1, 1], [], []>} : vector<2x32xf32>, vector<32x22xf32>, vector<2x22xf32> -> vector<2x22xf32>
    %c0_9 = arith.constant 0 : index
    %c0_10 = arith.constant 0 : index
    %10 = vector.load %arg5[%c0_9, %c0_10] : memref<1x22xf32, #tpu.memory_space<vmem>>, vector<1x22xf32>
    %11 = vector.broadcast %10 : vector<1x22xf32> to vector<2x22xf32>
    %12 = arith.addf %9, %11 : vector<2x22xf32>
    %cst_11 = arith.constant 0.000000e+00 : f32
    %13 = vector.broadcast %cst_11 : f32 to vector<2x22xf32>
    %14 = arith.maximumf %12, %13 : vector<2x22xf32>
    %c0_12 = arith.constant 0 : index
    %c0_13 = arith.constant 0 : index
    %15 = vector.load %arg6[%c0_12, %c0_13] : memref<22x5xf32, #tpu.memory_space<vmem>>, vector<22x5xf32>
    %cst_14 = arith.constant dense<0.000000e+00> : vector<2x5xf32>
    %16 = tpu.matmul %14, %15, %cst_14 {dimension_numbers = #tpu.dot_dimension_numbers<[1], [0], [0], [1], [0, 0, 1, 1], [], []>} : vector<2x22xf32>, vector<22x5xf32>, vector<2x5xf32> -> vector<2x5xf32>
    %c0_15 = arith.constant 0 : index
    %c0_16 = arith.constant 0 : index
    %17 = vector.load %arg7[%c0_15, %c0_16] : memref<1x5xf32, #tpu.memory_space<vmem>>, vector<1x5xf32>
    %18 = vector.broadcast %17 : vector<1x5xf32> to vector<2x5xf32>
    %19 = arith.addf %16, %18 : vector<2x5xf32>
    %cst_17 = arith.constant 0.000000e+00 : f32
    %20 = vector.broadcast %cst_17 : f32 to vector<2x5xf32>
    %21 = arith.subf %20, %19 : vector<2x5xf32>
    %22 = math.exp %21 : vector<2x5xf32>
    %cst_18 = arith.constant 1.000000e+00 : f32
    %23 = vector.broadcast %cst_18 : f32 to vector<2x5xf32>
    %24 = arith.addf %23, %22 : vector<2x5xf32>
    %25 = tpu.reciprocal %24 : vector<2x5xf32> -> vector<2x5xf32>
    %c0_19 = arith.constant 0 : index
    %c0_20 = arith.constant 0 : index
    %26 = vector.load %arg8[%c0_19, %c0_20] : memref<2x5xf32, #tpu.memory_space<vmem>>, vector<2x5xf32>
    tpu.vector_store %arg8[%c0_19, %c0_20], %25 {strides = array<i32>} : memref<2x5xf32, #tpu.memory_space<vmem>>, vector<2x5xf32>,
    return
  }
  func.func @transform_0(%arg0: i32) -> (i32, i32) {
    %c0_i32 = arith.constant 0 : i32
    %c0_i32_0 = arith.constant 0 : i32
    return %arg0, %c0_i32 : i32, i32
  }
  func.func @transform_1(%arg0: i32) -> (i32, i32) {
    %c0_i32 = arith.constant 0 : i32
    %c0_i32_0 = arith.constant 0 : i32
    %c0_i32_1 = arith.constant 0 : i32
    return %c0_i32, %c0_i32_0 : i32, i32
  }
  func.func @transform_2(%arg0: i32) -> (i32, i32) {
    %c0_i32 = arith.constant 0 : i32
    %c0_i32_0 = arith.constant 0 : i32
    %c0_i32_1 = arith.constant 0 : i32
    return %c0_i32, %c0_i32_0 : i32, i32
  }
  func.func @transform_3(%arg0: i32) -> (i32, i32) {
    %c0_i32 = arith.constant 0 : i32
    %c0_i32_0 = arith.constant 0 : i32
    %c0_i32_1 = arith.constant 0 : i32
    return %c0_i32, %c0_i32_0 : i32, i32
  }
  func.func @transform_4(%arg0: i32) -> (i32, i32) {
    %c0_i32 = arith.constant 0 : i32
    %c0_i32_0 = arith.constant 0 : i32
    %c0_i32_1 = arith.constant 0 : i32
    return %c0_i32, %c0_i32_0 : i32, i32
  }
  func.func @transform_5(%arg0: i32) -> (i32, i32) {
    %c0_i32 = arith.constant 0 : i32
    %c0_i32_0 = arith.constant 0 : i32
    %c0_i32_1 = arith.constant 0 : i32
    return %c0_i32, %c0_i32_0 : i32, i32
  }
  func.func @transform_6(%arg0: i32) -> (i32, i32) {
    %c0_i32 = arith.constant 0 : i32
    %c0_i32_0 = arith.constant 0 : i32
    %c0_i32_1 = arith.constant 0 : i32
    return %c0_i32, %c0_i32_0 : i32, i32
  }
  func.func @transform_7(%arg0: i32) -> (i32, i32) {
    %c0_i32 = arith.constant 0 : i32
    %c0_i32_0 = arith.constant 0 : i32
    return %arg0, %c0_i32 : i32, i32
  }
}

</mosaic_0001>

<bundles_post_ra>
// kernel: neuralnet_forward.2
= control target key start
LH: loop header
LB: loop body
LE: loop exit
PB: predicated region body
PF: predicated region fallthrough
CT: control target
= control target key end

     0   :  { %s4035_s15 = smov 0   ;;  %s5734_s0 = inlined_call_operand.vmem [shape: f32[2,38,114], index: 0, kind: input, shape index: {}]   ;;  %s5735_s1 = inlined_call_operand.vmem [shape: f32[5,114,544], index: 1, kind: input, shape index: {}]   ;;  %s5736_s2 = inlined_call_operand.vmem [shape: f32[1,272], index: 2, kind: input, shape index: {}]   ;;  %s5737_s3 = inlined_call_operand.vmem [shape: f32[17,33], index: 3, kind: input, shape index: {}]   ;;  %s5738_s4 = inlined_call_operand.vmem [shape: f32[2,17,272], index: 4, kind: output, shape index: {}]  }
   0x1 LB: > { %s2665_s16 = sadd.s32 4294967295, %s4004_s15   ;;  %p2669_p0 = scmp.ge.s32.totalorder %s4004_s15, 1  ;;  %s4004_s15 = sphi %s4035_s15, %s14_s15  }
   0x2   : > { %p162_p1 = scmp.lt.s32.totalorder %s4004_s15, 3 }
   0x4   : > { %p163_p2 = pnand %p2669_p0, %p162_p1 }
   0x5   : > { %v2673_v0 = vld [vmem:[%s5735_s1 + $0x260] sm:$0xff] (!%p163_p2)  ;;  %v2678_v1 = vld [vmem:[%s5735_s1 + $0x288] sm:$0xff] (!%p163_p2)  ;;  %v209_v4 = vld [vmem:[%s5735_s1 + $0x30] sm:$0xff] (!%p163_p2)  ;;  %v4006_v7 = vmov (!%p163_p2), 0.0   ;;  %p4137_p3 = scmp.lt.s32.totalorder (!%p163_p2), %s2665_s16, 1  ;;  %vm380_vm0 = vcmask (!%p163_p2), 1041408  }
   0x6   : > { %166 = sbr.rel (%p163_p2) target bundleno = 855 (0x357), region = 36  ;;  %v204_v2 = vld [vmem:[%s5735_s1 + $0x8] sm:$0xff] (!%p163_p2)  ;;  %v3435_v3 = vpack.c.bf16 (!%p163_p2), %v2678_v1, %v2673_v0  ;;  %v2672_v5 = vld [vmem:[%s5735_s1 + $0x258] sm:$0xff] (!%p163_p2)  ;;  %v2677_v6 = vld [vmem:[%s5735_s1 + $0x280] sm:$0xff] (!%p163_p2)  ;;  %460 = vmatprep.mubr.f32.mxu1 (!%p163_p2), %v4006_v7  ;;  %765 = vmatprep.mubr.f32.mxu0 (!%p163_p2), %v4006_v7  ;;  %vm359_vm1 = vcmask (!%p163_p2), 1046528   ;;  %vm369_vm2 = vcmask (!%p163_p2), 932864  }
   0x7   : > { %v3512_v8 = vpack.c.bf16 (!%p163_p2), %v209_v4, %v204_v2  ;;  %v3437_v9 = vpack.c.bf16 (!%p163_p2), %v2677_v6, %v2672_v5  ;;  %v203_v10 = vld [vmem:[%s5735_s1] sm:$0xff] (!%p163_p2)  ;;  %v208_v11 = vld [vmem:[%s5735_s1 + $0x28] sm:$0xff] (!%p163_p2)  ;;  %v2683_v12 = vld [vmem:[%s5735_s1 + $0x2b0] sm:$0xff] (!%p163_p2)  ;;  %vm4008_vm3 = vmmov (!%p163_p2), 0   ;;  %vm1057_vm4 = vcmask (!%p163_p2), 1045504   ;;  %s4009_s23 = smov (!%p163_p2), 112  }
   0x8   : > { %3436 = vmatprep.subr.bf16.mxu1 (!%p163_p2), %v3435_v3  ;;  %v3514_v13 = vpack.c.bf16 (!%p163_p2), %v208_v11, %v203_v10  ;;  %v2688_v14 = vld [vmem:[%s5735_s1 + $0x2d8] sm:$0xff] (!%p163_p2)  ;;  %v219_v16 = vld [vmem:[%s5735_s1 + $0x80] sm:$0xff] (!%p163_p2)  ;;  %v2682_v19 = vld [vmem:[%s5735_s1 + $0x2a8] sm:$0xff] (!%p163_p2)  ;;  %vm1473_vm5 = vcmask (!%p163_p2), 1044480   ;;  %vm1889_vm6 = vcmask (!%p163_p2), 1043456   ;;  %vm2274_vm7 = vcmask (!%p163_p2), 916480  }
   0x9   : > { %v214_v15 = vld [vmem:[%s5735_s1 + $0x58] sm:$0xff] (!%p163_p2)  ;;  %3513 = vmatprep.subr.bf16.mxu0 (!%p163_p2), %v3512_v8  ;;  %3438 = vmatpush1.bf16.msra.mxu1 (!%p163_p2), %v3437_v9  ;;  %v3439_v17 = vpack.c.bf16 (!%p163_p2), %v2688_v14, %v2683_v12  ;;  %v2687_v20 = vld [vmem:[%s5735_s1 + $0x2d0] sm:$0xff] (!%p163_p2)  ;;  %v2693_v24 = vld [vmem:[%s5735_s1 + $0x300] sm:$0xff] (!%p163_p2)  ;;  %vm2417_vm8 = vcmask (!%p163_p2), 1040384   ;;  %vm2407_vm9 = vcmask (!%p163_p2), 269312   ;;  %vm2601_vm10 = vcmask (!%p163_p2), 130048  }
   0xa   : > { %v3516_v18 = vpack.c.bf16 (!%p163_p2), %v219_v16, %v214_v15  ;;  %v213_v21 = vld [vmem:[%s5735_s1 + $0x50] sm:$0xff] (!%p163_p2)  ;;  %3515 = vmatpush1.bf16.msra.mxu0 (!%p163_p2), %v3514_v13  ;;  %v3441_v22 = vpack.c.bf16 (!%p163_p2), %v2687_v20, %v2682_v19  ;;  %v218_v23 = vld [vmem:[%s5735_s1 + $0x78] sm:$0xff] (!%p163_p2)  ;;  %v2698_v25 = vld [vmem:[%s5735_s1 + $0x328] sm:$0xff] (!%p163_p2)  ;;  %vm2608_vm11 = vcmask (!%p163_p2), 122880  }
   0xb   : > { %3440 = vmatprep.subr.bf16.mxu1 (!%p163_p2), %v3439_v17  ;;  %v3518_v26 = vpack.c.bf16 (!%p163_p2), %v218_v23, %v213_v21  ;;  %v3443_v27 = vpack.c.bf16 (!%p163_p2), %v2698_v25, %v2693_v24  ;;  %v224_v28 = vld [vmem:[%s5735_s1 + $0xa8] sm:$0xff] (!%p163_p2)  ;;  %v229_v29 = vld [vmem:[%s5735_s1 + $0xd0] sm:$0xff] (!%p163_p2)  ;;  %v2692_v30 = vld [vmem:[%s5735_s1 + $0x2f8] sm:$0xff] (!%p163_p2) }
   0xc   : > { %3517 = vmatprep.subr.bf16.mxu0 (!%p163_p2), %v3516_v18  ;;  %v3520_v31 = vpack.c.bf16 (!%p163_p2), %v229_v29, %v224_v28  ;;  %v2697_v32 = vld [vmem:[%s5735_s1 + $0x320] sm:$0xff] (!%p163_p2)  ;;  %v228_v34 = vld [vmem:[%s5735_s1 + $0xc8] sm:$0xff] (!%p163_p2)  ;;  %v2703_v36 = vld [vmem:[%s5735_s1 + $0x350] sm:$0xff] (!%p163_p2) }
   0xd   : > { %v223_v33 = vld [vmem:[%s5735_s1 + $0xa0] sm:$0xff]  ;;  %3442 = vmatpush1.bf16.msra.mxu1 %v3441_v22  ;;  %v3445_v35 = vpack.c.bf16 %v2697_v32, %v2692_v30  ;;  %v2708_v37 = vld [vmem:[%s5735_s1 + $0x378] sm:$0xff]  ;;  %v2702_v42 = vld [vmem:[%s5735_s1 + $0x348] sm:$0xff]  ;;  %s5741_s16 = smov (!%p4137_p3, %s2665_s16), 1 }
   0xe   : > { %v234_v38 = vld [vmem:[%s5735_s1 + $0xf8] sm:$0xff]  ;;  %3519 = vmatpush1.bf16.msra.mxu0 %v3518_v26  ;;  %3444 = vmatprep.subr.bf16.mxu1 %v3443_v27  ;;  %v3522_v39 = vpack.c.bf16 %v228_v34, %v223_v33  ;;  %v3447_v40 = vpack.c.bf16 %v2708_v37, %v2703_v36  ;;  %v239_v41 = vld [vmem:[%s5735_s1 + $0x120] sm:$0xff]  ;;  %v2707_v43 = vld [vmem:[%s5735_s1 + $0x370] sm:$0xff]  ;;  %s3949_s14 = smul.u32 40, %s5741_s16 }
   0xf   : > { %3521 = vmatprep.subr.bf16.mxu0 %v3520_v31  ;;  %v3524_v44 = vpack.c.bf16 %v239_v41, %v234_v38  ;;  %v233_v45 = vld [vmem:[%s5735_s1 + $0xf0] sm:$0xff]  ;;  %v238_v46 = vld [vmem:[%s5735_s1 + $0x118] sm:$0xff]  ;;  %v2713_v47 = vld [vmem:[%s5735_s1 + $0x3a0] sm:$0xff]  ;;  %v3449_v51 = vpack.c.bf16 %v2707_v43, %v2702_v42  ;;  %s3950_s6 = smul.u32 72, %s5741_s16 }
  0x10   : > { %v2718_v48 = vld [vmem:[%s5735_s1 + $0x3c8] sm:$0xff]  ;;  %v249_v50 = vld [vmem:[%s5735_s1 + $0x170] sm:$0xff]  ;;  %v3526_v52 = vpack.c.bf16 %v238_v46, %v233_v45  ;;  %v2712_v54 = vld [vmem:[%s5735_s1 + $0x398] sm:$0xff]  ;;  %s4223_s7 = scalar_lea.vmem %s5734_s0, %s3949_s14 }
  0x11   : > { %v244_v49 = vld [vmem:[%s5735_s1 + $0x148] sm:$0xff]  ;;  %3446 = vmatpush1.bf16.msra.mxu1 %v3445_v35  ;;  %v3451_v53 = vpack.c.bf16 %v2718_v48, %v2713_v47  ;;  %v2717_v55 = vld [vmem:[%s5735_s1 + $0x3c0] sm:$0xff]  ;;  %v2723_v59 = vld [vmem:[%s5735_s1 + $0x3f0] sm:$0xff]  ;;  %s5720_s9 = scalar_lea.vmem %s5738_s4, %s3950_s6 }
  0x12   : > { %3523 = vmatpush1.bf16.msra.mxu0 %v3522_v39  ;;  %3448 = vmatprep.subr.bf16.mxu1 %v3447_v40  ;;  %v243_v56 = vld [vmem:[%s5735_s1 + $0x140] sm:$0xff]  ;;  %v3528_v57 = vpack.c.bf16 %v249_v50, %v244_v49  ;;  %v248_v58 = vld [vmem:[%s5735_s1 + $0x168] sm:$0xff]  ;;  %v2728_v60 = vld [vmem:[%s5735_s1 + $0x418] sm:$0xff]  ;;  %v3453_v63 = vpack.c.bf16 %v2717_v55, %v2712_v54 }
  0x13   : > { %3525 = vmatprep.subr.bf16.mxu0 %v3524_v44  ;;  %v254_v61 = vld [vmem:[%s5735_s1 + $0x198] sm:$0xff]  ;;  %v259_v62 = vld [vmem:[%s5735_s1 + $0x1c0] sm:$0xff]  ;;  %v3530_v0 = vpack.c.bf16 %v248_v58, %v243_v56  ;;  %v3455_v1 = vpack.c.bf16 %v2728_v60, %v2723_v59  ;;  %v2722_v2 = vld [vmem:[%s5735_s1 + $0x3e8] sm:$0xff] }
  0x14   : > { %v2727_v3 = vld [vmem:[%s5735_s1 + $0x410] sm:$0xff]  ;;  %v3532_v5 = vpack.c.bf16 %v259_v62, %v254_v61  ;;  %v258_v6 = vld [vmem:[%s5735_s1 + $0x1b8] sm:$0xff]  ;;  %v2733_v8 = vld [vmem:[%s5735_s1 + $0x440] sm:$0xff] }
  0x15   : > { %3450 = vmatpush1.bf16.msra.mxu1 %v3449_v51  ;;  %v253_v4 = vld [vmem:[%s5735_s1 + $0x190] sm:$0xff]  ;;  %v2738_v9 = vld [vmem:[%s5735_s1 + $0x468] sm:$0xff]  ;;  %v3457_v12 = vpack.c.bf16 %v2727_v3, %v2722_v2  ;;  %v2732_v15 = vld [vmem:[%s5735_s1 + $0x438] sm:$0xff] }
  0x16   : > { %3527 = vmatpush1.bf16.msra.mxu0 %v3526_v52  ;;  %3452 = vmatprep.subr.bf16.mxu1 %v3451_v53  ;;  %v264_v10 = vld [vmem:[%s5735_s1 + $0x1e8] sm:$0xff]  ;;  %v269_v11 = vld [vmem:[%s5735_s1 + $0x210] sm:$0xff]  ;;  %v3534_v13 = vpack.c.bf16 %v258_v6, %v253_v4  ;;  %v3459_v14 = vpack.c.bf16 %v2738_v9, %v2733_v8  ;;  %v2737_v16 = vld [vmem:[%s5735_s1 + $0x460] sm:$0xff]  ;;  %v4007_v52 = vmov 0.0|0.0  }
  0x17   : > { %3529 = vmatprep.subr.bf16.mxu0 %v3528_v57  ;;  %v3536_v17 = vpack.c.bf16 %v269_v11, %v264_v10  ;;  %v263_v18 = vld [vmem:[%s5735_s1 + $0x1e0] sm:$0xff]  ;;  %v268_v19 = vld [vmem:[%s5735_s1 + $0x208] sm:$0xff]  ;;  %v3461_v20 = vpack.c.bf16 %v2737_v16, %v2732_v15  ;;  %v2743_v24 = vld [vmem:[%s5735_s1 + $0x490] sm:$0x3] }
  0x18   : > { %v4232_v21 = vld [vmem:[%s4223_s7] sm:$0xff]  ;;  %v4235_v22 = vld [vmem:[%s4223_s7 + $0x8] sm:$0xff]  ;;  %v3538_v23 = vpack.c.bf16 %v268_v19, %v263_v18  ;;  %v274_v25 = vld [vmem:[%s5735_s1 + $0x238] sm:$0x3] }
  0x19   : > { %3454 = vmatpush1.bf16.msra.mxu1 %v3453_v63  ;;  %v2675_v26 = vld [vmem:[%s5735_s1 + $0x270] sm:$0xff]  ;;  %v2680_v27 = vld [vmem:[%s5735_s1 + $0x298] sm:$0xff]  ;;  %v2742_v28 = vld [vmem:[%s5735_s1 + $0x488] sm:$0x3]  ;;  %v360_v29 = vrot.slane %v4232_v21, 1  ;;  %v361_v30 = vrot.slane %v4235_v22, 1 }
  0x1a   : > { %3531 = vmatpush1.bf16.msra.mxu0 %v3530_v0  ;;  %3456 = vmatprep.subr.bf16.mxu1 %v3455_v1  ;;  %v2674_v31 = vld [vmem:[%s5735_s1 + $0x268] sm:$0xff]  ;;  %v2679_v32 = vld [vmem:[%s5735_s1 + $0x290] sm:$0xff]  ;;  %v207_v33 = vld [vmem:[%s5735_s1 + $0x20] sm:$0xff]  ;;  %v3463_v35 = vpack.c.bf16 %v2680_v27, %v2675_v26 }
  0x1b   : > { %3533 = vmatprep.subr.bf16.mxu0 %v3532_v5  ;;  %v4264_v34 = vld [vmem:[%s4223_s7 + $0x10] sm:$0xff]  ;;  %v212_v36 = vld [vmem:[%s5735_s1 + $0x48] sm:$0xff]  ;;  %v2685_v37 = vld [vmem:[%s5735_s1 + $0x2c0] sm:$0xff]  ;;  %v4281_v40 = vsel %vm359_vm1, %v360_v29, %v361_v30  ;;  %v3465_v41 = vpack.c.bf16 %v2679_v32, %v2674_v31 }
  0x1c   : > { %v2690_v38 = vld [vmem:[%s5735_s1 + $0x2e8] sm:$0xff]  ;;  %v273_v39 = vld [vmem:[%s5735_s1 + $0x230] sm:$0x3]  ;;  %v2684_v42 = vld [vmem:[%s5735_s1 + $0x2b8] sm:$0xff]  ;;  %v363_v43 = vrot.slane %v4264_v34, 1  ;;  %v3569_v44 = vpack.c.bf16 %v212_v36, %v207_v33 }
  0x1d   : > { %3458 = vmatpush1.bf16.msra.mxu1 %v3457_v12  ;;  %v3467_v45 = vpack.c.bf16 %v2690_v38, %v2685_v37  ;;  %v2689_v46 = vld [vmem:[%s5735_s1 + $0x2e0] sm:$0xff]  ;;  %v217_v47 = vld [vmem:[%s5735_s1 + $0x70] sm:$0xff]  ;;  %v4295_v48 = vld [vmem:[%s4223_s7 + $0x18] sm:$0xff] }
  0x1e   : > { %3535 = vmatpush1.bf16.msra.mxu0 %v3534_v13  ;;  %3460 = vmatprep.subr.bf16.mxu1 %v3459_v14  ;;  %v222_v49 = vld [vmem:[%s5735_s1 + $0x98] sm:$0xff]  ;;  %v2695_v50 = vld [vmem:[%s5735_s1 + $0x310] sm:$0xff]  ;;  %v3469_v53 = vpack.c.bf16 %v2689_v46, %v2684_v42  ;;  %v2694_v54 = vld [vmem:[%s5735_s1 + $0x308] sm:$0xff]  ;;  %v4316_v55 = vsel %vm359_vm1, %v361_v30, %v363_v43  ;;  %v365_v56 = vrot.slane %v4295_v48, 1 }
  0x1f   : > { %3537 = vmatprep.subr.bf16.mxu0 %v3536_v17  ;;  %v2700_v51 = vld [vmem:[%s5735_s1 + $0x338] sm:$0xff]  ;;  %v3572_v57 = vpack.c.bf16 %v222_v49, %v217_v47  ;;  %v2699_v59 = vld [vmem:[%s5735_s1 + $0x330] sm:$0xff]  ;;  %v227_v60 = vld [vmem:[%s5735_s1 + $0xc0] sm:$0xff] }
  0x20   : > { %v3471_v58 = vpack.c.bf16 %v2700_v51, %v2695_v50  ;;  %v4326_v61 = vld [vmem:[%s4223_s7 + $0x20] sm:$0x3f]  ;;  %v232_v62 = vld [vmem:[%s5735_s1 + $0xe8] sm:$0xff]  ;;  %v3473_v1 = vpack.c.bf16 %v2699_v59, %v2694_v54  ;;  %v4345_v2 = vsel %vm359_vm1, %v363_v43, %v365_v56  ;;  %v2704_v6 = vld [vmem:[%s5735_s1 + $0x358] sm:$0xff] }
  0x21   : > { %3462 = vmatpush1.bf16.msra.mxu1 %v3461_v20  ;;  %v2705_v63 = vld [vmem:[%s5735_s1 + $0x360] sm:$0xff]  ;;  %v2710_v0 = vld [vmem:[%s5735_s1 + $0x388] sm:$0xff]  ;;  %v4348_v3 = vrot.slane %v4326_v61, 1  ;;  %v3575_v4 = vpack.c.bf16 %v232_v62, %v227_v60  ;;  %v237_v9 = vld [vmem:[%s5735_s1 + $0x110] sm:$0xff] }
  0x22   : > { %3539 = vmatpush1.bf16.msra.mxu0 %v3538_v23  ;;  %2747 = vmatprep.subr.msk.mxu1 %vm380_vm0, %v2743_v24  ;;  %v3475_v5 = vpack.c.bf16 %v2710_v0, %v2705_v63  ;;  %v2709_v8 = vld [vmem:[%s5735_s1 + $0x380] sm:$0xff]  ;;  %v242_v10 = vld [vmem:[%s5735_s1 + $0x138] sm:$0xff]  ;;  %v2715_v11 = vld [vmem:[%s5735_s1 + $0x3b0] sm:$0xff] }
  0x23   : > { %2767 = vmatprep.subr.msk.mxu0 %vm380_vm0, %v274_v25  ;;  %v2720_v12 = vld [vmem:[%s5735_s1 + $0x3d8] sm:$0xff]  ;;  %v3477_v13 = vpack.c.bf16 %v2709_v8, %v2704_v6  ;;  %v4377_v14 = vsel %vm359_vm1, %v365_v56, %v4348_v3  ;;  %v3578_v15 = vpack.c.bf16 %v242_v10, %v237_v9  ;;  %v2714_v17 = vld [vmem:[%s5735_s1 + $0x3a8] sm:$0xff]  ;;  %v2719_v18 = vld [vmem:[%s5735_s1 + $0x3d0] sm:$0xff] }
  0x24   : > { %v3479_v16 = vpack.c.bf16 %v2720_v12, %v2715_v11  ;;  %v247_v19 = vld [vmem:[%s5735_s1 + $0x160] sm:$0xff]  ;;  %v252_v20 = vld [vmem:[%s5735_s1 + $0x188] sm:$0xff]  ;;  %v3481_v25 = vpack.c.bf16 %v2719_v18, %v2714_v17  ;;  %v257_v30 = vld [vmem:[%s5735_s1 + $0x1b0] sm:$0xff] }
  0x25   : > { %2748 = vmatpush1.msk.msra.mxu1 %vm380_vm0, %v2742_v28  ;;  %v2725_v23 = vld [vmem:[%s5735_s1 + $0x400] sm:$0xff]  ;;  %v2730_v24 = vld [vmem:[%s5735_s1 + $0x428] sm:$0xff]  ;;  %v3581_v26 = vpack.c.bf16 %v252_v20, %v247_v19  ;;  %v2724_v28 = vld [vmem:[%s5735_s1 + $0x3f8] sm:$0xff] }
  0x26   : > { %2768 = vmatpush1.msk.msra.mxu0 %vm380_vm0, %v273_v39  ;;  %3464 = vmatprep.subr.bf16.mxu1 %v3463_v35  ;;  %v3483_v27 = vpack.c.bf16 %v2730_v24, %v2725_v23  ;;  %v2729_v29 = vld [vmem:[%s5735_s1 + $0x420] sm:$0xff]  ;;  %v262_v31 = vld [vmem:[%s5735_s1 + $0x1d8] sm:$0xff]  ;;  %v2735_v32 = vld [vmem:[%s5735_s1 + $0x450] sm:$0xff] }
  0x27   : > { %3568 = vmatprep.subr.bf16.mxu0 %v4007_v52  ;;  %2749 = vmatmul.mubr.msk.f32.vlgmr.msra.gmra.mrb[0].mxu1 %vm369_vm2, %v4281_v40  ;;  %v2740_v33 = vld [vmem:[%s5735_s1 + $0x478] sm:$0xff]  ;;  %v3485_v35 = vpack.c.bf16 %v2729_v29, %v2724_v28  ;;  %v3584_v36 = vpack.c.bf16 %v262_v31, %v257_v30  ;;  %v2734_v38 = vld [vmem:[%s5735_s1 + $0x448] sm:$0xff]  ;;  %v2739_v39 = vld [vmem:[%s5735_s1 + $0x470] sm:$0xff] }
  0x28   : > { %3466 = vmatpush1.bf16.msra.mxu1 %v3465_v41  ;;  %2769 = vmatmul.mubr.msk.f32.vlgmr.msra.gmra.mrb[0].mxu0 %vm369_vm2, %v4232_v21  ;;  %v3487_v37 = vpack.c.bf16 %v2740_v33, %v2735_v32  ;;  %v267_v41 = vld [vmem:[%s5735_s1 + $0x200] sm:$0xff]  ;;  %v272_v42 = vld [vmem:[%s5735_s1 + $0x228] sm:$0xff]  ;;  %v3489_v43 = vpack.c.bf16 %v2739_v39, %v2734_v38  ;;  %v2788_v46 = vld [vmem:[%s5735_s1 + $0x4b8] sm:$0xff] }
  0x29   : > { %3570 = vmatpush3.bf16.msra.mxu0 %v3569_v44  ;;  %3468 = vmatprep.subr.bf16.mxu1 %v3467_v45  ;;  %v3587_v44 = vpack.c.bf16 %v272_v42, %v267_v41  ;;  %v2745_v45 = vld [vmem:[%s5735_s1 + $0x4a0] sm:$0x3]  ;;  %v2676_v49 = vld [vmem:[%s5735_s1 + $0x278] sm:$0xff]  ;;  %v277_v56 = vld [vmem:[%s5735_s1 + $0x250] sm:$0x3] }
  0x2a   : > { %3571 = vmatprep.subr.bf16.mxu0 %v4007_v52  ;;  %466 = vmatprep.mubr.f32.mxu1 %v4006_v7  ;;  %v2793_v47 = vld [vmem:[%s5735_s1 + $0x4e0] sm:$0xff]  ;;  %v2744_v51 = vld [vmem:[%s5735_s1 + $0x498] sm:$0x3]  ;;  %v2803_v59 = vld [vmem:[%s5735_s1 + $0x530] sm:$0xff] }
  0x2b   : > { %771 = vmatprep.mubr.f32.mxu0 %v4006_v7  ;;  %2750 = vmatmul.mubr.msk.f32.gmra.mrb[2].mxu1 %vm369_vm2, %v4316_v55  ;;  %v2681_v50 = vld [vmem:[%s5735_s1 + $0x2a0] sm:$0xff]  ;;  %v2792_v54 = vld [vmem:[%s5735_s1 + $0x4d8] sm:$0xff]  ;;  %v2686_v63 = vld [vmem:[%s5735_s1 + $0x2c8] sm:$0xff] }
  0x2c   : > { %3470 = vmatpush1.bf16.msra.mxu1 %v3469_v53  ;;  %2770 = vmatmul.mubr.msk.f32.gmra.mrb[2].mxu0 %vm369_vm2, %v4235_v22  ;;  %v2787_v53 = vld [vmem:[%s5735_s1 + $0x4b0] sm:$0xff]  ;;  %v3492_v60 = vpack.c.bf16 %v2681_v50, %v2676_v49  ;;  %v2808_v6 = vld [vmem:[%s5735_s1 + $0x558] sm:$0xff]  ;;  %v2813_v8 = vld [vmem:[%s5735_s1 + $0x580] sm:$0xff] }
  0x2d   : > { %3573 = vmatpush3.bf16.msra.mxu0 %v3572_v57  ;;  %3472 = vmatprep.subr.bf16.mxu1 %v3471_v58  ;;  %v3589_v57 = vpack.c.bf16 %v2793_v47, %v2788_v46  ;;  %v2798_v58 = vld [vmem:[%s5735_s1 + $0x508] sm:$0xff]  ;;  %v3591_v62 = vpack.c.bf16 %v2792_v54, %v2787_v53  ;;  %v2691_v0 = vld [vmem:[%s5735_s1 + $0x2f0] sm:$0xff]  ;;  %v2696_v11 = vld [vmem:[%s5735_s1 + $0x318] sm:$0xff] }
  0x2e   : > { %3574 = vmatprep.subr.bf16.mxu0 %v4007_v52  ;;  %472 = vmatprep.mubr.f32.mxu1 %v4006_v7  ;;  %v3495_v9 = vpack.c.bf16 %v2691_v0, %v2686_v63  ;;  %v2701_v12 = vld [vmem:[%s5735_s1 + $0x340] sm:$0xff]  ;;  %v2818_v17 = vld [vmem:[%s5735_s1 + $0x5a8] sm:$0xff]  ;;  %v2823_v18 = vld [vmem:[%s5735_s1 + $0x5d0] sm:$0xff] }
  0x2f   : > { %777 = vmatprep.mubr.f32.mxu0 %v4006_v7  ;;  %2751 = vmatmul.mubr.msk.f32.gmra.mrb[4].mxu1 %vm369_vm2, %v4345_v2  ;;  %v3498_v19 = vpack.c.bf16 %v2701_v12, %v2696_v11  ;;  %v2706_v23 = vld [vmem:[%s5735_s1 + $0x368] sm:$0xff]  ;;  %v2711_v24 = vld [vmem:[%s5735_s1 + $0x390] sm:$0xff]  ;;  %v2828_v28 = vld [vmem:[%s5735_s1 + $0x5f8] sm:$0xff] }
  0x30   : > { %3474 = vmatpush1.bf16.msra.mxu1 %v3473_v1  ;;  %2771 = vmatmul.mubr.msk.f32.gmra.mrb[4].mxu0 %vm369_vm2, %v4264_v34  ;;  %v3593_v1 = vpack.c.bf16 %v2803_v59, %v2798_v58  ;;  %v2833_v29 = vld [vmem:[%s5735_s1 + $0x620] sm:$0xff]  ;;  %v3501_v30 = vpack.c.bf16 %v2711_v24, %v2706_v23  ;;  %v2716_v32 = vld [vmem:[%s5735_s1 + $0x3b8] sm:$0xff]  ;;  %v2838_v38 = vld [vmem:[%s5735_s1 + $0x648] sm:$0xff] }
  0x31   : > { %3576 = vmatpush3.bf16.msra.mxu0 %v3575_v4  ;;  %3476 = vmatprep.subr.bf16.mxu1 %v3475_v5  ;;  %v2797_v4 = vld [vmem:[%s5735_s1 + $0x500] sm:$0xff]  ;;  %v2802_v5 = vld [vmem:[%s5735_s1 + $0x528] sm:$0xff]  ;;  %v2843_v39 = vld [vmem:[%s5735_s1 + $0x670] sm:$0xff] }
  0x32   : > { %3577 = vmatprep.subr.bf16.mxu0 %v4007_v52  ;;  %478 = vmatprep.mubr.f32.mxu1 %v4006_v7  ;;  %v3595_v10 = vpack.c.bf16 %v2802_v5, %v2797_v4  ;;  %v2721_v33 = vld [vmem:[%s5735_s1 + $0x3e0] sm:$0xff]  ;;  %v2842_v47 = vld [vmem:[%s5735_s1 + $0x668] sm:$0xff]  ;;  %v2848_v49 = vld [vmem:[%s5735_s1 + $0x698] sm:$0xff] }
  0x33   : > { %783 = vmatprep.mubr.f32.mxu0 %v4006_v7  ;;  %2752 = vmatmul.mubr.msk.f32.gmra.mrb[6].mxu1 %vm369_vm2, %v4377_v14  ;;  %v3504_v41 = vpack.c.bf16 %v2721_v33, %v2716_v32  ;;  %v2837_v46 = vld [vmem:[%s5735_s1 + $0x640] sm:$0xff]  ;;  %v2736_v54 = vld [vmem:[%s5735_s1 + $0x458] sm:$0xff]  ;;  %v2847_v58 = vld [vmem:[%s5735_s1 + $0x690] sm:$0xff] }
  0x34   : > { %3478 = vmatpush1.bf16.msra.mxu1 %v3477_v13  ;;  %2772 = vmatmul.mubr.msk.f32.gmra.mrb[6].mxu0 %vm369_vm2, %v4295_v48  ;;  %v3597_v13 = vpack.c.bf16 %v2813_v8, %v2808_v6  ;;  %v2853_v50 = vld [vmem:[%s5735_s1 + $0x6c0] sm:$0xff]  ;;  %v3611_v53 = vpack.c.bf16 %v2842_v47, %v2837_v46  ;;  %v2852_v59 = vld [vmem:[%s5735_s1 + $0x6b8] sm:$0xff]  ;;  %v2746_v4 = vld [vmem:[%s5735_s1 + $0x4a8] sm:$0x3]  ;;  %v1058_v8 = vrot.slane %v4232_v21, 2 }
  0x35   : > { %3579 = vmatpush3.bf16.msra.mxu0 %v3578_v15  ;;  %3480 = vmatprep.subr.bf16.mxu1 %v3479_v16  ;;  %v2807_v15 = vld [vmem:[%s5735_s1 + $0x550] sm:$0xff]  ;;  %v2812_v16 = vld [vmem:[%s5735_s1 + $0x578] sm:$0xff]  ;;  %v211_v0 = vld [vmem:[%s5735_s1 + $0x40] sm:$0xff] }
  0x36   : > { %3580 = vmatprep.subr.bf16.mxu0 %v4007_v52  ;;  %484 = vmatprep.mubr.f32.mxu1 %v4006_v7  ;;  %v3599_v20 = vpack.c.bf16 %v2812_v16, %v2807_v15  ;;  %v206_v63 = vld [vmem:[%s5735_s1 + $0x18] sm:$0xff]  ;;  %v205_v5 = vld [vmem:[%s5735_s1 + $0x10] sm:$0xff]  ;;  %v2857_v16 = vld [vmem:[%s5735_s1 + $0x6e0] sm:$0x3] }
  0x37   : > { %789 = vmatprep.mubr.f32.mxu0 %v4006_v7  ;;  %2753 = vmatmul.mubr.msk.f32.gmra.mrb[8].mxu1 %vm369_vm2, %v4348_v3  ;;  %v210_v6 = vld [vmem:[%s5735_s1 + $0x38] sm:$0xff]  ;;  %v3540_v11 = vpack.c.bf16 %v211_v0, %v206_v63  ;;  %v221_v15 = vld [vmem:[%s5735_s1 + $0x90] sm:$0xff]  ;;  %v215_v23 = vld [vmem:[%s5735_s1 + $0x60] sm:$0xff] }
  0x38   : > { %3482 = vmatpush1.bf16.msra.mxu1 %v3481_v25  ;;  %2773 = vmatmul.mubr.msk.f32.gmra.mrb[8].mxu0 %vm369_vm2, %v4326_v61  ;;  %v3601_v25 = vpack.c.bf16 %v2823_v18, %v2818_v17  ;;  %v2796_v12 = vld [vmem:[%s5735_s1 + $0x4f8] sm:$0xff]  ;;  %v3542_v17 = vpack.c.bf16 %v210_v6, %v205_v5  ;;  %v220_v24 = vld [vmem:[%s5735_s1 + $0x88] sm:$0xff]  ;;  %v225_v33 = vld [vmem:[%s5735_s1 + $0xb0] sm:$0xff] }
  0x39   : > { %3582 = vmatpush3.bf16.msra.mxu0 %v3581_v26  ;;  %3484 = vmatprep.subr.bf16.mxu1 %v3483_v27  ;;  %v2817_v26 = vld [vmem:[%s5735_s1 + $0x5a0] sm:$0xff]  ;;  %v2822_v27 = vld [vmem:[%s5735_s1 + $0x5c8] sm:$0xff]  ;;  %v261_v0 = vld [vmem:[%s5735_s1 + $0x1d0] sm:$0xff] }
  0x3a   : > { %3583 = vmatprep.subr.bf16.mxu0 %v4007_v52  ;;  %555 = vmatprep.mubr.f32.mxu1 %v4006_v7  ;;  %v3603_v31 = vpack.c.bf16 %v2822_v27, %v2817_v26  ;;  %v1061_v26 = vrot.slane %v4264_v34, 2  ;;  %v2806_v27 = vld [vmem:[%s5735_s1 + $0x548] sm:$0xff]  ;;  %v255_v6 = vld [vmem:[%s5735_s1 + $0x1a0] sm:$0xff] }
  0x3b   : > { %3266 = vmatprep.mubr.msk.f32.mxu0 %vm4008_vm3, %v4006_v7  ;;  %v240_v46 = vld [vmem:[%s5735_s1 + $0x128] sm:$0xff] }
  0x3c   : > { %3486 = vmatpush1.bf16.msra.mxu1 %v3485_v35  ;;  %v3605_v35 = vpack.c.bf16 %v2833_v29, %v2828_v28  ;;  %v226_v28 = vld [vmem:[%s5735_s1 + $0xb8] sm:$0xff]  ;;  %v231_v29 = vld [vmem:[%s5735_s1 + $0xe0] sm:$0xff]  ;;  %v256_v63 = vld [vmem:[%s5735_s1 + $0x1a8] sm:$0xff] }
  0x3d   : > { %3585 = vmatpush3.bf16.msra.mxu0 %v3584_v36  ;;  %3488 = vmatprep.subr.bf16.mxu1 %v3487_v37  ;;  %v2827_v36 = vld [vmem:[%s5735_s1 + $0x5f0] sm:$0xff]  ;;  %v2832_v37 = vld [vmem:[%s5735_s1 + $0x618] sm:$0xff]  ;;  %v3548_v32 = vpack.c.bf16 %v231_v29, %v226_v28  ;;  %v3560_v5 = vpack.c.bf16 %v261_v0, %v256_v63  ;;  %v2814_v63 = vld [vmem:[%s5735_s1 + $0x588] sm:$0xff] }
  0x3e   : > { %3586 = vmatprep.subr.bf16.mxu0 %v4007_v52  ;;  %v3607_v42 = vpack.c.bf16 %v2832_v37, %v2827_v36  ;;  %v1063_v37 = vrot.slane %v4295_v48, 2  ;;  %v2883_v28 = vld [vmem:[%s5735_s1 + $0x710] sm:$0xff]  ;;  %v2888_v29 = vld [vmem:[%s5735_s1 + $0x738] sm:$0xff]  ;;  %v2902_v0 = vld [vmem:[%s5735_s1 + $0x7a8] sm:$0xff] }
  0x40   : > { %3490 = vmatpush1.bf16.msra.mxu1 %v3489_v43  ;;  %v2726_v43 = vld [vmem:[%s5735_s1 + $0x408] sm:$0xff]  ;;  %v4733_v47 = vsel %vm1057_vm4, %v1061_v26, %v1063_v37 }
  0x41   : > { %3588 = vmatpush3.bf16.msra.mxu0 %v3587_v44  ;;  %2754 = vmatprep.subr.msk.mxu1 %vm380_vm0, %v2745_v45  ;;  %v2731_v44 = vld [vmem:[%s5735_s1 + $0x430] sm:$0xff]  ;;  %v3609_v45 = vpack.c.bf16 %v2843_v39, %v2838_v38  ;;  %v2816_v38 = vld [vmem:[%s5735_s1 + $0x598] sm:$0xff]  ;;  %v236_v39 = vld [vmem:[%s5735_s1 + $0x108] sm:$0xff] }
  0x42   : > { %3264 = vmatprep.subr.mxu0 %v4006_v7 }
  0x44   : > { %2755 = vmatpush1.msk.msra.mxu1 %vm380_vm0, %v2744_v51  ;;  %v3507_v51 = vpack.c.bf16 %v2731_v44, %v2726_v43 }
  0x45   : > { %3265 = vmatpush3.msk.msra.mxu0 %vm380_vm0, %v277_v56  ;;  %3491 = vmatprep.subr.bf16.mxu1 %v4007_v52  ;;  %v2741_v56 = vld [vmem:[%s5735_s1 + $0x480] sm:$0xff] }
  0x46   : > { %3590 = vmatprep.subr.bf16.mxu0 %v3589_v57  ;;  %2756 = vmatmul.mubr.msk.f32.vlgmr.msra.gmra.mrb[10].mxu1 %vm369_vm2, %v4281_v40  ;;  %v3613_v57 = vpack.c.bf16 %v2853_v50, %v2848_v49  ;;  %v4736_v49 = vrot.slane %v4326_v61, 2  ;;  %v2826_v50 = vld [vmem:[%s5735_s1 + $0x5e8] sm:$0xff] }
  0x47   : > { %3493 = vmatpush3.bf16.msra.mxu1 %v3492_v60  ;;  %3267 = vmatmul.mubr.msk.f32.vlgmr.msra.gmra.mrb[10].mxu0 %vm369_vm2, %v4232_v21  ;;  %v3510_v60 = vpack.c.bf16 %v2741_v56, %v2736_v54 }
  0x48   : > { %3592 = vmatpush1.bf16.msra.mxu0 %v3591_v62  ;;  %3494 = vmatprep.subr.bf16.mxu1 %v4007_v52  ;;  %v3615_v62 = vpack.c.bf16 %v2852_v59, %v2847_v58  ;;  %v245_v58 = vld [vmem:[%s5735_s1 + $0x150] sm:$0xff]  ;;  %v250_v59 = vld [vmem:[%s5735_s1 + $0x178] sm:$0xff] }
  0x49   : > { %3594 = vmatprep.subr.bf16.mxu0 %v3593_v1  ;;  %561 = vmatprep.mubr.f32.mxu1 %v4006_v7  ;;  %v2858_v1 = vld [vmem:[%s5735_s1 + $0x6e8] sm:$0x3] }
  0x4a   : > { %3269 = vmatprep.mubr.msk.f32.mxu0 %vm4008_vm3, %v4006_v7  ;;  %2757 = vmatmul.mubr.msk.f32.gmra.mrb[12].mxu1 %vm369_vm2, %v4316_v55 }
  0x4b   : > { %3496 = vmatpush3.bf16.msra.mxu1 %v3495_v9  ;;  %3270 = vmatmul.mubr.msk.f32.gmra.mrb[12].mxu0 %vm369_vm2, %v4235_v22  ;;  %v1059_v9 = vrot.slane %v4235_v22, 2 }
  0x4c   : > { %3596 = vmatpush1.bf16.msra.mxu0 %v3595_v10  ;;  %3497 = vmatprep.subr.bf16.mxu1 %v4007_v52  ;;  %v2791_v10 = vld [vmem:[%s5735_s1 + $0x4d0] sm:$0xff] }
  0x4d   : > { %3598 = vmatprep.subr.bf16.mxu0 %v3597_v13  ;;  %567 = vmatprep.mubr.f32.mxu1 %v4006_v7  ;;  %v216_v13 = vld [vmem:[%s5735_s1 + $0x68] sm:$0xff]  ;;  %v4666_v18 = vsel %vm1057_vm4, %v1058_v8, %v1059_v9  ;;  %v4703_v36 = vsel %vm1057_vm4, %v1059_v9, %v1061_v26  ;;  %v2795_v26 = vld [vmem:[%s5735_s1 + $0x4f0] sm:$0xff] }
  0x4e   : > { %3272 = vmatprep.mubr.msk.f32.mxu0 %vm4008_vm3, %v4006_v7  ;;  %2758 = vmatmul.mubr.msk.f32.gmra.mrb[14].mxu1 %vm369_vm2, %v4345_v2  ;;  %v260_v8 = vld [vmem:[%s5735_s1 + $0x1c8] sm:$0xff] }
  0x4f   : > { %3499 = vmatpush3.bf16.msra.mxu1 %v3498_v19  ;;  %3273 = vmatmul.mubr.msk.f32.gmra.mrb[14].mxu0 %vm369_vm2, %v4264_v34  ;;  %v3646_v19 = vpack.c.bf16 %v2796_v12, %v2791_v10  ;;  %v2846_v9 = vld [vmem:[%s5735_s1 + $0x688] sm:$0xff]  ;;  %v266_v10 = vld [vmem:[%s5735_s1 + $0x1f8] sm:$0xff]  ;;  %v3562_v12 = vpack.c.bf16 %v260_v8, %v255_v6  ;;  %v2825_v6 = vld [vmem:[%s5735_s1 + $0x5e0] sm:$0xff] }
  0x50   : > { %3600 = vmatpush1.bf16.msra.mxu0 %v3599_v20  ;;  %3500 = vmatprep.subr.bf16.mxu1 %v4007_v52  ;;  %v3544_v20 = vpack.c.bf16 %v221_v15, %v216_v13  ;;  %v2913_v8 = vld [vmem:[%s5735_s1 + $0x800] sm:$0xff] }
  0x51   : > { %3602 = vmatprep.subr.bf16.mxu0 %v3601_v25  ;;  %573 = vmatprep.mubr.f32.mxu1 %v4006_v7  ;;  %v2801_v25 = vld [vmem:[%s5735_s1 + $0x520] sm:$0xff] }
  0x52   : > { %3275 = vmatprep.mubr.msk.f32.mxu0 %vm4008_vm3, %v4006_v7  ;;  %2759 = vmatmul.mubr.msk.f32.gmra.mrb[16].mxu1 %vm369_vm2, %v4377_v14 }
  0x53   : > { %3502 = vmatpush3.bf16.msra.mxu1 %v3501_v30  ;;  %3276 = vmatmul.mubr.msk.f32.gmra.mrb[16].mxu0 %vm369_vm2, %v4295_v48  ;;  %v3546_v30 = vpack.c.bf16 %v220_v24, %v215_v23  ;;  %v276_v24 = vld [vmem:[%s5735_s1 + $0x248] sm:$0x3] }
  0x54   : > { %3604 = vmatpush1.bf16.msra.mxu0 %v3603_v31  ;;  %3503 = vmatprep.subr.bf16.mxu1 %v4007_v52  ;;  %v3649_v31 = vpack.c.bf16 %v2806_v27, %v2801_v25  ;;  %v2790_v25 = vld [vmem:[%s5735_s1 + $0x4c8] sm:$0xff]  ;;  %v275_v27 = vld [vmem:[%s5735_s1 + $0x240] sm:$0x3] }
  0x55   : > { %3606 = vmatprep.subr.bf16.mxu0 %v3605_v35  ;;  %579 = vmatprep.mubr.f32.mxu1 %v4006_v7  ;;  %v230_v35 = vld [vmem:[%s5735_s1 + $0xd8] sm:$0xff] }
  0x56   : > { %3278 = vmatprep.mubr.msk.f32.mxu0 %vm4008_vm3, %v4006_v7  ;;  %2760 = vmatmul.mubr.msk.f32.gmra.mrb[18].mxu1 %vm369_vm2, %v4348_v3 }
  0x57   : > { %3505 = vmatpush3.bf16.msra.mxu1 %v3504_v41  ;;  %3279 = vmatmul.mubr.msk.f32.gmra.mrb[18].mxu0 %vm369_vm2, %v4326_v61  ;;  %v241_v41 = vld [vmem:[%s5735_s1 + $0x130] sm:$0xff] }
  0x58   : > { %3608 = vmatpush1.bf16.msra.mxu0 %v3607_v42  ;;  %3506 = vmatprep.subr.bf16.mxu1 %v4007_v52  ;;  %v3550_v42 = vpack.c.bf16 %v230_v35, %v225_v33  ;;  %v3552_v44 = vpack.c.bf16 %v241_v41, %v236_v39  ;;  %v3617_v33 = vpack.c.bf16 %v2795_v26, %v2790_v25  ;;  %v2887_v35 = vld [vmem:[%s5735_s1 + $0x730] sm:$0xff]  ;;  %v2893_v41 = vld [vmem:[%s5735_s1 + $0x760] sm:$0xff] }
  0x59   : > { %3610 = vmatprep.subr.bf16.mxu0 %v3609_v45  ;;  %3221 = vmatprep.mubr.msk.f32.mxu1 %vm4008_vm3, %v4006_v7  ;;  %v235_v45 = vld [vmem:[%s5735_s1 + $0x100] sm:$0xff]  ;;  %v3666_v39 = vpack.c.bf16 %v2888_v29, %v2883_v28  ;;  %v2927_v29 = vld [vmem:[%s5735_s1 + $0x870] sm:$0xff] }
  0x5a   : > { %1156 = vmatprep.mubr.f32.mxu0 %v4006_v7  ;;  %v3554_v54 = vpack.c.bf16 %v240_v46, %v235_v45  ;;  %v2799_v46 = vld [vmem:[%s5735_s1 + $0x510] sm:$0xff]  ;;  %v2829_v26 = vld [vmem:[%s5735_s1 + $0x600] sm:$0xff] }
  0x5b   : > { %3508 = vmatpush3.bf16.msra.mxu1 %v3507_v51  ;;  %v246_v51 = vld [vmem:[%s5735_s1 + $0x158] sm:$0xff] }
  0x5c   : > { %3612 = vmatpush1.bf16.msra.mxu0 %v3611_v53  ;;  %3509 = vmatprep.subr.bf16.mxu1 %v4007_v52  ;;  %v251_v53 = vld [vmem:[%s5735_s1 + $0x180] sm:$0xff] }
  0x5d   : > { %3614 = vmatprep.subr.bf16.mxu0 %v3613_v57  ;;  %v3556_v57 = vpack.c.bf16 %v251_v53, %v246_v51  ;;  %v2897_v53 = vld [vmem:[%s5735_s1 + $0x780] sm:$0xff] }
  0x5f   : > { %3511 = vmatpush3.bf16.msra.mxu1 %v3510_v60  ;;  %v4766_v60 = vsel %vm1057_vm4, %v1063_v37, %v4736_v49  ;;  %v2805_v37 = vld [vmem:[%s5735_s1 + $0x540] sm:$0xff] }
  0x60   : > { %3616 = vmatpush1.bf16.msra.mxu0 %v3615_v62  ;;  %3219 = vmatprep.subr.mxu1 %v4006_v7  ;;  %v2836_v62 = vld [vmem:[%s5735_s1 + $0x638] sm:$0xff] }
  0x61   : > { %2862 = vmatprep.subr.msk.mxu0 %vm380_vm0, %v2858_v1  ;;  %v3558_v1 = vpack.c.bf16 %v250_v59, %v245_v58  ;;  %v2908_v58 = vld [vmem:[%s5735_s1 + $0x7d8] sm:$0xff] }
  0x63   : > { %3220 = vmatpush3.msk.msra.mxu1 %vm380_vm0, %v2746_v4 }
  0x64   : > { %2863 = vmatpush1.msk.msra.mxu0 %vm380_vm0, %v2857_v16  ;;  %3541 = vmatprep.subr.bf16.mxu1 %v3540_v11  ;;  %v271_v11 = vld [vmem:[%s5735_s1 + $0x220] sm:$0xff]  ;;  %v265_v16 = vld [vmem:[%s5735_s1 + $0x1f0] sm:$0xff] }
  0x65   : > { %3645 = vmatprep.subr.bf16.mxu0 %v4007_v52  ;;  %3222 = vmatmul.mubr.msk.f32.vlgmr.msra.gmra.mrb[20].mxu1 %vm369_vm2, %v4281_v40  ;;  %v2811_v40 = vld [vmem:[%s5735_s1 + $0x570] sm:$0xff]  ;;  %v3564_v15 = vpack.c.bf16 %v271_v11, %v266_v10 }
  0x66   : > { %3543 = vmatpush1.bf16.msra.mxu1 %v3542_v17  ;;  %2864 = vmatmul.mubr.msk.f32.vlgmr.msra.gmra.mrb[0].mxu0 %vm369_vm2, %v4666_v18  ;;  %v3652_v43 = vpack.c.bf16 %v2816_v38, %v2811_v40  ;;  %v270_v17 = vld [vmem:[%s5735_s1 + $0x218] sm:$0xff]  ;;  %v2861_v38 = vld [vmem:[%s5735_s1 + $0x700] sm:$0x3] }
  0x67   : > { %3647 = vmatpush3.bf16.msra.mxu0 %v3646_v19  ;;  %3545 = vmatprep.subr.bf16.mxu1 %v3544_v20  ;;  %v2856_v19 = vld [vmem:[%s5735_s1 + $0x6d8] sm:$0xff]  ;;  %v3566_v20 = vpack.c.bf16 %v270_v17, %v265_v16  ;;  %v2917_v16 = vld [vmem:[%s5735_s1 + $0x820] sm:$0xff]  ;;  %v2830_v17 = vld [vmem:[%s5735_s1 + $0x608] sm:$0xff] }
  0x68   : > { %3648 = vmatprep.subr.bf16.mxu0 %v4007_v52  ;;  %3224 = vmatprep.mubr.msk.f32.mxu1 %vm4008_vm3, %v4006_v7  ;;  %v2800_v40 = vld [vmem:[%s5735_s1 + $0x518] sm:$0xff] }
  0x69   : > { %1162 = vmatprep.mubr.f32.mxu0 %v4006_v7  ;;  %3225 = vmatmul.mubr.msk.f32.gmra.mrb[22].mxu1 %vm369_vm2, %v4316_v55  ;;  %v2821_v55 = vld [vmem:[%s5735_s1 + $0x5c0] sm:$0xff]  ;;  %v3621_v45 = vpack.c.bf16 %v2805_v37, %v2800_v40 }
  0x6a   : > { %3547 = vmatpush1.bf16.msra.mxu1 %v3546_v30  ;;  %2865 = vmatmul.mubr.msk.f32.gmra.mrb[2].mxu0 %vm369_vm2, %v4703_v36  ;;  %v3655_v56 = vpack.c.bf16 %v2826_v50, %v2821_v55  ;;  %v2789_v30 = vld [vmem:[%s5735_s1 + $0x4c0] sm:$0xff]  ;;  %v2804_v55 = vld [vmem:[%s5735_s1 + $0x538] sm:$0xff] }
  0x6b   : > { %3650 = vmatpush3.bf16.msra.mxu0 %v3649_v31  ;;  %3549 = vmatprep.subr.bf16.mxu1 %v3548_v32  ;;  %v2794_v31 = vld [vmem:[%s5735_s1 + $0x4e8] sm:$0xff]  ;;  %v2892_v50 = vld [vmem:[%s5735_s1 + $0x758] sm:$0xff]  ;;  %v3623_v59 = vpack.c.bf16 %v2804_v55, %v2799_v46 }
  0x6c   : > { %3651 = vmatprep.subr.bf16.mxu0 %v4007_v52  ;;  %3227 = vmatprep.mubr.msk.f32.mxu1 %vm4008_vm3, %v4006_v7  ;;  %v2882_v32 = vld [vmem:[%s5735_s1 + $0x708] sm:$0xff]  ;;  %v2948_v46 = vld [vmem:[%s5735_s1 + $0x918] sm:$0xff] }
  0x6d   : > { %1168 = vmatprep.mubr.f32.mxu0 %v4006_v7  ;;  %3228 = vmatmul.mubr.msk.f32.gmra.mrb[24].mxu1 %vm369_vm2, %v4345_v2  ;;  %v2831_v2 = vld [vmem:[%s5735_s1 + $0x610] sm:$0xff] }
  0x6e   : > { %3551 = vmatpush1.bf16.msra.mxu1 %v3550_v42  ;;  %2866 = vmatmul.mubr.msk.f32.gmra.mrb[4].mxu0 %vm369_vm2, %v4733_v47  ;;  %v3658_v4 = vpack.c.bf16 %v2836_v62, %v2831_v2  ;;  %v2898_v42 = vld [vmem:[%s5735_s1 + $0x788] sm:$0xff]  ;;  %v3672_v2 = vpack.c.bf16 %v2897_v53, %v2892_v50  ;;  %v2849_v53 = vld [vmem:[%s5735_s1 + $0x6a0] sm:$0xff] }
  0x6f   : > { %3653 = vmatpush3.bf16.msra.mxu0 %v3652_v43  ;;  %3553 = vmatprep.subr.bf16.mxu1 %v3552_v44  ;;  %v3619_v43 = vpack.c.bf16 %v2794_v31, %v2789_v30  ;;  %v3668_v44 = vpack.c.bf16 %v2887_v35, %v2882_v32  ;;  %v3670_v51 = vpack.c.bf16 %v2898_v42, %v2893_v41  ;;  %v2840_v30 = vld [vmem:[%s5735_s1 + $0x658] sm:$0xff]  ;;  %v2845_v31 = vld [vmem:[%s5735_s1 + $0x680] sm:$0xff] }
  0x70   : > { %3654 = vmatprep.subr.bf16.mxu0 %v4007_v52  ;;  %3230 = vmatprep.mubr.msk.f32.mxu1 %vm4008_vm3, %v4006_v7  ;;  %v2933_v32 = vld [vmem:[%s5735_s1 + $0x8a0] sm:$0xff]  ;;  %v3637_v37 = vpack.c.bf16 %v2845_v31, %v2840_v30  ;;  %v2904_v31 = vld [vmem:[%s5735_s1 + $0x7b8] sm:$0xff] }
  0x71   : > { %1174 = vmatprep.mubr.f32.mxu0 %v4006_v7  ;;  %3231 = vmatmul.mubr.msk.f32.gmra.mrb[26].mxu1 %vm369_vm2, %v4377_v14  ;;  %v2841_v14 = vld [vmem:[%s5735_s1 + $0x660] sm:$0xff] }
  0x72   : > { %3555 = vmatpush1.bf16.msra.mxu1 %v3554_v54  ;;  %2867 = vmatmul.mubr.msk.f32.gmra.mrb[6].mxu0 %vm369_vm2, %v4766_v60  ;;  %v3661_v13 = vpack.c.bf16 %v2846_v9, %v2841_v14  ;;  %v2810_v54 = vld [vmem:[%s5735_s1 + $0x568] sm:$0xff]  ;;  %v2937_v42 = vld [vmem:[%s5735_s1 + $0x8c0] sm:$0xff] }
  0x73   : > { %3656 = vmatpush3.bf16.msra.mxu0 %v3655_v56  ;;  %3557 = vmatprep.subr.bf16.mxu1 %v3556_v57  ;;  %v2815_v56 = vld [vmem:[%s5735_s1 + $0x590] sm:$0xff]  ;;  %v2918_v14 = vld [vmem:[%s5735_s1 + $0x828] sm:$0xff] }
  0x74   : > { %3657 = vmatprep.subr.bf16.mxu0 %v4007_v52  ;;  %3233 = vmatprep.mubr.msk.f32.mxu1 %vm4008_vm3, %v4006_v7  ;;  %v2903_v57 = vld [vmem:[%s5735_s1 + $0x7b0] sm:$0xff]  ;;  %v3625_v62 = vpack.c.bf16 %v2815_v56, %v2810_v54  ;;  %v2854_v54 = vld [vmem:[%s5735_s1 + $0x6c8] sm:$0xff] }
  0x75   : > { %1180 = vmatprep.mubr.f32.mxu0 %v4006_v7  ;;  %3234 = vmatmul.mubr.msk.f32.gmra.mrb[28].mxu1 %vm369_vm2, %v4348_v3  ;;  %v2851_v3 = vld [vmem:[%s5735_s1 + $0x6b0] sm:$0xff] }
  0x76   : > { %3559 = vmatpush1.bf16.msra.mxu1 %v3558_v1  ;;  %2868 = vmatmul.mubr.msk.f32.gmra.mrb[8].mxu0 %vm369_vm2, %v4736_v49  ;;  %v3664_v23 = vpack.c.bf16 %v2856_v19, %v2851_v3  ;;  %v3674_v1 = vpack.c.bf16 %v2908_v58, %v2903_v57  ;;  %v2835_v3 = vld [vmem:[%s5735_s1 + $0x630] sm:$0xff]  ;;  %v3643_v58 = vpack.c.bf16 %v2854_v54, %v2849_v53  ;;  %v2930_v53 = vld [vmem:[%s5735_s1 + $0x888] sm:$0xff] }
  0x77   : > { %3659 = vmatpush3.bf16.msra.mxu0 %v3658_v4  ;;  %3561 = vmatprep.subr.bf16.mxu1 %v3560_v5  ;;  %v2907_v4 = vld [vmem:[%s5735_s1 + $0x7d0] sm:$0xff]  ;;  %v2820_v5 = vld [vmem:[%s5735_s1 + $0x5b8] sm:$0xff]  ;;  %v3633_v25 = vpack.c.bf16 %v2835_v3, %v2830_v17 }
  0x78   : > { %3660 = vmatprep.subr.bf16.mxu0 %v4007_v52  ;;  %860 = vmatprep.mubr.f32.mxu1 %v4006_v7  ;;  %v3676_v10 = vpack.c.bf16 %v2907_v4, %v2902_v0  ;;  %v3629_v11 = vpack.c.bf16 %v2825_v6, %v2820_v5  ;;  %v2923_v19 = vld [vmem:[%s5735_s1 + $0x850] sm:$0xff]  ;;  %v5063_v5 = vld [vmem:[%s4223_s7 + $0x8] sm:$0xff] }
  0x79   : > { %3311 = vmatprep.mubr.msk.f32.mxu0 %vm4008_vm3, %v4006_v7  ;;  %v2947_v57 = vld [vmem:[%s5735_s1 + $0x910] sm:$0xff]  ;;  %v1475_v6 = vrot.slane %v5063_v5, 3 }
  0x7a   : > { %3563 = vmatpush1.bf16.msra.mxu1 %v3562_v12  ;;  %v2819_v12 = vld [vmem:[%s5735_s1 + $0x5b0] sm:$0xff] }
  0x7b   : > { %3662 = vmatpush3.bf16.msra.mxu0 %v3661_v13  ;;  %3565 = vmatprep.subr.bf16.mxu1 %v3564_v15  ;;  %v2824_v13 = vld [vmem:[%s5735_s1 + $0x5d8] sm:$0xff]  ;;  %v3678_v15 = vpack.c.bf16 %v2918_v14, %v2913_v8  ;;  %v2859_v0 = vld [vmem:[%s5735_s1 + $0x6f0] sm:$0x3]  ;;  %v2889_v14 = vld [vmem:[%s5735_s1 + $0x740] sm:$0xff] }
  0x7c   : > { %3663 = vmatprep.subr.bf16.mxu0 %v4007_v52  ;;  %v2884_v8 = vld [vmem:[%s5735_s1 + $0x718] sm:$0xff] }
  0x7e   : > { %3567 = vmatpush1.bf16.msra.mxu1 %v3566_v20  ;;  %v2928_v20 = vld [vmem:[%s5735_s1 + $0x878] sm:$0xff] }
  0x7f   : > { %3665 = vmatpush3.bf16.msra.mxu0 %v3664_v23  ;;  %2774 = vmatprep.subr.msk.mxu1 %vm380_vm0, %v276_v24  ;;  %v3631_v23 = vpack.c.bf16 %v2824_v13, %v2819_v12  ;;  %v3682_v28 = vpack.c.bf16 %v2928_v20, %v2923_v19  ;;  %v2895_v12 = vld [vmem:[%s5735_s1 + $0x770] sm:$0xff]  ;;  %v2900_v13 = vld [vmem:[%s5735_s1 + $0x798] sm:$0xff]  ;;  %v2894_v19 = vld [vmem:[%s5735_s1 + $0x768] sm:$0xff] }
  0x80   : > { %3309 = vmatprep.subr.mxu0 %v4006_v7  ;;  %v3698_v3 = vpack.c.bf16 %v2900_v13, %v2895_v12  ;;  %v2899_v20 = vld [vmem:[%s5735_s1 + $0x790] sm:$0xff] }
  0x82   : > { %2775 = vmatpush1.msk.msra.mxu1 %vm380_vm0, %v275_v27  ;;  %v2834_v27 = vld [vmem:[%s5735_s1 + $0x628] sm:$0xff] }
  0x83   : > { %3310 = vmatpush3.msk.msra.mxu0 %vm380_vm0, %v2861_v38  ;;  %3618 = vmatprep.subr.bf16.mxu1 %v3617_v33  ;;  %v2938_v33 = vld [vmem:[%s5735_s1 + $0x8c8] sm:$0xff]  ;;  %v3635_v35 = vpack.c.bf16 %v2834_v27, %v2829_v26  ;;  %v2839_v38 = vld [vmem:[%s5735_s1 + $0x650] sm:$0xff]  ;;  %v2901_v26 = vld [vmem:[%s5735_s1 + $0x7a0] sm:$0xff] }
  0x84   : > { %3667 = vmatprep.subr.bf16.mxu0 %v3666_v39  ;;  %2776 = vmatmul.mubr.msk.f32.vlgmr.msra.gmra.mrb[10].mxu1 %vm369_vm2, %v4232_v21  ;;  %v2809_v21 = vld [vmem:[%s5735_s1 + $0x560] sm:$0xff]  ;;  %v2844_v39 = vld [vmem:[%s5735_s1 + $0x678] sm:$0xff]  ;;  %v3686_v41 = vpack.c.bf16 %v2938_v33, %v2933_v32 }
  0x85   : > { %3620 = vmatpush1.bf16.msra.mxu1 %v3619_v43  ;;  %3312 = vmatmul.mubr.msk.f32.vlgmr.msra.gmra.mrb[10].mxu0 %vm369_vm2, %v4666_v18  ;;  %v3627_v9 = vpack.c.bf16 %v2814_v63, %v2809_v21  ;;  %v2850_v43 = vld [vmem:[%s5735_s1 + $0x6a8] sm:$0xff]  ;;  %v3639_v55 = vpack.c.bf16 %v2844_v39, %v2839_v38  ;;  %v2953_v63 = vld [vmem:[%s5735_s1 + $0x940] sm:$0x3]  ;;  %v2915_v38 = vld [vmem:[%s5735_s1 + $0x810] sm:$0xff] }
  0x86   : > { %3669 = vmatpush1.bf16.msra.mxu0 %v3668_v44  ;;  %3622 = vmatprep.subr.bf16.mxu1 %v3621_v45  ;;  %v2855_v44 = vld [vmem:[%s5735_s1 + $0x6d0] sm:$0xff]  ;;  %v2890_v21 = vld [vmem:[%s5735_s1 + $0x748] sm:$0xff]  ;;  %v2905_v27 = vld [vmem:[%s5735_s1 + $0x7c0] sm:$0xff] }
  0x87   : > { %3671 = vmatprep.subr.bf16.mxu0 %v3670_v51  ;;  %866 = vmatprep.mubr.f32.mxu1 %v4006_v7  ;;  %v2943_v45 = vld [vmem:[%s5735_s1 + $0x8f0] sm:$0xff]  ;;  %v3641_v51 = vpack.c.bf16 %v2855_v44, %v2850_v43  ;;  %v2909_v32 = vld [vmem:[%s5735_s1 + $0x7e0] sm:$0xff]  ;;  %v2920_v39 = vld [vmem:[%s5735_s1 + $0x838] sm:$0xff] }
  0x88   : > { %3314 = vmatprep.mubr.msk.f32.mxu0 %vm4008_vm3, %v4006_v7  ;;  %2777 = vmatmul.mubr.msk.f32.gmra.mrb[12].mxu1 %vm369_vm2, %v4235_v22  ;;  %v2912_v22 = vld [vmem:[%s5735_s1 + $0x7f8] sm:$0xff]  ;;  %v3690_v56 = vpack.c.bf16 %v2948_v46, %v2943_v45  ;;  %v2914_v43 = vld [vmem:[%s5735_s1 + $0x808] sm:$0xff]  ;;  %v2919_v44 = vld [vmem:[%s5735_s1 + $0x830] sm:$0xff] }
  0x89   : > { %3624 = vmatpush1.bf16.msra.mxu1 %v3623_v59  ;;  %3315 = vmatmul.mubr.msk.f32.gmra.mrb[12].mxu0 %vm369_vm2, %v4703_v36  ;;  %v3680_v24 = vpack.c.bf16 %v2917_v16, %v2912_v22  ;;  %v2952_v22 = vld [vmem:[%s5735_s1 + $0x938] sm:$0x3]  ;;  %v5166_v46 = vld [vmem:[%s4223_s7 + $0x20] sm:$0x3f]  ;;  %v3708_v54 = vpack.c.bf16 %v2919_v44, %v2914_v43  ;;  %v2987_v44 = vld [vmem:[%s5735_s1 + $0x9b0] sm:$0xff] }
  0x8a   : > { %3673 = vmatpush1.bf16.msra.mxu0 %v3672_v2  ;;  %3626 = vmatprep.subr.bf16.mxu1 %v3625_v62  ;;  %v2860_v2 = vld [vmem:[%s5735_s1 + $0x6f8] sm:$0x3]  ;;  %v2885_v62 = vld [vmem:[%s5735_s1 + $0x720] sm:$0xff] }
  0x8b   : > { %3675 = vmatprep.subr.bf16.mxu0 %v3674_v1  ;;  %872 = vmatprep.mubr.f32.mxu1 %v4006_v7  ;;  %v5059_v1 = vld [vmem:[%s4223_s7] sm:$0xff] }
  0x8c   : > { %3317 = vmatprep.mubr.msk.f32.mxu0 %vm4008_vm3, %v4006_v7  ;;  %2778 = vmatmul.mubr.msk.f32.gmra.mrb[14].mxu1 %vm369_vm2, %v4264_v34  ;;  %v2922_v34 = vld [vmem:[%s5735_s1 + $0x848] sm:$0xff]  ;;  %v1474_v4 = vrot.slane %v5059_v1, 3 }
  0x8d   : > { %3628 = vmatpush1.bf16.msra.mxu1 %v3627_v9  ;;  %3318 = vmatmul.mubr.msk.f32.gmra.mrb[14].mxu0 %vm369_vm2, %v4733_v47  ;;  %v3684_v40 = vpack.c.bf16 %v2927_v29, %v2922_v34  ;;  %v2886_v9 = vld [vmem:[%s5735_s1 + $0x728] sm:$0xff] }
  0x8e   : > { %3677 = vmatpush1.bf16.msra.mxu0 %v3676_v10  ;;  %3630 = vmatprep.subr.bf16.mxu1 %v3629_v11  ;;  %v3694_v10 = vpack.c.bf16 %v2890_v21, %v2885_v62  ;;  %v2891_v11 = vld [vmem:[%s5735_s1 + $0x750] sm:$0xff]  ;;  %v5091_v16 = vsel %vm1473_vm5, %v1474_v4, %v1475_v6  ;;  %v2910_v34 = vld [vmem:[%s5735_s1 + $0x7e8] sm:$0xff]  ;;  %v2940_v21 = vld [vmem:[%s5735_s1 + $0x8d8] sm:$0xff] }
  0x8f   : > { %3679 = vmatprep.subr.bf16.mxu0 %v3678_v15  ;;  %878 = vmatprep.mubr.f32.mxu1 %v4006_v7  ;;  %v3696_v15 = vpack.c.bf16 %v2889_v14, %v2884_v8  ;;  %v3723_v17 = vpack.c.bf16 %v2891_v11, %v2886_v9  ;;  %v3702_v30 = vpack.c.bf16 %v2910_v34, %v2905_v27  ;;  %v2935_v62 = vld [vmem:[%s5735_s1 + $0x8b0] sm:$0xff]  ;;  %v2941_v14 = vld [vmem:[%s5735_s1 + $0x8e0] sm:$0xff]  ;;  %v2978_v27 = vld [vmem:[%s5735_s1 + $0x968] sm:$0xff] }
  0x90   : > { %3320 = vmatprep.mubr.msk.f32.mxu0 %vm4008_vm3, %v4006_v7  ;;  %2779 = vmatmul.mubr.msk.f32.gmra.mrb[16].mxu1 %vm369_vm2, %v4295_v48  ;;  %v2932_v48 = vld [vmem:[%s5735_s1 + $0x898] sm:$0xff]  ;;  %v3714_v4 = vpack.c.bf16 %v2940_v21, %v2935_v62  ;;  %v2939_v8 = vld [vmem:[%s5735_s1 + $0x8d0] sm:$0xff]  ;;  %v2945_v9 = vld [vmem:[%s5735_s1 + $0x900] sm:$0xff] }
  0x91   : > { %3632 = vmatpush1.bf16.msra.mxu1 %v3631_v23  ;;  %3321 = vmatmul.mubr.msk.f32.gmra.mrb[16].mxu0 %vm369_vm2, %v4766_v60  ;;  %v3688_v50 = vpack.c.bf16 %v2937_v42, %v2932_v48  ;;  %v2896_v23 = vld [vmem:[%s5735_s1 + $0x778] sm:$0xff]  ;;  %v3704_v48 = vpack.c.bf16 %v2909_v32, %v2904_v31  ;;  %v3706_v42 = vpack.c.bf16 %v2920_v39, %v2915_v38  ;;  %v2983_v34 = vld [vmem:[%s5735_s1 + $0x990] sm:$0xff]  ;;  %v2982_v32 = vld [vmem:[%s5735_s1 + $0x988] sm:$0xff] }
  0x92   : > { %3681 = vmatpush1.bf16.msra.mxu0 %v3680_v24  ;;  %3634 = vmatprep.subr.bf16.mxu1 %v3633_v25  ;;  %v5103_v24 = vld [vmem:[%s4223_s7 + $0x10] sm:$0xff]  ;;  %v3726_v29 = vpack.c.bf16 %v2901_v26, %v2896_v23  ;;  %v2980_v23 = vld [vmem:[%s5735_s1 + $0x978] sm:$0xff]  ;;  %v2954_v26 = vld [vmem:[%s5735_s1 + $0x948] sm:$0x3]  ;;  %v3743_v38 = vpack.c.bf16 %v2983_v34, %v2978_v27 }
  0x93   : > { %3683 = vmatprep.subr.bf16.mxu0 %v3682_v28  ;;  %884 = vmatprep.mubr.f32.mxu1 %v4006_v7  ;;  %v1477_v25 = vrot.slane %v5103_v24, 3  ;;  %v3700_v28 = vpack.c.bf16 %v2899_v20, %v2894_v19  ;;  %v2955_v20 = vld [vmem:[%s5735_s1 + $0x950] sm:$0x3]  ;;  %v2988_v39 = vld [vmem:[%s5735_s1 + $0x9b8] sm:$0xff]  ;;  %v2997_v62 = vld [vmem:[%s5735_s1 + $0xa00] sm:$0xff] }
  0x94   : > { %3323 = vmatprep.mubr.msk.f32.mxu0 %vm4008_vm3, %v4006_v7  ;;  %2780 = vmatmul.mubr.msk.f32.gmra.mrb[18].mxu1 %vm369_vm2, %v4326_v61  ;;  %v2942_v61 = vld [vmem:[%s5735_s1 + $0x8e8] sm:$0xff]  ;;  %v2999_v21 = vld [vmem:[%s5735_s1 + $0xa10] sm:$0xff]  ;;  %v3024_v27 = vld [vmem:[%s5735_s1 + $0xad8] sm:$0xff] }
  0x95   : > { %3636 = vmatpush1.bf16.msra.mxu1 %v3635_v35  ;;  %3324 = vmatmul.mubr.msk.f32.gmra.mrb[18].mxu0 %vm369_vm2, %v4736_v49  ;;  %v3692_v59 = vpack.c.bf16 %v2947_v57, %v2942_v61  ;;  %v5131_v33 = vsel %vm1473_vm5, %v1475_v6, %v1477_v25  ;;  %v5134_v35 = vld [vmem:[%s4223_s7 + $0x18] sm:$0xff]  ;;  %v2934_v6 = vld [vmem:[%s5735_s1 + $0x8a8] sm:$0xff] }
  0x96   : > { %3685 = vmatpush1.bf16.msra.mxu0 %v3684_v40  ;;  %3638 = vmatprep.subr.bf16.mxu1 %v3637_v37  ;;  %v1479_v40 = vrot.slane %v5134_v35, 3  ;;  %v2911_v37 = vld [vmem:[%s5735_s1 + $0x7f0] sm:$0xff]  ;;  %v2924_v57 = vld [vmem:[%s5735_s1 + $0x858] sm:$0xff]  ;;  %v3716_v11 = vpack.c.bf16 %v2939_v8, %v2934_v6 }
  0x97   : > { %3687 = vmatprep.subr.bf16.mxu0 %v3686_v41  ;;  %1251 = vmatprep.mubr.f32.mxu1 %v4006_v7  ;;  %v3015_v6 = vld [vmem:[%s5735_s1 + $0xa90] sm:$0xff]  ;;  %v3008_v8 = vld [vmem:[%s5735_s1 + $0xa58] sm:$0xff] }
  0x98   : > { %1572 = vmatprep.mubr.f32.mxu0 %v4006_v7  ;;  %v5163_v45 = vsel %vm1473_vm5, %v1477_v25, %v1479_v40  ;;  %v2985_v25 = vld [vmem:[%s5735_s1 + $0x9a0] sm:$0xff] }
  0x99   : > { %3640 = vmatpush1.bf16.msra.mxu1 %v3639_v55  ;;  %v5169_v55 = vrot.slane %v5166_v46, 3  ;;  %v3771_v31 = vpack.c.bf16 %v2985_v25, %v2980_v23  ;;  %v3017_v25 = vld [vmem:[%s5735_s1 + $0xaa0] sm:$0xff] }
  0x9a   : > { %3689 = vmatpush1.bf16.msra.mxu0 %v3688_v50  ;;  %3642 = vmatprep.subr.bf16.mxu1 %v3641_v51  ;;  %v2921_v50 = vld [vmem:[%s5735_s1 + $0x840] sm:$0xff] }
  0x9b   : > { %3691 = vmatprep.subr.bf16.mxu0 %v3690_v56  ;;  %v2925_v51 = vld [vmem:[%s5735_s1 + $0x860] sm:$0xff] }
  0x9c   : > { %v3710_v61 = vpack.c.bf16 %v2930_v53, %v2925_v51  ;;  %v2992_v53 = vld [vmem:[%s5735_s1 + $0x9d8] sm:$0xff] }
  0x9d   : > { %3644 = vmatpush1.bf16.msra.mxu1 %v3643_v58  ;;  %v2929_v58 = vld [vmem:[%s5735_s1 + $0x880] sm:$0xff] }
  0x9e   : > { %3693 = vmatpush1.bf16.msra.mxu0 %v3692_v59  ;;  %2869 = vmatprep.subr.msk.mxu1 %vm380_vm0, %v2860_v2  ;;  %v5198_v59 = vsel %vm1473_vm5, %v1479_v40, %v5169_v55  ;;  %v2931_v2 = vld [vmem:[%s5735_s1 + $0x890] sm:$0xff] }
  0x9f   : > { %2957 = vmatprep.subr.msk.mxu0 %vm380_vm0, %v2953_v63  ;;  %v3712_v63 = vpack.c.bf16 %v2929_v58, %v2924_v57  ;;  %v2995_v40 = vld [vmem:[%s5735_s1 + $0x9f0] sm:$0xff] }
  0xa0   : > { %v3003_v57 = vld [vmem:[%s5735_s1 + $0xa30] sm:$0xff] }
  0xa1   : > { %2870 = vmatpush1.msk.msra.mxu1 %vm380_vm0, %v2859_v0 }
  0xa2   : > { %2958 = vmatpush1.msk.msra.mxu0 %vm380_vm0, %v2952_v22  ;;  %3695 = vmatprep.subr.bf16.mxu1 %v3694_v10  ;;  %v2950_v10 = vld [vmem:[%s5735_s1 + $0x928] sm:$0xff]  ;;  %v2944_v22 = vld [vmem:[%s5735_s1 + $0x8f8] sm:$0xff] }
  0xa3   : > { %3722 = vmatprep.subr.bf16.mxu0 %v4007_v52  ;;  %2871 = vmatmul.mubr.msk.f32.vlgmr.msra.gmra.mrb[10].mxu1 %vm369_vm2, %v4666_v18  ;;  %v2906_v18 = vld [vmem:[%s5735_s1 + $0x7c8] sm:$0xff]  ;;  %v3718_v13 = vpack.c.bf16 %v2950_v10, %v2945_v9 }
  0xa4   : > { %2959 = vmatmul.mubr.msk.f32.vlgmr.msra.gmra.mrb[0].mxu0 %vm369_vm2, %v5091_v16  ;;  %3697 = vmatpush1.bf16.msra.mxu1 %v3696_v15  ;;  %v3729_v41 = vpack.c.bf16 %v2911_v37, %v2906_v18  ;;  %v2949_v15 = vld [vmem:[%s5735_s1 + $0x920] sm:$0xff]  ;;  %v2990_v18 = vld [vmem:[%s5735_s1 + $0x9c8] sm:$0xff]  ;;  %v2956_v37 = vld [vmem:[%s5735_s1 + $0x958] sm:$0x3] }
  0xa5   : > { %3724 = vmatpush3.bf16.msra.mxu0 %v3723_v17  ;;  %3699 = vmatprep.subr.bf16.mxu1 %v3698_v3  ;;  %v2951_v17 = vld [vmem:[%s5735_s1 + $0x930] sm:$0xff]  ;;  %v3720_v3 = vpack.c.bf16 %v2949_v15, %v2944_v22  ;;  %v3775_v43 = vpack.c.bf16 %v2995_v40, %v2990_v18  ;;  %v3020_v15 = vld [vmem:[%s5735_s1 + $0xab8] sm:$0xff] }
  0xa6   : > { %3725 = vmatprep.subr.bf16.mxu0 %v4007_v52  ;;  %1257 = vmatprep.mubr.f32.mxu1 %v4006_v7 }
  0xa7   : > { %1578 = vmatprep.mubr.f32.mxu0 %v4006_v7  ;;  %2872 = vmatmul.mubr.msk.f32.gmra.mrb[12].mxu1 %vm369_vm2, %v4703_v36  ;;  %v2916_v36 = vld [vmem:[%s5735_s1 + $0x818] sm:$0xff] }
  0xa8   : > { %3701 = vmatpush1.bf16.msra.mxu1 %v3700_v28  ;;  %2960 = vmatmul.mubr.msk.f32.gmra.mrb[2].mxu0 %vm369_vm2, %v5131_v33  ;;  %v3732_v56 = vpack.c.bf16 %v2921_v50, %v2916_v36  ;;  %v2977_v28 = vld [vmem:[%s5735_s1 + $0x960] sm:$0xff]  ;;  %v2994_v50 = vld [vmem:[%s5735_s1 + $0x9e8] sm:$0xff] }
  0xa9   : > { %3727 = vmatpush3.bf16.msra.mxu0 %v3726_v29  ;;  %3703 = vmatprep.subr.bf16.mxu1 %v3702_v30  ;;  %v2979_v29 = vld [vmem:[%s5735_s1 + $0x970] sm:$0xff]  ;;  %v2984_v30 = vld [vmem:[%s5735_s1 + $0x998] sm:$0xff]  ;;  %v2989_v36 = vld [vmem:[%s5735_s1 + $0x9c0] sm:$0xff] }
  0xaa   : > { %3728 = vmatprep.subr.bf16.mxu0 %v4007_v52  ;;  %1263 = vmatprep.mubr.f32.mxu1 %v4006_v7  ;;  %v3777_v58 = vpack.c.bf16 %v2994_v50, %v2989_v36 }
  0xab   : > { %1584 = vmatprep.mubr.f32.mxu0 %v4006_v7  ;;  %2873 = vmatmul.mubr.msk.f32.gmra.mrb[14].mxu1 %vm369_vm2, %v4733_v47  ;;  %v2926_v47 = vld [vmem:[%s5735_s1 + $0x868] sm:$0xff] }
  0xac   : > { %3705 = vmatpush1.bf16.msra.mxu1 %v3704_v48  ;;  %2961 = vmatmul.mubr.msk.f32.gmra.mrb[4].mxu0 %vm369_vm2, %v5163_v45  ;;  %v3735_v0 = vpack.c.bf16 %v2931_v2, %v2926_v47  ;;  %v2993_v48 = vld [vmem:[%s5735_s1 + $0x9e0] sm:$0xff]  ;;  %v3749_v47 = vpack.c.bf16 %v2992_v53, %v2987_v44  ;;  %v3043_v44 = vld [vmem:[%s5735_s1 + $0xb70] sm:$0xff] }
  0xad   : > { %3730 = vmatpush3.bf16.msra.mxu0 %v3729_v41  ;;  %3707 = vmatprep.subr.bf16.mxu1 %v3706_v42  ;;  %v3773_v41 = vpack.c.bf16 %v2984_v30, %v2979_v29  ;;  %v3745_v42 = vpack.c.bf16 %v2982_v32, %v2977_v28  ;;  %v3747_v51 = vpack.c.bf16 %v2993_v48, %v2988_v39  ;;  %v3030_v28 = vld [vmem:[%s5735_s1 + $0xb08] sm:$0xff]  ;;  %v3035_v29 = vld [vmem:[%s5735_s1 + $0xb30] sm:$0xff]  ;;  %v3028_v30 = vld [vmem:[%s5735_s1 + $0xaf8] sm:$0xff] }
  0xae   : > { %3731 = vmatprep.subr.bf16.mxu0 %v4007_v52  ;;  %1269 = vmatprep.mubr.f32.mxu1 %v4006_v7  ;;  %v3791_v40 = vpack.c.bf16 %v3035_v29, %v3030_v28  ;;  %v3034_v39 = vld [vmem:[%s5735_s1 + $0xb28] sm:$0xff]  ;;  %v3039_v53 = vld [vmem:[%s5735_s1 + $0xb50] sm:$0xff] }
  0xaf   : > { %1590 = vmatprep.mubr.f32.mxu0 %v4006_v7  ;;  %2874 = vmatmul.mubr.msk.f32.gmra.mrb[16].mxu1 %vm369_vm2, %v4766_v60  ;;  %v2936_v60 = vld [vmem:[%s5735_s1 + $0x8b8] sm:$0xff] }
  0xb0   : > { %3709 = vmatpush1.bf16.msra.mxu1 %v3708_v54  ;;  %2962 = vmatmul.mubr.msk.f32.gmra.mrb[6].mxu0 %vm369_vm2, %v5198_v59  ;;  %v3738_v12 = vpack.c.bf16 %v2941_v14, %v2936_v60  ;;  %v3000_v54 = vld [vmem:[%s5735_s1 + $0xa18] sm:$0xff]  ;;  %v3013_v60 = vld [vmem:[%s5735_s1 + $0xa80] sm:$0xff] }
  0xb1   : > { %3733 = vmatpush3.bf16.msra.mxu0 %v3732_v56  ;;  %3711 = vmatprep.subr.bf16.mxu1 %v3710_v61  ;;  %v3005_v56 = vld [vmem:[%s5735_s1 + $0xa40] sm:$0xff]  ;;  %v2998_v61 = vld [vmem:[%s5735_s1 + $0xa08] sm:$0xff]  ;;  %v3755_v22 = vpack.c.bf16 %v3013_v60, %v3008_v8  ;;  %v2991_v8 = vld [vmem:[%s5735_s1 + $0x9d0] sm:$0xff] }
  0xb2   : > { %3734 = vmatprep.subr.bf16.mxu0 %v4007_v52  ;;  %1275 = vmatprep.mubr.f32.mxu1 %v4006_v7  ;;  %v3779_v2 = vpack.c.bf16 %v3005_v56, %v3000_v54  ;;  %v3044_v54 = vld [vmem:[%s5735_s1 + $0xb78] sm:$0xff] }
  0xb3   : > { %1596 = vmatprep.mubr.f32.mxu0 %v4006_v7  ;;  %2875 = vmatmul.mubr.msk.f32.gmra.mrb[18].mxu1 %vm369_vm2, %v4736_v49  ;;  %v2946_v49 = vld [vmem:[%s5735_s1 + $0x908] sm:$0xff]  ;;  %v2996_v60 = vld [vmem:[%s5735_s1 + $0x9f8] sm:$0xff] }
  0xb4   : > { %3713 = vmatpush1.bf16.msra.mxu1 %v3712_v63  ;;  %2963 = vmatmul.mubr.msk.f32.gmra.mrb[8].mxu0 %vm369_vm2, %v5169_v55  ;;  %v3741_v19 = vpack.c.bf16 %v2951_v17, %v2946_v49  ;;  %v3004_v63 = vld [vmem:[%s5735_s1 + $0xa38] sm:$0xff]  ;;  %v3025_v49 = vld [vmem:[%s5735_s1 + $0xae0] sm:$0xff]  ;;  %v3018_v17 = vld [vmem:[%s5735_s1 + $0xaa8] sm:$0xff] }
  0xb5   : > { %3736 = vmatpush3.bf16.msra.mxu0 %v3735_v0  ;;  %3715 = vmatprep.subr.bf16.mxu1 %v3714_v4  ;;  %v3002_v0 = vld [vmem:[%s5735_s1 + $0xa28] sm:$0xff]  ;;  %v3781_v14 = vpack.c.bf16 %v3004_v63, %v2999_v21  ;;  %v3787_v23 = vpack.c.bf16 %v3025_v49, %v3020_v15  ;;  %v3048_v21 = vld [vmem:[%s5735_s1 + $0xb98] sm:$0x3]  ;;  %v2981_v63 = vld [vmem:[%s5735_s1 + $0x980] sm:$0xff] }
  0xb6   : > { %3737 = vmatprep.subr.bf16.mxu0 %v4007_v52  ;;  %1667 = vmatprep.mubr.f32.mxu1 %v4006_v7  ;;  %v3010_v4 = vld [vmem:[%s5735_s1 + $0xa68] sm:$0xff]  ;;  %v3753_v9 = vpack.c.bf16 %v3002_v0, %v2997_v62  ;;  %v1891_v62 = vrot.slane %v5063_v5, 4  ;;  %v3047_v5 = vld [vmem:[%s5735_s1 + $0xb90] sm:$0x3]  ;;  %v3021_v49 = vld [vmem:[%s5735_s1 + $0xac0] sm:$0xff] }
  0xb7   : > { %3356 = vmatprep.mubr.msk.f32.mxu0 %vm4008_vm3, %v4006_v7  ;;  %v3783_v10 = vpack.c.bf16 %v3015_v6, %v3010_v4  ;;  %v1893_v4 = vrot.slane %v5103_v24, 4 }
  0xb8   : > { %3717 = vmatpush1.bf16.msra.mxu1 %v3716_v11  ;;  %v3007_v11 = vld [vmem:[%s5735_s1 + $0xa50] sm:$0xff] }
  0xb9   : > { %3739 = vmatpush3.bf16.msra.mxu0 %v3738_v12  ;;  %3719 = vmatprep.subr.bf16.mxu1 %v3718_v13  ;;  %v3009_v12 = vld [vmem:[%s5735_s1 + $0xa60] sm:$0xff]  ;;  %v3014_v13 = vld [vmem:[%s5735_s1 + $0xa88] sm:$0xff]  ;;  %v1894_v24 = vsel %vm1889_vm6, %v1891_v62, %v1893_v4 }
  0xba   : > { %3740 = vmatprep.subr.bf16.mxu0 %v4007_v52 }
  0xbc   : > { %3721 = vmatpush1.bf16.msra.mxu1 %v3720_v3  ;;  %v3023_v3 = vld [vmem:[%s5735_s1 + $0xad0] sm:$0xff] }
  0xbd   : > { %3742 = vmatpush3.bf16.msra.mxu0 %v3741_v19  ;;  %2964 = vmatprep.subr.msk.mxu1 %vm380_vm0, %v2955_v20  ;;  %v3785_v19 = vpack.c.bf16 %v3014_v13, %v3009_v12  ;;  %v3759_v34 = vpack.c.bf16 %v3023_v3, %v3018_v17  ;;  %v1897_v12 = vrot.slane %v5166_v46, 4  ;;  %v3026_v17 = vld [vmem:[%s5735_s1 + $0xae8] sm:$0xff] }
  0xbe   : > { %3354 = vmatprep.subr.mxu0 %v4006_v7  ;;  %v3812_v3 = vpack.c.bf16 %v3026_v17, %v3021_v49 }
  0xc0   : > { %2965 = vmatpush1.msk.msra.mxu1 %vm380_vm0, %v2954_v26  ;;  %v3019_v26 = vld [vmem:[%s5735_s1 + $0xab0] sm:$0xff] }
  0xc1   : > { %3355 = vmatpush3.msk.msra.mxu0 %vm380_vm0, %v2956_v37  ;;  %3772 = vmatprep.subr.bf16.mxu1 %v3771_v31  ;;  %v3033_v31 = vld [vmem:[%s5735_s1 + $0xb20] sm:$0xff]  ;;  %v3789_v32 = vpack.c.bf16 %v3024_v27, %v3019_v26  ;;  %v3027_v37 = vld [vmem:[%s5735_s1 + $0xaf0] sm:$0xff]  ;;  %v3046_v26 = vld [vmem:[%s5735_s1 + $0xb88] sm:$0xff] }
  0xc2   : > { %3744 = vmatprep.subr.bf16.mxu0 %v3743_v38  ;;  %2966 = vmatmul.mubr.msk.f32.vlgmr.msra.gmra.mrb[10].mxu1 %vm369_vm2, %v5091_v16  ;;  %v3029_v38 = vld [vmem:[%s5735_s1 + $0xb00] sm:$0xff]  ;;  %v3763_v48 = vpack.c.bf16 %v3033_v31, %v3028_v30 }
  0xc3   : > { %3357 = vmatmul.mubr.msk.f32.vlgmr.msra.gmra.mrb[10].mxu0 %vm369_vm2, %v5091_v16  ;;  %3774 = vmatpush1.bf16.msra.mxu1 %v3773_v41  ;;  %v3751_v16 = vpack.c.bf16 %v3003_v57, %v2998_v61  ;;  %v3040_v41 = vld [vmem:[%s5735_s1 + $0xb58] sm:$0xff]  ;;  %v3793_v36 = vpack.c.bf16 %v3034_v39, %v3029_v38  ;;  %v3037_v61 = vld [vmem:[%s5735_s1 + $0xb40] sm:$0xff]  ;;  %v3797_v57 = vpack.c.bf16 %v3044_v54, %v3039_v53 }
  0xc4   : > { %3746 = vmatpush1.bf16.msra.mxu0 %v3745_v42  ;;  %3776 = vmatprep.subr.bf16.mxu1 %v3775_v43  ;;  %v3045_v42 = vld [vmem:[%s5735_s1 + $0xb80] sm:$0xff]  ;;  %v3038_v43 = vld [vmem:[%s5735_s1 + $0xb48] sm:$0xff] }
  0xc5   : > { %3748 = vmatprep.subr.bf16.mxu0 %v3747_v51  ;;  %1673 = vmatprep.mubr.f32.mxu1 %v4006_v7  ;;  %v3795_v51 = vpack.c.bf16 %v3045_v42, %v3040_v41  ;;  %v3767_v56 = vpack.c.bf16 %v3043_v44, %v3038_v43 }
  0xc6   : > { %3359 = vmatprep.mubr.msk.f32.mxu0 %vm4008_vm3, %v4006_v7  ;;  %2967 = vmatmul.mubr.msk.f32.gmra.mrb[12].mxu1 %vm369_vm2, %v5131_v33 }
  0xc7   : > { %3778 = vmatpush1.bf16.msra.mxu1 %v3777_v58  ;;  %3360 = vmatmul.mubr.msk.f32.gmra.mrb[12].mxu0 %vm369_vm2, %v5131_v33  ;;  %v3012_v33 = vld [vmem:[%s5735_s1 + $0xa78] sm:$0xff] }
  0xc8   : > { %3750 = vmatpush1.bf16.msra.mxu0 %v3749_v47  ;;  %3780 = vmatprep.subr.bf16.mxu1 %v3779_v2  ;;  %v3757_v20 = vpack.c.bf16 %v3012_v33, %v3007_v11  ;;  %v3050_v47 = vld [vmem:[%s5735_s1 + $0xba8] sm:$0x3]  ;;  %v1890_v2 = vrot.slane %v5059_v1, 4  ;;  %v3049_v1 = vld [vmem:[%s5735_s1 + $0xba0] sm:$0x3]  ;;  %v3016_v33 = vld [vmem:[%s5735_s1 + $0xa98] sm:$0xff] }
  0xc9   : > { %3752 = vmatprep.subr.bf16.mxu0 %v3751_v16  ;;  %1679 = vmatprep.mubr.f32.mxu1 %v4006_v7  ;;  %v2986_v16 = vld [vmem:[%s5735_s1 + $0x9a8] sm:$0xff] }
  0xca   : > { %3362 = vmatprep.mubr.msk.f32.mxu0 %vm4008_vm3, %v4006_v7  ;;  %2968 = vmatmul.mubr.msk.f32.gmra.mrb[14].mxu1 %vm369_vm2, %v5163_v45  ;;  %v5496_v0 = vsel %vm1889_vm6, %v1890_v2, %v1891_v62  ;;  %v3800_v6 = vpack.c.bf16 %v2986_v16, %v2981_v63  ;;  %v3006_v11 = vld [vmem:[%s5735_s1 + $0xa48] sm:$0xff] }
  0xcb   : > { %3782 = vmatpush1.bf16.msra.mxu1 %v3781_v14  ;;  %3363 = vmatmul.mubr.msk.f32.gmra.mrb[14].mxu0 %vm369_vm2, %v5163_v45  ;;  %v3022_v45 = vld [vmem:[%s5735_s1 + $0xac8] sm:$0xff]  ;;  %v1895_v14 = vrot.slane %v5134_v35, 4 }
  0xcc   : > { %3754 = vmatpush1.bf16.msra.mxu0 %v3753_v9  ;;  %3784 = vmatprep.subr.bf16.mxu1 %v3783_v10  ;;  %v3761_v18 = vpack.c.bf16 %v3022_v45, %v3017_v25  ;;  %v3803_v9 = vpack.c.bf16 %v2996_v60, %v2991_v8  ;;  %v3001_v10 = vld [vmem:[%s5735_s1 + $0xa20] sm:$0xff]  ;;  %v3051_v45 = vld [vmem:[%s5735_s1 + $0xbb0] sm:$0x3] }
  0xcd   : > { %3756 = vmatprep.subr.bf16.mxu0 %v3755_v22  ;;  %1685 = vmatprep.mubr.f32.mxu1 %v4006_v7  ;;  %v1896_v35 = vsel %vm1889_vm6, %v1893_v4, %v1895_v14  ;;  %v3806_v13 = vpack.c.bf16 %v3006_v11, %v3001_v10  ;;  %v3011_v22 = vld [vmem:[%s5735_s1 + $0xa70] sm:$0xff]  ;;  %v1898_v46 = vsel %vm1889_vm6, %v1895_v14, %v1897_v12  ;;  %v3041_v25 = vld [vmem:[%s5735_s1 + $0xb60] sm:$0xff] }
  0xce   : > { %3365 = vmatprep.mubr.msk.f32.mxu0 %vm4008_vm3, %v4006_v7  ;;  %2969 = vmatmul.mubr.msk.f32.gmra.mrb[16].mxu1 %vm369_vm2, %v5198_v59  ;;  %v3809_v15 = vpack.c.bf16 %v3016_v33, %v3011_v22  ;;  %v3818_v27 = vpack.c.bf16 %v3046_v26, %v3041_v25 }
  0xcf   : > { %3786 = vmatpush1.bf16.msra.mxu1 %v3785_v19  ;;  %3366 = vmatmul.mubr.msk.f32.gmra.mrb[16].mxu0 %vm369_vm2, %v5198_v59  ;;  %v3032_v59 = vld [vmem:[%s5735_s1 + $0xb18] sm:$0xff]  ;;  %v3031_v19 = vld [vmem:[%s5735_s1 + $0xb10] sm:$0xff] }
  0xd0   : > { %3758 = vmatpush1.bf16.msra.mxu0 %v3757_v20  ;;  %3788 = vmatprep.subr.bf16.mxu1 %v3787_v23  ;;  %v3765_v50 = vpack.c.bf16 %v3032_v59, %v3027_v37  ;;  %v3036_v20 = vld [vmem:[%s5735_s1 + $0xb38] sm:$0xff] }
  0xd1   : > { %3760 = vmatprep.subr.bf16.mxu0 %v3759_v34  ;;  %1691 = vmatprep.mubr.f32.mxu1 %v4006_v7  ;;  %v3815_v23 = vpack.c.bf16 %v3036_v20, %v3031_v19 }
  0xd2   : > { %3368 = vmatprep.mubr.msk.f32.mxu0 %vm4008_vm3, %v4006_v7  ;;  %2970 = vmatmul.mubr.msk.f32.gmra.mrb[18].mxu1 %vm369_vm2, %v5169_v55 }
  0xd3   : > { %3790 = vmatpush1.bf16.msra.mxu1 %v3789_v32  ;;  %3369 = vmatmul.mubr.msk.f32.gmra.mrb[18].mxu0 %vm369_vm2, %v5169_v55  ;;  %v3042_v55 = vld [vmem:[%s5735_s1 + $0xb68] sm:$0xff] }
  0xd4   : > { %3762 = vmatpush1.bf16.msra.mxu0 %v3761_v18  ;;  %3792 = vmatprep.subr.bf16.mxu1 %v3791_v40  ;;  %v3769_v58 = vpack.c.bf16 %v3042_v55, %v3037_v61 }
  0xd5   : > { %3764 = vmatprep.subr.bf16.mxu0 %v3763_v48  ;;  %1988 = vmatprep.mubr.f32.mxu0 %v4006_v7 }
  0xd6   : > { %2083 = vmatprep.mubr.f32.mxu1 %v4006_v7 }
  0xd7   : > { %3794 = vmatpush1.bf16.msra.mxu1 %v3793_v36 }
  0xd8   : > { %3766 = vmatpush1.bf16.msra.mxu0 %v3765_v50  ;;  %3796 = vmatprep.subr.bf16.mxu1 %v3795_v51 }
  0xd9   : > { %3768 = vmatprep.subr.bf16.mxu0 %v3767_v56 }
  0xdb   : > { %3798 = vmatpush1.bf16.msra.mxu1 %v3797_v57 }
  0xdc   : > { %3770 = vmatpush1.bf16.msra.mxu0 %v3769_v58  ;;  %3059 = vmatprep.subr.msk.mxu1 %vm380_vm0, %v3050_v47 }
  0xdd   : > { %3052 = vmatprep.subr.msk.mxu0 %vm380_vm0, %v3048_v21 }
  0xdf   : > { %3060 = vmatpush1.msk.msra.mxu1 %vm380_vm0, %v3049_v1 }
  0xe0   : > { %3053 = vmatpush1.msk.msra.mxu0 %vm380_vm0, %v3047_v5  ;;  %3061 = vmatmul.mubr.msk.f32.vlgmr.msra.gmra.mrb[10].mxu1 %vm369_vm2, %v5496_v0 }
  0xe1   : > { %3054 = vmatmul.mubr.msk.f32.vlgmr.msra.gmra.mrb[0].mxu0 %vm369_vm2, %v5496_v0  ;;  %3799 = vmatprep.subr.bf16.mxu0 %v4007_v52 }
  0xe2   : > { %3801 = vmatpush3.bf16.msra.mxu0 %v3800_v6  ;;  %1994 = vmatprep.mubr.f32.mxu0 %v4006_v7 }
  0xe3   : > { %2089 = vmatprep.mubr.f32.mxu1 %v4006_v7  ;;  %3802 = vmatprep.subr.bf16.mxu0 %v4007_v52 }
  0xe4   : > { %3062 = vmatmul.mubr.msk.f32.gmra.mrb[12].mxu1 %vm369_vm2, %v1894_v24 }
  0xe5   : > { %3055 = vmatmul.mubr.msk.f32.gmra.mrb[2].mxu0 %vm369_vm2, %v1894_v24  ;;  %2095 = vmatprep.mubr.f32.mxu1 %v4006_v7 }
  0xe6   : > { %3804 = vmatpush3.bf16.msra.mxu0 %v3803_v9  ;;  %2000 = vmatprep.mubr.f32.mxu0 %v4006_v7 }
  0xe7   : > { %3805 = vmatprep.subr.bf16.mxu0 %v4007_v52 }
  0xe8   : > { %3063 = vmatmul.mubr.msk.f32.gmra.mrb[14].mxu1 %vm369_vm2, %v1896_v35 }
  0xe9   : > { %3056 = vmatmul.mubr.msk.f32.gmra.mrb[4].mxu0 %vm369_vm2, %v1896_v35  ;;  %2101 = vmatprep.mubr.f32.mxu1 %v4006_v7 }
  0xea   : > { %3807 = vmatpush3.bf16.msra.mxu0 %v3806_v13  ;;  %2006 = vmatprep.mubr.f32.mxu0 %v4006_v7 }
  0xeb   : > { %3808 = vmatprep.subr.bf16.mxu0 %v4007_v52 }
  0xec   : > { %3064 = vmatmul.mubr.msk.f32.gmra.mrb[16].mxu1 %vm369_vm2, %v1898_v46 }
  0xed   : > { %3057 = vmatmul.mubr.msk.f32.gmra.mrb[6].mxu0 %vm369_vm2, %v1898_v46  ;;  %2107 = vmatprep.mubr.f32.mxu1 %v4006_v7 }
  0xee   : > { %3810 = vmatpush3.bf16.msra.mxu0 %v3809_v15  ;;  %2012 = vmatprep.mubr.f32.mxu0 %v4006_v7 }
  0xef   : > { %3811 = vmatprep.subr.bf16.mxu0 %v4007_v52 }
  0xf0   : > { %3065 = vmatmul.mubr.msk.f32.gmra.mrb[18].mxu1 %vm369_vm2, %v1897_v12 }
  0xf1   : > { %3058 = vmatmul.mubr.msk.f32.gmra.mrb[8].mxu0 %vm369_vm2, %v1897_v12  ;;  %2491 = vmatprep.mubr.f32.mxu1 %v4006_v7 }
  0xf2   : > { %3813 = vmatpush3.bf16.msra.mxu0 %v3812_v3  ;;  %3401 = vmatprep.mubr.msk.f32.mxu0 %vm4008_vm3, %v4006_v7 }
  0xf3   : > { %3814 = vmatprep.subr.bf16.mxu0 %v4007_v52 }
  0xf6   : > { %3816 = vmatpush3.bf16.msra.mxu0 %v3815_v23 }
  0xf7   : > { %3817 = vmatprep.subr.bf16.mxu0 %v4007_v52 }
  0xfa   : > { %3819 = vmatpush3.bf16.msra.mxu0 %v3818_v27  ;;  %v462_v34 = vpop.f32.mrb[0].mxu1 }
  0xfb   : > { %3399 = vmatprep.subr.mxu0 %v4006_v7  ;;  %v464_v28 = vpop.f32.mrb[1].mxu1 }
  0xfe   : > { %3400 = vmatpush3.msk.msra.mxu0 %vm380_vm0, %v3051_v45  ;;  %v468_v29 = vpop.f32.mrb[2].mxu1 }
  0xff   : > { %3402 = vmatmul.mubr.msk.f32.vlgmr.msra.gmra.mrb[10].mxu0 %vm369_vm2, %v5496_v0  ;;  %v470_v30 = vpop.f32.mrb[3].mxu1 }
 0x100   : > { %3404 = vmatprep.mubr.msk.f32.mxu0 %vm4008_vm3, %v4006_v7 }
 0x102   : > { %v474_v31 = vpop.f32.mrb[4].mxu1 }
 0x103   : > { %3405 = vmatmul.mubr.msk.f32.gmra.mrb[12].mxu0 %vm369_vm2, %v1894_v24  ;;  %v476_v32 = vpop.f32.mrb[5].mxu1 }
 0x104   : > { %3407 = vmatprep.mubr.msk.f32.mxu0 %vm4008_vm3, %v4006_v7 }
 0x106   : > { %v480_v18 = vpop.f32.mrb[6].mxu1 }
 0x107   : > { %3408 = vmatmul.mubr.msk.f32.gmra.mrb[14].mxu0 %vm369_vm2, %v1896_v35  ;;  %v482_v40 = vpop.f32.mrb[7].mxu1 }
 0x108   : > { %3410 = vmatprep.mubr.msk.f32.mxu0 %vm4008_vm3, %v4006_v7 }
 0x10a   : > { %v486_v37 = vpop.f32.mrb[8].mxu1 }
 0x10b   : > { %3411 = vmatmul.mubr.msk.f32.gmra.mrb[16].mxu0 %vm369_vm2, %v1898_v46  ;;  %v488_v38 = vpop.f32.mrb[9].mxu1 }
 0x10c   : > { %3413 = vmatprep.mubr.msk.f32.mxu0 %vm4008_vm3, %v4006_v7 }
 0x10f   : > { %3414 = vmatmul.mubr.msk.f32.gmra.mrb[18].mxu0 %vm369_vm2, %v1897_v12 }
 0x138   : > { %v652_v39 = vpop.f32.mrb[20].mxu1 }
 0x139   : > { %v3223_v48 = vpop.f32.mrb[21].mxu1 }
 0x13c   : > { %v657_v59 = vpop.f32.mrb[22].mxu1 }
 0x13d   : > { %v3226_v41 = vpop.f32.mrb[23].mxu1 }
 0x140   : > { %v662_v42 = vpop.f32.mrb[24].mxu1 }
 0x141   : > { %v3229_v43 = vpop.f32.mrb[25].mxu1 }
 0x144   : > { %v667_v44 = vpop.f32.mrb[26].mxu1 }
 0x145   : > { %v3232_v36 = vpop.f32.mrb[27].mxu1 }
 0x148   : > { %v672_v50 = vpop.f32.mrb[28].mxu1 }
 0x149   : > { %v3235_v51 = vpop.f32.mrb[29].mxu1 }
 0x1b3   : > { %v5591_v53 = vpop.f32.mrb[10].mxu1 }
 0x1b4   : > { %v1990_v54 = vpop.f32.mrb[0].mxu0  ;;  %v2087_v56 = vpop.f32.mrb[11].mxu1 }
 0x1b5   : > { %v5593_v61 = vadd.f32 %v1990_v54, %v462_v34  ;;  %v1992_v55 = vpop.f32.mrb[1].mxu0 }
 0x1b6   : > { %v5595_v57 = vadd.f32 %v1992_v55, %v464_v28 }
 0x1b7   : > { %v5597_v58 = vpop.f32.mrb[12].mxu1 }
 0x1b8   : > { %v1996_v47 = vpop.f32.mrb[2].mxu0  ;;  %v2093_v2 = vpop.f32.mrb[13].mxu1  ;;  %v3963_v62 = vpack.i.bf16 %v5597_v58, %v5591_v53 }
 0x1b9   : > { %v5601_v21 = vadd.f32 %v1996_v47, %v468_v29  ;;  %v1998_v63 = vpop.f32.mrb[3].mxu0 }
 0x1ba   : > { %v5603_v16 = vadd.f32 %v1998_v63, %v470_v30  ;;  %3964 = vrot.lane.b32.xlu1 %v3963_v62, %s4009_s23 }
 0x1bb   : > { %v5606_v1 = vpop.f32.mrb[14].mxu1 }
 0x1bc   : > { %v2002_v5 = vpop.f32.mrb[4].mxu0  ;;  %v2099_v0 = vpop.f32.mrb[15].mxu1 }
 0x1bd   : > { %v5608_v4 = vadd.f32 %v2002_v5, %v474_v31  ;;  %v2004_v6 = vpop.f32.mrb[5].mxu0 }
 0x1be   : > { %v5610_v8 = vadd.f32 %v2004_v6, %v476_v32 }
 0x1bf   : > { %v5612_v60 = vpop.f32.mrb[16].mxu1 }
 0x1c0   : > { %v2008_v24 = vpop.f32.mrb[6].mxu0  ;;  %v2105_v14 = vpop.f32.mrb[17].mxu1 }
 0x1c1   : > { %v5614_v9 = vadd.f32 %v2008_v24, %v480_v18  ;;  %v2010_v10 = vpop.f32.mrb[7].mxu0  ;;  %v3968_v11 = vpack.i.bf16 %v2105_v14, %v5606_v1 }
 0x1c2   : > { %v5617_v35 = vadd.f32 %v2010_v10, %v482_v40 }
 0x1c3   : > { %3969 = vrot.lane.b32.xlu0 %v3968_v11, %s4009_s23  ;;  %v5620_v12 = vpop.f32.mrb[18].mxu1 }
 0x1c4   : > { %v2014_v13 = vpop.f32.mrb[8].mxu0  ;;  %v2111_v22 = vpop.f32.mrb[19].mxu1 }
 0x1c5   : > { %v5622_v33 = vadd.f32 %v2014_v13, %v486_v37  ;;  %v2016_v46 = vpop.f32.mrb[9].mxu0 }
 0x1c6   : > { %v5624_v15 = vadd.f32 %v2016_v46, %v488_v38 }
 0x1d2   : > { %v2180_v49 = vpop.f32.mrb[10].mxu0 }
 0x1d3   : > { %v3844_v17 = vadd.f32 %v2180_v49, %v652_v39  ;;  %v3403_v3 = vpop.f32.mrb[11].mxu0 }
 0x1d5   : > { %v3973_v19 = vpack.i.bf16 %v3844_v17, %v2087_v56 }
 0x1d6   : > { %v2185_v20 = vpop.f32.mrb[12].mxu0 }
 0x1d7   : > { %v3845_v23 = vadd.f32 %v2185_v20, %v657_v59  ;;  %v3406_v25 = vpop.f32.mrb[13].mxu0  ;;  %3974 = vrot.lane.b32.xlu0 %v3973_v19, %s4009_s23 }
 0x1d9   : > { %v3978_v26 = vpack.i.bf16 %v3845_v23, %v2093_v2 }
 0x1da   : > { %v2190_v27 = vpop.f32.mrb[14].mxu0 }
 0x1db   : > { %v3846_v34 = vadd.f32 %v2190_v27, %v662_v42  ;;  %v3409_v45 = vpop.f32.mrb[15].mxu0  ;;  %3979 = vrot.lane.b32.xlu0 %v3978_v26, %s4009_s23 }
 0x1dd   : > { %v3983_v28 = vpack.i.bf16 %v3846_v34, %v2099_v0 }
 0x1de   : > { %v2195_v29 = vpop.f32.mrb[16].mxu0 }
 0x1df   : > { %v3847_v30 = vadd.f32 %v2195_v29, %v667_v44  ;;  %v3412_v31 = vpop.f32.mrb[17].mxu0  ;;  %3984 = vrot.lane.b32.xlu1 %v3983_v28, %s4009_s23  ;;  %2270 = vrot.lane.b32.xlu0 %v2111_v22, %s4009_s23 }
 0x1e1   : > { %v3988_v32 = vpack.i.bf16 %v5612_v60, %v3847_v30 }
 0x1e2   : > { %v2200_v18 = vpop.f32.mrb[18].mxu0 }
 0x1e3   : > { %v3848_v40 = vadd.f32 %v2200_v18, %v672_v50  ;;  %v3415_v37 = vpop.f32.mrb[19].mxu0  ;;  %3989 = vrot.lane.b32.xlu1 %v3988_v32, %s4009_s23  ;;  %2268 = vrot.lane.b32.xlu0 %v5620_v12, %s4009_s23 }
 0x1e7   : > { %2272 = vrot.lane.b32.xlu1 %v3848_v40, %s4009_s23 }
 0x22c   : > { %v3965_v39 = vpop.permute.xlu1 %3964 }
 0x22d   : > { %v3966_v59 = vunpack.i.l.bf16 %v3965_v39  ;;  %v3967_v50 = vunpack.i.h.bf16 %v3965_v39 }
 0x235   : > { %v3970_v38 = vpop.permute.xlu0 %3969 }
 0x236   : > { %v3972_v5 = vunpack.i.h.bf16 %v3970_v38  ;;  %v3971_v0 = vunpack.i.l.bf16 %v3970_v38 }
 0x249   : > { %v3975_v48 = vpop.permute.xlu0 %3974 }
 0x24a   : > { %v3977_v41 = vunpack.i.h.bf16 %v3975_v48  ;;  %v3976_v42 = vunpack.i.l.bf16 %v3975_v48 }
 0x24c   : > { %v2275_v43 = vsel %vm2274_vm7, %v3966_v59, %v3976_v42  ;;  %v2276_v44 = vsel %vm2274_vm7, %v3976_v42, %v3977_v41  ;;  %v5638_v51 = vmax.f32 %v5591_v53, %v3977_v41 }
 0x24d   : > { %v3980_v36 = vpop.permute.xlu0 %3979  ;;  %v5641_v55 = vmax.f32 %v5593_v61, %v2275_v43  ;;  %v2301_v47 = vmax.f32 %v5595_v57, %v2276_v44 }
 0x24e   : > { %v3982_v54 = vunpack.i.h.bf16 %v3980_v36  ;;  %v3981_v56 = vunpack.i.l.bf16 %v3980_v36  ;;  %v2336_v61 = vrot.slane %v5638_v51, 1 }
 0x24f   : > { %v2333_v13 = vrot.slane %v2301_v47, 1 }
 0x250   : > { %v5645_v2 = vmax.f32 %v5597_v58, %v3982_v54  ;;  %v2277_v62 = vsel %vm2274_vm7, %v3967_v50, %v3981_v56  ;;  %v2278_v63 = vsel %vm2274_vm7, %v3981_v56, %v3982_v54  ;;  %v2330_v58 = vrot.slane %v5641_v55, 1 }
 0x251   : > { %v2303_v6 = vmax.f32 %v5601_v21, %v2277_v62  ;;  %v2304_v53 = vmax.f32 %v5603_v16, %v2278_v63  ;;  %v3985_v24 = vpop.permute.xlu1 %3984  ;;  %v2271_v14 = vpop.permute.xlu0 %2270 }
 0x252   : > { %v2337_v10 = vrot.slane %v5645_v2, 1  ;;  %v3987_v57 = vunpack.i.h.bf16 %v3985_v24  ;;  %v3986_v11 = vunpack.i.l.bf16 %v3985_v24 }
 0x253   : > { %v2331_v22 = vrot.slane %v2303_v6, 1  ;;  %v2334_v46 = vrot.slane %v2304_v53, 1 }
 0x254   : > { %v2338_v49 = vsel %vm359_vm1, %v2336_v61, %v2337_v10  ;;  %v2308_v17 = vmax.f32 %v5606_v1, %v3987_v57  ;;  %v2279_v21 = vsel %vm2274_vm7, %v3971_v0, %v3986_v11  ;;  %v2280_v16 = vsel %vm2274_vm7, %v3986_v11, %v3987_v57 }
 0x255   : > { %v2306_v3 = vmax.f32 %v5608_v4, %v2279_v21  ;;  %v2307_v19 = vmax.f32 %v5610_v8, %v2280_v16  ;;  %v3990_v20 = vpop.permute.xlu1 %3989  ;;  %v2269_v23 = vpop.permute.xlu0 %2268  ;;  %v2335_v25 = vsel %vm359_vm1, %v2333_v13, %v2334_v46  ;;  %v2332_v26 = vsel %vm359_vm1, %v2330_v58, %v2331_v22  ;;  %v2387_v16 = vld [vmem:[%s5737_s3] sm:$0xff] }
 0x256   : > { %v2343_v27 = vrot.slane %v2308_v17, 1  ;;  %v3992_v34 = vunpack.i.h.bf16 %v3990_v20  ;;  %v3991_v45 = vunpack.i.l.bf16 %v3990_v20  ;;  %v2283_v28 = vsel %vm2274_vm7, %v2269_v23, %v2271_v14 }
 0x257   : > { %v2339_v1 = vrot.slane %v2306_v3, 1  ;;  %v2341_v29 = vrot.slane %v2307_v19, 1  ;;  %v2312_v30 = vmax.f32 %v5622_v33, %v2283_v28  ;;  %v2373_v31 = vmax.f32 %v2301_v47, %v2335_v25 }
 0x258   : > { %v2344_v4 = vsel %vm359_vm1, %v2337_v10, %v2343_v27  ;;  %v2281_v8 = vsel %vm2274_vm7, %v3992_v34, %v3972_v5  ;;  %v2282_v32 = vsel %vm2274_vm7, %v3972_v5, %v3991_v45  ;;  %v2311_v18 = vmax.f32 %v5612_v60, %v3991_v45 }
 0x259   : > { %v2309_v40 = vmax.f32 %v5614_v9, %v2281_v8  ;;  %v2310_v37 = vmax.f32 %v5617_v35, %v2282_v32  ;;  %v2273_v38 = vpop.permute.xlu1 %2272  ;;  %v2342_v39 = vsel %vm359_vm1, %v2334_v46, %v2341_v29  ;;  %v2351_v44 = vrot.slane %v2312_v30, 1 }
 0x25a   : > { %v2349_v48 = vrot.slane %v2311_v18, 1  ;;  %v2284_v59 = vsel %vm2274_vm7, %v2271_v14, %v2273_v38  ;;  %v2314_v33 = vmax.f32 %v5620_v12, %v2273_v38  ;;  %v2376_v41 = vmax.f32 %v2304_v53, %v2342_v39 }
 0x25b   : > { %v2345_v42 = vrot.slane %v2309_v40, 1  ;;  %v2347_v43 = vrot.slane %v2310_v37, 1  ;;  %v2313_v36 = vmax.f32 %v5624_v15, %v2284_v59  ;;  %v2340_v35 = vsel %vm359_vm1, %v2331_v22, %v2339_v1 }
 0x25c   : > { %v2350_v60 = vsel %vm359_vm1, %v2343_v27, %v2349_v48  ;;  %v2355_v50 = vrot.slane %v2314_v33, 1  ;;  %v3820_v9 = vpack.c.bf16 %v2376_v41, %v2373_v31  ;;  %v2372_v47 = vmax.f32 %v5641_v55, %v2332_v26 }
 0x25d   : > { %v2352_v54 = vsel %vm359_vm1, %v2345_v42, %v2351_v44  ;;  %v2353_v56 = vrot.slane %v2313_v36, 1  ;;  %v2375_v62 = vmax.f32 %v2303_v6, %v2340_v35  ;;  %v2348_v63 = vsel %vm359_vm1, %v2341_v29, %v2347_v43 }
 0x25e   : > { %v2356_v12 = vsel %vm359_vm1, %v2349_v48, %v2355_v50  ;;  %3821 = vmatprep.subr.bf16.mxu1 %v3820_v9  ;;  %v2346_v5 = vsel %vm359_vm1, %v2339_v1, %v2345_v42  ;;  %v2379_v24 = vmax.f32 %v2307_v19, %v2348_v63  ;;  %v2381_v10 = vmax.f32 %v2309_v40, %v2352_v54  ;;  %v2390_v19 = vld [vmem:[%s5736_s2] sm:$0x7] }
 0x25f   : > { %v2383_v15 = vmax.f32 %v2311_v18, %v2356_v12  ;;  %v3822_v0 = vpack.c.bf16 %v2375_v62, %v2372_v47  ;;  %v2354_v53 = vsel %vm359_vm1, %v2347_v43, %v2353_v56  ;;  %v2378_v61 = vmax.f32 %v2306_v3, %v2346_v5 }
 0x260   : > { %v2382_v14 = vmax.f32 %v2310_v37, %v2354_v53  ;;  %v2374_v57 = vmax.f32 %v5638_v51, %v2338_v49  ;;  %v2377_v55 = vmax.f32 %v5645_v2, %v2344_v4  ;;  %v2380_v6 = vmax.f32 %v2308_v17, %v2350_v60  ;;  %v2388_v51 = vld [vmem:[%s5737_s3 + $0x8] sm:$0xff]  ;;  %v2389_v2 = vld [vmem:[%s5737_s3 + $0x10] sm:$0x1] }
 0x261   : > { %3823 = vmatpush1.bf16.msra.mxu1 %v3822_v0  ;;  %v3826_v58 = vpack.c.bf16 %v2381_v10, %v2378_v61  ;;  %v2385_v46 = vmax.f32 %v2313_v36, %v2353_v56  ;;  %v2384_v21 = vmax.f32 %v2312_v30, %v2351_v44  ;;  %v2386_v49 = vmax.f32 %v2314_v33, %v2355_v50 }
 0x262   : > { %v3824_v11 = vpack.c.bf16 %v2382_v14, %v2379_v24  ;;  %v3829_v13 = vpack.c.bf16 %v2377_v55, %v2374_v57  ;;  %v3832_v22 = vpack.c.bf16 %v2383_v15, %v2380_v6 }
 0x264   : > { %3825 = vmatprep.subr.bf16.mxu1 %v3824_v11 }
 0x265   : > { %3827 = vmatpush1.bf16.msra.mxu1 %v3826_v58 }
 0x266   : > { %3072 = vmatprep.subr.msk.mxu1 %vm2417_vm8, %v2385_v46 }
 0x269   : > { %3073 = vmatpush1.msk.msra.mxu1 %vm2417_vm8, %v2384_v21 }
 0x26a   : > { %3828 = vmatprep.subr.bf16.mxu1 %v4007_v52  ;;  %3074 = vmatmul.mubr.msk.f32.vlgmr.msra.gmra.mrb[30].mxu1 %vm2407_vm9, %v2387_v16 }
 0x26b   : > { %3830 = vmatpush3.bf16.msra.mxu1 %v3829_v13  ;;  %2497 = vmatprep.mubr.f32.mxu1 %v4006_v7 }
 0x26c   : > { %3831 = vmatprep.subr.bf16.mxu1 %v4007_v52  ;;  %v2392_v52 = vlaneseq }
 0x26e   : > { %3075 = vmatmul.mubr.msk.f32.gmra.mrb[32].mxu1 %vm2407_vm9, %v2388_v51  ;;  %v2393_v17 = vshrl.u32 %v2392_v52, 7 }
 0x26f   : > { %3833 = vmatpush3.bf16.msra.mxu1 %v3832_v22  ;;  %2503 = vmatprep.mubr.f32.mxu1 %v4006_v7 }
 0x270   : > { %3424 = vmatprep.subr.mxu1 %v4006_v7  ;;  %v2394_v3 = vsub.s32 0, %v2393_v17  ;;  %v2398_v20 = vsub.s32 1, %v2393_v17  ;;  %v2402_v31 = vsub.s32 2, %v2393_v17 }
 0x272   : > { %3076 = vmatmul.mubr.msk.f32.gmra.mrb[34].mxu1 %vm2407_vm9, %v2389_v2  ;;  %v2395_v23 = vrot.slane %v2390_v19, %v2394_v3  ;;  %v2399_v25 = vrot.slane %v2390_v19, %v2398_v20  ;;  %v2403_v38 = vrot.slane %v2390_v19, %v2402_v31 }
 0x273   : > { %3425 = vmatpush3.msk.msra.mxu1 %vm2417_vm8, %v2386_v49  ;;  %3426 = vmatprep.mubr.msk.f32.mxu1 %vm4008_vm3, %v4006_v7 }
 0x276   : > { %3427 = vmatmul.mubr.msk.f32.vlgmr.msra.gmra.mrb[36].mxu1 %vm2407_vm9, %v2387_v16 }
 0x277   : > { %3429 = vmatprep.mubr.msk.f32.mxu1 %vm4008_vm3, %v4006_v7 }
 0x27a   : > { %3430 = vmatmul.mubr.msk.f32.gmra.mrb[38].mxu1 %vm2407_vm9, %v2388_v51 }
 0x27b   : > { %3432 = vmatprep.mubr.msk.f32.mxu1 %vm4008_vm3, %v4006_v7 }
 0x27e   : > { %3433 = vmatmul.mubr.msk.f32.gmra.mrb[40].mxu1 %vm2407_vm9, %v2389_v2 }
 0x33d   : > { %v2493_v26 = vpop.f32.mrb[30].mxu1 }
 0x33e   : > { %v2494_v27 = vadd.f32 %v2493_v26, %v2395_v23  ;;  %v2495_v34 = vpop.f32.mrb[31].mxu1 }
 0x33f   : > { %v2496_v7 = vadd.f32 %v2495_v34, %v2399_v25 }
 0x340   : > { %v2590_v45 = vmax.f32 %v2494_v27, 0.0 }
 0x341   : > { %v2591_v28 = vmax.f32 %v2496_v7, 0.0  ;;  %v2499_v1 = vpop.f32.mrb[32].mxu1 }
 0x342   : > { %2599 = vst [vmem:[%s5720_s9] sm:$0xff] %v2590_v45  ;;  %v2500_v29 = vadd.f32 %v2499_v1, %v2395_v23  ;;  %v2501_v30 = vpop.f32.mrb[33].mxu1 }
 0x343   : > { %2600 = vst [vmem:[%s5720_s9 + $0x8] sm:$0xff] %v2591_v28  ;;  %v2502_v4 = vadd.f32 %v2501_v30, %v2399_v25 }
 0x344   : > { %v2593_v8 = vmax.f32 %v2500_v29, 0.0 }
 0x345   : > { %v2594_v32 = vmax.f32 %v2502_v4, 0.0  ;;  %v2505_v18 = vpop.f32.mrb[34].mxu1 }
 0x346   : > { %2603 = vst [vmem:[%s5720_s9 + $0x18] sm:$0xff] %v2593_v8  ;;  %v2506_v40 = vadd.f32 %v2505_v18, %v2395_v23  ;;  %v2507_v37 = vpop.f32.mrb[35].mxu1 }
 0x347   : > { %2604 = vst [vmem:[%s5720_s9 + $0x20] sm:$0xff] %v2594_v32  ;;  %v2508_v39 = vadd.f32 %v2507_v37, %v2399_v25 }
 0x348   : > { %v2596_v48 = vmax.f32 %v2506_v40, 0.0 }
 0x349   : > { %v2597_v59 = vmax.f32 %v2508_v39, 0.0  ;;  %v2576_v33 = vpop.f32.mrb[36].mxu1 }
 0x34a   : > { %2606 = vst [vmem:[%s5720_s9 + $0x30] sm:$0x1] %v2596_v48  ;;  %v2577_v41 = vadd.f32 %v2576_v33, %v2403_v38  ;;  %v3428_v42 = vpop.f32.mrb[37].mxu1 }
 0x34b   : > { %2607 = vst [vmem:[%s5720_s9 + $0x38] sm:$0x1] %v2597_v59 }
 0x34c   : > { %v2592_v43 = vmax.f32 %v2577_v41, 0.0 }
 0x34d   : > { %v2581_v44 = vpop.f32.mrb[38].mxu1 }
 0x34e   : > { %2602 = vst.msk [vmem:[%s5720_s9 + $0x10] sm:$0xff] %vm2601_vm10, %v2592_v43  ;;  %v2582_v36 = vadd.f32 %v2581_v44, %v2403_v38  ;;  %v3431_v60 = vpop.f32.mrb[39].mxu1 }
 0x350   : > { %v2595_v50 = vmax.f32 %v2582_v36, 0.0 }
 0x351   : > { %v2586_v9 = vpop.f32.mrb[40].mxu1 }
 0x352   : > { %2605 = vst.msk [vmem:[%s5720_s9 + $0x28] sm:$0xff] %vm2601_vm10, %v2595_v50  ;;  %v2587_v35 = vadd.f32 %v2586_v9, %v2403_v38  ;;  %v3434_v54 = vpop.f32.mrb[41].mxu1 }
 0x354   : > { %v2598_v56 = vmax.f32 %v2587_v35, 0.0 }
 0x356   : > { %2609 = vst.msk [vmem:[%s5720_s9 + $0x40] sm:$0x1] %vm2608_vm11, %v2598_v56 }
 0x357 PF: > { %s14_s15 = sadd.s32 1, %s4004_s15  }
 0x358   : > { %p11_p4 = scmp.ge.s32.totalorder %s14_s15, 4  }
 0x35a   :  { %13 = sbr.rel (!%p11_p4) target bundleno = 1 (0x1), region = 70 }

// kernel: neuralnet_forward.3
= control target key start
LH: loop header
LB: loop body
LE: loop exit
PB: predicated region body
PF: predicated region fallthrough
CT: control target
= control target key end

     0   :  { %v3664_v47 = vmov 1983009808   ;;  %v636_v49 = vlaneseq  ;;  %s5618_s0 = inlined_call_operand.vmem [shape: f32[2,4624], index: 0, kind: input, shape index: {}]   ;;  %s5619_s1 = inlined_call_operand.vmem [shape: f32[4624,32], index: 1, kind: input, shape index: {}]   ;;  %s5620_s2 = inlined_call_operand.vmem [shape: f32[1,32], index: 2, kind: input, shape index: {}]   ;;  %s5621_s3 = inlined_call_operand.vmem [shape: f32[32,22], index: 3, kind: input, shape index: {}]   ;;  %s5622_s4 = inlined_call_operand.vmem [shape: f32[1,22], index: 4, kind: input, shape index: {}]   ;;  %s5623_s5 = inlined_call_operand.vmem [shape: f32[22,5], index: 5, kind: input, shape index: {}]   ;;  %s5624_s6 = inlined_call_operand.vmem [shape: f32[1,5], index: 6, kind: input, shape index: {}]   ;;  %s5625_s7 = inlined_call_operand.hbm [shape: f32[2,5], index: 7, kind: output, shape index: {}]  }
   0x1   :  { %v53_v0 = vld [vmem:[%s5619_s1 + $0x80] sm:$0xff]  ;;  %v54_v1 = vld [vmem:[%s5619_s1 + $0x88] sm:$0xff]  ;;  %v55_v11 = vld [vmem:[%s5619_s1 + $0x90] sm:$0xff]  ;;  %v634_v48 = vunpack.c.l.s4 %v3664_v47 }
   0x2   :  { %v37_v2 = vld [vmem:[%s5619_s1] sm:$0xff]  ;;  %v3034_v3 = vpack.c.bf16 %v54_v1, %v53_v0  ;;  %v38_v4 = vld [vmem:[%s5619_s1 + $0x8] sm:$0xff]  ;;  %v56_v13 = vld [vmem:[%s5619_s1 + $0x98] sm:$0xff]  ;;  %v637_v0 = vshrl.u32 %v636_v49, 7 }
   0x3   :  { %v85_v5 = vld [vmem:[%s5619_s1 + $0x180] sm:$0xff]  ;;  %v86_v6 = vld [vmem:[%s5619_s1 + $0x188] sm:$0xff]  ;;  %v3036_v7 = vpack.c.bf16 %v38_v4, %v37_v2  ;;  %v39_v14 = vld [vmem:[%s5619_s1 + $0x10] sm:$0xff]  ;;  %v3038_v16 = vpack.c.bf16 %v56_v13, %v55_v11  ;;  %v635_v63 = vunpack.c.0.s8 %v634_v48 }
   0x4   :  { %v3066_v8 = vpack.c.bf16 %v86_v6, %v85_v5  ;;  %v69_v9 = vld [vmem:[%s5619_s1 + $0x100] sm:$0xff]  ;;  %v70_v10 = vld [vmem:[%s5619_s1 + $0x108] sm:$0xff]  ;;  %3035 = vmatprep.subr.bf16.mxu0 %v3034_v3  ;;  %v40_v15 = vld [vmem:[%s5619_s1 + $0x18] sm:$0xff] }
   0x5   :  { %v3068_v12 = vpack.c.bf16 %v70_v10, %v69_v9  ;;  %3037 = vmatpush3.bf16.msra.mxu0 %v3036_v7  ;;  %v3040_v17 = vpack.c.bf16 %v40_v15, %v39_v14  ;;  %v87_v18 = vld [vmem:[%s5619_s1 + $0x190] sm:$0xff]  ;;  %v88_v19 = vld [vmem:[%s5619_s1 + $0x198] sm:$0xff]  ;;  %v57_v23 = vld [vmem:[%s5619_s1 + $0xa0] sm:$0xff]  ;;  %v3859_v13 = vsub.s32 %v635_v63, %v637_v0 }
   0x6   :  { %3067 = vmatprep.subr.bf16.mxu1 %v3066_v8  ;;  %v71_v20 = vld [vmem:[%s5619_s1 + $0x110] sm:$0xff]  ;;  %v3070_v21 = vpack.c.bf16 %v88_v19, %v87_v18  ;;  %v72_v22 = vld [vmem:[%s5619_s1 + $0x118] sm:$0xff]  ;;  %v58_v24 = vld [vmem:[%s5619_s1 + $0xa8] sm:$0xff]  ;;  %3039 = vmatprep.subr.bf16.mxu0 %v3038_v16 }
   0x7   :  { %3069 = vmatpush3.bf16.msra.mxu1 %v3068_v12  ;;  %v3072_v25 = vpack.c.bf16 %v72_v22, %v71_v20  ;;  %v3042_v26 = vpack.c.bf16 %v58_v24, %v57_v23  ;;  %v41_v27 = vld [vmem:[%s5619_s1 + $0x20] sm:$0xff]  ;;  %v42_v28 = vld [vmem:[%s5619_s1 + $0x28] sm:$0xff]  ;;  %v59_v35 = vld [vmem:[%s5619_s1 + $0xb0] sm:$0xff] }
   0x8   :  { %v89_v29 = vld [vmem:[%s5619_s1 + $0x1a0] sm:$0xff]  ;;  %3071 = vmatprep.subr.bf16.mxu1 %v3070_v21  ;;  %v90_v30 = vld [vmem:[%s5619_s1 + $0x1a8] sm:$0xff]  ;;  %v3044_v33 = vpack.c.bf16 %v42_v28, %v41_v27  ;;  %v60_v36 = vld [vmem:[%s5619_s1 + $0xb8] sm:$0xff] }
   0x9   :  { %v73_v31 = vld [vmem:[%s5619_s1 + $0x120] sm:$0xff]  ;;  %v74_v32 = vld [vmem:[%s5619_s1 + $0x128] sm:$0xff]  ;;  %3041 = vmatpush3.bf16.msra.mxu0 %v3040_v17  ;;  %v3074_v34 = vpack.c.bf16 %v90_v30, %v89_v29  ;;  %v43_v37 = vld [vmem:[%s5619_s1 + $0x30] sm:$0xff]  ;;  %v3046_v39 = vpack.c.bf16 %v60_v36, %v59_v35 }
   0xa   :  { %3043 = vmatprep.subr.bf16.mxu0 %v3042_v26  ;;  %v3076_v38 = vpack.c.bf16 %v74_v32, %v73_v31  ;;  %v44_v40 = vld [vmem:[%s5619_s1 + $0x38] sm:$0xff]  ;;  %v91_v41 = vld [vmem:[%s5619_s1 + $0x1b0] sm:$0xff]  ;;  %v61_v46 = vld [vmem:[%s5619_s1 + $0xc0] sm:$0xff] }
   0xb   :  { %3073 = vmatpush3.bf16.msra.mxu1 %v3072_v25  ;;  %v92_v42 = vld [vmem:[%s5619_s1 + $0x1b8] sm:$0xff]  ;;  %v75_v44 = vld [vmem:[%s5619_s1 + $0x130] sm:$0xff]  ;;  %v62_v50 = vld [vmem:[%s5619_s1 + $0xc8] sm:$0xff]  ;;  %v3048_v51 = vpack.c.bf16 %v44_v40, %v43_v37 }
   0xc   :  { %3075 = vmatprep.subr.bf16.mxu1 %v3074_v34  ;;  %v3078_v43 = vpack.c.bf16 %v92_v42, %v91_v41  ;;  %v76_v45 = vld [vmem:[%s5619_s1 + $0x138] sm:$0xff]  ;;  %v93_v52 = vld [vmem:[%s5619_s1 + $0x1c0] sm:$0xff]  ;;  %v94_v53 = vld [vmem:[%s5619_s1 + $0x1c8] sm:$0xff]  ;;  %v3050_v55 = vpack.c.bf16 %v62_v50, %v61_v46 }
   0xd   :  { %3045 = vmatpush3.bf16.msra.mxu0 %v3044_v33  ;;  %v3080_v54 = vpack.c.bf16 %v76_v45, %v75_v44  ;;  %v45_v56 = vld [vmem:[%s5619_s1 + $0x40] sm:$0xff]  ;;  %v46_v57 = vld [vmem:[%s5619_s1 + $0x48] sm:$0xff]  ;;  %v3082_v59 = vpack.c.bf16 %v94_v53, %v93_v52  ;;  %v63_v61 = vld [vmem:[%s5619_s1 + $0xd0] sm:$0xff] }
   0xe   :  { %3047 = vmatprep.subr.bf16.mxu0 %v3046_v39  ;;  %v77_v58 = vld [vmem:[%s5619_s1 + $0x140] sm:$0xff]  ;;  %v78_v60 = vld [vmem:[%s5619_s1 + $0x148] sm:$0xff]  ;;  %v64_v62 = vld [vmem:[%s5619_s1 + $0xd8] sm:$0xff]  ;;  %v3052_v3 = vpack.c.bf16 %v46_v57, %v45_v56 }
   0xf   :  { %3077 = vmatpush3.bf16.msra.mxu1 %v3076_v38  ;;  %v95_v1 = vld [vmem:[%s5619_s1 + $0x1d0] sm:$0xff]  ;;  %v96_v2 = vld [vmem:[%s5619_s1 + $0x1d8] sm:$0xff]  ;;  %v3084_v4 = vpack.c.bf16 %v78_v60, %v77_v58  ;;  %v3054_v5 = vpack.c.bf16 %v64_v62, %v63_v61  ;;  %v65_v11 = vld [vmem:[%s5619_s1 + $0xe0] sm:$0xff] }
  0x10   :  { %3079 = vmatprep.subr.bf16.mxu1 %v3078_v43  ;;  %v47_v6 = vld [vmem:[%s5619_s1 + $0x50] sm:$0xff]  ;;  %v48_v7 = vld [vmem:[%s5619_s1 + $0x58] sm:$0xff]  ;;  %v3086_v9 = vpack.c.bf16 %v96_v2, %v95_v1  ;;  %v66_v12 = vld [vmem:[%s5619_s1 + $0xe8] sm:$0xff] }
  0x11   :  { %3049 = vmatpush3.bf16.msra.mxu0 %v3048_v51  ;;  %v79_v8 = vld [vmem:[%s5619_s1 + $0x150] sm:$0xff]  ;;  %v80_v10 = vld [vmem:[%s5619_s1 + $0x158] sm:$0xff]  ;;  %v97_v14 = vld [vmem:[%s5619_s1 + $0x1e0] sm:$0xff]  ;;  %v3056_v16 = vpack.c.bf16 %v48_v7, %v47_v6  ;;  %v3058_v19 = vpack.c.bf16 %v66_v12, %v65_v11 }
  0x12   :  { %3051 = vmatprep.subr.bf16.mxu0 %v3050_v55  ;;  %v98_v15 = vld [vmem:[%s5619_s1 + $0x1e8] sm:$0xff]  ;;  %v49_v17 = vld [vmem:[%s5619_s1 + $0x60] sm:$0xff]  ;;  %v3088_v18 = vpack.c.bf16 %v80_v10, %v79_v8  ;;  %v67_v25 = vld [vmem:[%s5619_s1 + $0xf0] sm:$0xff] }
  0x13   :  { %3081 = vmatpush3.bf16.msra.mxu1 %v3080_v54  ;;  %v50_v20 = vld [vmem:[%s5619_s1 + $0x68] sm:$0xff]  ;;  %v81_v21 = vld [vmem:[%s5619_s1 + $0x160] sm:$0xff]  ;;  %v3090_v23 = vpack.c.bf16 %v98_v15, %v97_v14  ;;  %v68_v26 = vld [vmem:[%s5619_s1 + $0xf8] sm:$0xff] }
  0x14   :  { %3083 = vmatprep.subr.bf16.mxu1 %v3082_v59  ;;  %v27_v22 = vld [vmem:[%s5618_s0] sm:$0xff]  ;;  %v82_v24 = vld [vmem:[%s5619_s1 + $0x168] sm:$0xff]  ;;  %v99_v29 = vld [vmem:[%s5619_s1 + $0x1f0] sm:$0xff]  ;;  %v3060_v31 = vpack.c.bf16 %v50_v20, %v49_v17  ;;  %v3062_v35 = vpack.c.bf16 %v68_v26, %v67_v25 }
  0x15   :  { %3053 = vmatpush3.bf16.msra.mxu0 %v3052_v3  ;;  %v639_v27 = vrot.slane %v27_v22, %v3859_v13  ;;  %v632_v28 = vcombine.high %v27_v22, %v27_v22  ;;  %v100_v30 = vld [vmem:[%s5619_s1 + $0x1f8] sm:$0xff]  ;;  %v3092_v34 = vpack.c.bf16 %v82_v24, %v81_v21  ;;  %v51_v36 = vld [vmem:[%s5619_s1 + $0x70] sm:$0xff]  ;;  %v117_v41 = vld [vmem:[%s5619_s1 + $0x280] sm:$0xff] }
  0x16   :  { %3055 = vmatprep.subr.bf16.mxu0 %v3054_v5  ;;  %v52_v37 = vld [vmem:[%s5619_s1 + $0x78] sm:$0xff]  ;;  %v83_v38 = vld [vmem:[%s5619_s1 + $0x170] sm:$0xff]  ;;  %v3094_v39 = vpack.c.bf16 %v100_v30, %v99_v29  ;;  %v118_v42 = vld [vmem:[%s5619_s1 + $0x288] sm:$0xff] }
  0x17   :  { %3085 = vmatpush3.bf16.msra.mxu1 %v3084_v4  ;;  %v647_v32 = vcombine.high %v639_v27, %v639_v27  ;;  %v646_v33 = vrot.slane %v632_v28, %v3859_v13  ;;  %v84_v40 = vld [vmem:[%s5619_s1 + $0x178] sm:$0xff]  ;;  %v149_v44 = vld [vmem:[%s5619_s1 + $0x380] sm:$0xff]  ;;  %v150_v45 = vld [vmem:[%s5619_s1 + $0x388] sm:$0xff]  ;;  %v3064_v46 = vpack.c.bf16 %v52_v37, %v51_v36  ;;  %v3098_v48 = vpack.c.bf16 %v118_v42, %v117_v41 }
  0x18   :  { %3087 = vmatprep.subr.bf16.mxu1 %v3086_v9  ;;  %v3096_v47 = vpack.c.bf16 %v84_v40, %v83_v38  ;;  %v101_v49 = vld [vmem:[%s5619_s1 + $0x200] sm:$0xff]  ;;  %v102_v50 = vld [vmem:[%s5619_s1 + $0x208] sm:$0xff]  ;;  %v3130_v52 = vpack.c.bf16 %v150_v45, %v149_v44  ;;  %v119_v54 = vld [vmem:[%s5619_s1 + $0x290] sm:$0xff] }
  0x19   :  { %3057 = vmatpush3.bf16.msra.mxu0 %v3056_v16  ;;  %895 = vmatprep.mubr.f32.mxu0 %v647_v32  ;;  %v648_v43 = vcombine.high %v646_v33, %v646_v33  ;;  %v133_v51 = vld [vmem:[%s5619_s1 + $0x300] sm:$0xff]  ;;  %v134_v53 = vld [vmem:[%s5619_s1 + $0x308] sm:$0xff]  ;;  %v120_v55 = vld [vmem:[%s5619_s1 + $0x298] sm:$0xff]  ;;  %v3100_v58 = vpack.c.bf16 %v102_v50, %v101_v49 }
  0x1a   :  { %3059 = vmatprep.subr.bf16.mxu0 %v3058_v19  ;;  %v151_v56 = vld [vmem:[%s5619_s1 + $0x390] sm:$0xff]  ;;  %v152_v57 = vld [vmem:[%s5619_s1 + $0x398] sm:$0xff]  ;;  %v3132_v59 = vpack.c.bf16 %v134_v53, %v133_v51  ;;  %v3102_v60 = vpack.c.bf16 %v120_v55, %v119_v54  ;;  %v121_v2 = vld [vmem:[%s5619_s1 + $0x2a0] sm:$0xff] }
  0x1b   :  { %3089 = vmatpush3.bf16.msra.mxu1 %v3088_v18  ;;  %965 = vmatprep.mubr.f32.mxu1 %v648_v43  ;;  %v103_v61 = vld [vmem:[%s5619_s1 + $0x210] sm:$0xff]  ;;  %v104_v62 = vld [vmem:[%s5619_s1 + $0x218] sm:$0xff]  ;;  %v3134_v0 = vpack.c.bf16 %v152_v57, %v151_v56  ;;  %v122_v3 = vld [vmem:[%s5619_s1 + $0x2a8] sm:$0xff] }
  0x1c   :  { %3091 = vmatprep.subr.bf16.mxu1 %v3090_v23  ;;  %v135_v63 = vld [vmem:[%s5619_s1 + $0x310] sm:$0xff]  ;;  %v136_v1 = vld [vmem:[%s5619_s1 + $0x318] sm:$0xff]  ;;  %v153_v4 = vld [vmem:[%s5619_s1 + $0x3a0] sm:$0xff]  ;;  %v3104_v6 = vpack.c.bf16 %v104_v62, %v103_v61  ;;  %v3106_v8 = vpack.c.bf16 %v122_v3, %v121_v2 }
  0x1d   :  { %3061 = vmatpush3.bf16.msra.mxu0 %v3060_v31  ;;  %v154_v5 = vld [vmem:[%s5619_s1 + $0x3a8] sm:$0xff]  ;;  %v3136_v7 = vpack.c.bf16 %v136_v1, %v135_v63  ;;  %v105_v9 = vld [vmem:[%s5619_s1 + $0x220] sm:$0xff]  ;;  %v123_v15 = vld [vmem:[%s5619_s1 + $0x2b0] sm:$0xff] }
  0x1e   :  { %3063 = vmatprep.subr.bf16.mxu0 %v3062_v35  ;;  %v106_v10 = vld [vmem:[%s5619_s1 + $0x228] sm:$0xff]  ;;  %v137_v11 = vld [vmem:[%s5619_s1 + $0x320] sm:$0xff]  ;;  %v3138_v12 = vpack.c.bf16 %v154_v5, %v153_v4  ;;  %v124_v16 = vld [vmem:[%s5619_s1 + $0x2b8] sm:$0xff] }
  0x1f   :  { %3093 = vmatpush3.bf16.msra.mxu1 %v3092_v34  ;;  %v138_v14 = vld [vmem:[%s5619_s1 + $0x328] sm:$0xff]  ;;  %v155_v17 = vld [vmem:[%s5619_s1 + $0x3b0] sm:$0xff]  ;;  %v156_v18 = vld [vmem:[%s5619_s1 + $0x3b8] sm:$0xff]  ;;  %v3108_v19 = vpack.c.bf16 %v106_v10, %v105_v9  ;;  %v3110_v21 = vpack.c.bf16 %v124_v16, %v123_v15 }
  0x20   :  { %3095 = vmatprep.subr.bf16.mxu1 %v3094_v39  ;;  %v3140_v20 = vpack.c.bf16 %v138_v14, %v137_v11  ;;  %v107_v22 = vld [vmem:[%s5619_s1 + $0x230] sm:$0xff]  ;;  %v108_v23 = vld [vmem:[%s5619_s1 + $0x238] sm:$0xff]  ;;  %v3142_v25 = vpack.c.bf16 %v156_v18, %v155_v17  ;;  %v126_v28 = vld [vmem:[%s5619_s1 + $0x2c8] sm:$0xff] }
  0x21   :  { %3065 = vmatpush3.bf16.msra.mxu0 %v3064_v46  ;;  %v139_v24 = vld [vmem:[%s5619_s1 + $0x330] sm:$0xff]  ;;  %v140_v26 = vld [vmem:[%s5619_s1 + $0x338] sm:$0xff]  ;;  %v157_v29 = vld [vmem:[%s5619_s1 + $0x3c0] sm:$0xff]  ;;  %v3112_v32 = vpack.c.bf16 %v108_v23, %v107_v22 }
  0x22   :  { %3099 = vmatprep.subr.bf16.mxu0 %v3098_v48  ;;  %v158_v30 = vld [vmem:[%s5619_s1 + $0x3c8] sm:$0xff]  ;;  %v3144_v35 = vpack.c.bf16 %v140_v26, %v139_v24  ;;  %v109_v37 = vld [vmem:[%s5619_s1 + $0x240] sm:$0xff]  ;;  %v127_v42 = vld [vmem:[%s5619_s1 + $0x2d0] sm:$0xff] }
  0x23   :  { %3097 = vmatpush3.bf16.msra.mxu1 %v3096_v47  ;;  %v28_v31 = vld [vmem:[%s5618_s0 + $0x8] sm:$0xff]  ;;  %v141_v39 = vld [vmem:[%s5619_s1 + $0x340] sm:$0xff]  ;;  %v3146_v40 = vpack.c.bf16 %v158_v30, %v157_v29  ;;  %v128_v43 = vld [vmem:[%s5619_s1 + $0x2d8] sm:$0xff] }
  0x24   :  { %3131 = vmatprep.subr.bf16.mxu1 %v3130_v52  ;;  %896 = vmatmul.mubr.f32.vlgmr.msra.gmra.mrb[0].mxu0 %v639_v27  ;;  %v125_v27 = vld [vmem:[%s5619_s1 + $0x2c0] sm:$0xff]  ;;  %v649_v34 = vcombine.high %v28_v31, %v28_v31  ;;  %v110_v38 = vld [vmem:[%s5619_s1 + $0x248] sm:$0xff]  ;;  %v159_v46 = vld [vmem:[%s5619_s1 + $0x3d0] sm:$0xff]  ;;  %v3118_v51 = vpack.c.bf16 %v128_v43, %v127_v42 }
  0x25   :  { %3101 = vmatpush3.bf16.msra.mxu0 %v3100_v58  ;;  %v3114_v36 = vpack.c.bf16 %v126_v28, %v125_v27  ;;  %v142_v41 = vld [vmem:[%s5619_s1 + $0x348] sm:$0xff]  ;;  %v160_v47 = vld [vmem:[%s5619_s1 + $0x3d8] sm:$0xff]  ;;  %v3116_v48 = vpack.c.bf16 %v110_v38, %v109_v37  ;;  %v111_v52 = vld [vmem:[%s5619_s1 + $0x250] sm:$0xff] }
  0x26   :  { %966 = vmatmul.mubr.f32.vlgmr.msra.gmra.mrb[0].mxu1 %v646_v33  ;;  %3103 = vmatprep.subr.bf16.mxu0 %v3102_v60  ;;  %v4020_v33 = vrot.slane %v28_v31, %v3859_v13  ;;  %v4043_v45 = vrot.slane %v649_v34, %v3859_v13  ;;  %v3148_v50 = vpack.c.bf16 %v142_v41, %v141_v39  ;;  %v112_v53 = vld [vmem:[%s5619_s1 + $0x258] sm:$0xff]  ;;  %v143_v54 = vld [vmem:[%s5619_s1 + $0x350] sm:$0xff]  ;;  %v129_v57 = vld [vmem:[%s5619_s1 + $0x2e0] sm:$0xff] }
  0x27   :  { %3133 = vmatpush3.bf16.msra.mxu1 %v3132_v59  ;;  %v3150_v55 = vpack.c.bf16 %v160_v47, %v159_v46  ;;  %v144_v56 = vld [vmem:[%s5619_s1 + $0x358] sm:$0xff]  ;;  %v130_v58 = vld [vmem:[%s5619_s1 + $0x2e8] sm:$0xff]  ;;  %v161_v59 = vld [vmem:[%s5619_s1 + $0x3e0] sm:$0xff]  ;;  %v3120_v61 = vpack.c.bf16 %v112_v53, %v111_v52 }
  0x28   :  { %3135 = vmatprep.subr.bf16.mxu1 %v3134_v0  ;;  %v664_v44 = vcombine.high %v4020_v33, %v4020_v33  ;;  %v665_v49 = vcombine.high %v4043_v45, %v4043_v45  ;;  %v162_v60 = vld [vmem:[%s5619_s1 + $0x3e8] sm:$0xff]  ;;  %v3152_v62 = vpack.c.bf16 %v144_v56, %v143_v54  ;;  %v3122_v63 = vpack.c.bf16 %v130_v58, %v129_v57  ;;  %v113_v0 = vld [vmem:[%s5619_s1 + $0x260] sm:$0xff]  ;;  %v131_v5 = vld [vmem:[%s5619_s1 + $0x2f0] sm:$0xff] }
  0x29   :  { %3105 = vmatpush3.bf16.msra.mxu0 %v3104_v6  ;;  %v114_v1 = vld [vmem:[%s5619_s1 + $0x268] sm:$0xff]  ;;  %v145_v2 = vld [vmem:[%s5619_s1 + $0x360] sm:$0xff]  ;;  %v3154_v3 = vpack.c.bf16 %v162_v60, %v161_v59  ;;  %v132_v6 = vld [vmem:[%s5619_s1 + $0x2f8] sm:$0xff] }
  0x2a   :  { %3107 = vmatprep.subr.bf16.mxu0 %v3106_v8  ;;  %1035 = vmatprep.mubr.f32.mxu0 %v664_v44  ;;  %v146_v4 = vld [vmem:[%s5619_s1 + $0x368] sm:$0xff]  ;;  %v164_v8 = vld [vmem:[%s5619_s1 + $0x3f8] sm:$0xff]  ;;  %v3124_v9 = vpack.c.bf16 %v114_v1, %v113_v0  ;;  %v3126_v11 = vpack.c.bf16 %v132_v6, %v131_v5  ;;  %v147_v15 = vld [vmem:[%s5619_s1 + $0x370] sm:$0xff] }
  0x2b   :  { %3137 = vmatpush3.bf16.msra.mxu1 %v3136_v7  ;;  %1105 = vmatprep.mubr.f32.mxu1 %v665_v49  ;;  %v163_v7 = vld [vmem:[%s5619_s1 + $0x3f0] sm:$0xff]  ;;  %v3156_v10 = vpack.c.bf16 %v146_v4, %v145_v2  ;;  %v116_v14 = vld [vmem:[%s5619_s1 + $0x278] sm:$0xff]  ;;  %v181_v18 = vld [vmem:[%s5619_s1 + $0x480] sm:$0xff] }
  0x2c   :  { %3139 = vmatprep.subr.bf16.mxu1 %v3138_v12  ;;  %v115_v12 = vld [vmem:[%s5619_s1 + $0x270] sm:$0xff]  ;;  %v3158_v16 = vpack.c.bf16 %v164_v8, %v163_v7  ;;  %v148_v17 = vld [vmem:[%s5619_s1 + $0x378] sm:$0xff]  ;;  %v165_v23 = vld [vmem:[%s5619_s1 + $0x400] sm:$0xff] }
  0x2d   :  { %3109 = vmatpush3.bf16.msra.mxu0 %v3108_v19  ;;  %v182_v19 = vld [vmem:[%s5619_s1 + $0x488] sm:$0xff]  ;;  %v3128_v22 = vpack.c.bf16 %v116_v14, %v115_v12  ;;  %v3160_v24 = vpack.c.bf16 %v148_v17, %v147_v15  ;;  %v197_v27 = vld [vmem:[%s5619_s1 + $0x500] sm:$0xff]  ;;  %v183_v30 = vld [vmem:[%s5619_s1 + $0x490] sm:$0xff] }
  0x2e   :  { %3111 = vmatprep.subr.bf16.mxu0 %v3110_v21  ;;  %v214_v21 = vld [vmem:[%s5619_s1 + $0x588] sm:$0xff]  ;;  %v184_v31 = vld [vmem:[%s5619_s1 + $0x498] sm:$0xff]  ;;  %v29_v37 = vld [vmem:[%s5618_s0 + $0x10] sm:$0xff] }
  0x2f   :  { %3141 = vmatpush3.bf16.msra.mxu1 %v3140_v20  ;;  %v213_v20 = vld [vmem:[%s5619_s1 + $0x580] sm:$0xff]  ;;  %v166_v26 = vld [vmem:[%s5619_s1 + $0x408] sm:$0xff]  ;;  %v216_v34 = vld [vmem:[%s5619_s1 + $0x598] sm:$0xff]  ;;  %v3166_v38 = vpack.c.bf16 %v184_v31, %v183_v30  ;;  %v4162_v42 = vrot.slane %v29_v37, %v3859_v13  ;;  %v666_v43 = vcombine.high %v29_v37, %v29_v37 }
  0x30   :  { %3143 = vmatprep.subr.bf16.mxu1 %v3142_v25  ;;  %v3162_v25 = vpack.c.bf16 %v182_v19, %v181_v18  ;;  %v198_v28 = vld [vmem:[%s5619_s1 + $0x508] sm:$0xff]  ;;  %v3194_v29 = vpack.c.bf16 %v214_v21, %v213_v20  ;;  %v167_v39 = vld [vmem:[%s5619_s1 + $0x410] sm:$0xff]  ;;  %v200_v46 = vld [vmem:[%s5619_s1 + $0x518] sm:$0xff] }
  0x31   :  { %3113 = vmatpush3.bf16.msra.mxu0 %v3112_v32  ;;  %v215_v32 = vld [vmem:[%s5619_s1 + $0x590] sm:$0xff]  ;;  %v185_v47 = vld [vmem:[%s5619_s1 + $0x4a0] sm:$0xff]  ;;  %v4183_v52 = vrot.slane %v666_v43, %v3859_v13  ;;  %v170_v56 = vld [vmem:[%s5619_s1 + $0x428] sm:$0xff] }
  0x32   :  { %3115 = vmatprep.subr.bf16.mxu0 %v3114_v36  ;;  %v3196_v36 = vpack.c.bf16 %v198_v28, %v197_v27  ;;  %v199_v41 = vld [vmem:[%s5619_s1 + $0x510] sm:$0xff]  ;;  %v3198_v44 = vpack.c.bf16 %v216_v34, %v215_v32  ;;  %v217_v49 = vld [vmem:[%s5619_s1 + $0x5a0] sm:$0xff]  ;;  %v202_v59 = vld [vmem:[%s5619_s1 + $0x528] sm:$0xff] }
  0x33   :  { %3145 = vmatpush3.bf16.msra.mxu1 %v3144_v35  ;;  %v3164_v35 = vpack.c.bf16 %v166_v26, %v165_v23  ;;  %v201_v57 = vld [vmem:[%s5619_s1 + $0x520] sm:$0xff]  ;;  %v187_v60 = vld [vmem:[%s5619_s1 + $0x4b0] sm:$0xff]  ;;  %v172_v4 = vld [vmem:[%s5619_s1 + $0x438] sm:$0xff] }
  0x34   :  { %3147 = vmatprep.subr.bf16.mxu1 %v3146_v40  ;;  %v168_v40 = vld [vmem:[%s5619_s1 + $0x418] sm:$0xff]  ;;  %v3204_v1 = vpack.c.bf16 %v202_v59, %v201_v57  ;;  %v203_v5 = vld [vmem:[%s5619_s1 + $0x530] sm:$0xff]  ;;  %v189_v8 = vld [vmem:[%s5619_s1 + $0x4c0] sm:$0xff] }
  0x35   :  { %3117 = vmatpush3.bf16.msra.mxu0 %v3116_v48  ;;  %v186_v48 = vld [vmem:[%s5619_s1 + $0x4a8] sm:$0xff]  ;;  %v3168_v53 = vpack.c.bf16 %v168_v40, %v167_v39  ;;  %v204_v7 = vld [vmem:[%s5619_s1 + $0x538] sm:$0xff]  ;;  %v205_v18 = vld [vmem:[%s5619_s1 + $0x540] sm:$0xff] }
  0x36   :  { %3119 = vmatprep.subr.bf16.mxu0 %v3118_v51  ;;  %v681_v51 = vcombine.high %v4162_v42, %v4162_v42  ;;  %v3170_v54 = vpack.c.bf16 %v186_v48, %v185_v47  ;;  %v3208_v14 = vpack.c.bf16 %v204_v7, %v203_v5  ;;  %v174_v17 = vld [vmem:[%s5619_s1 + $0x448] sm:$0xff]  ;;  %v191_v21 = vld [vmem:[%s5619_s1 + $0x4d0] sm:$0xff]  ;;  %v208_v32 = vld [vmem:[%s5619_s1 + $0x558] sm:$0xff] }
  0x37   :  { %3149 = vmatpush3.bf16.msra.mxu1 %v3148_v50  ;;  %v218_v50 = vld [vmem:[%s5619_s1 + $0x5a8] sm:$0xff]  ;;  %v223_v23 = vld [vmem:[%s5619_s1 + $0x5d0] sm:$0xff]  ;;  %v193_v34 = vld [vmem:[%s5619_s1 + $0x4e0] sm:$0xff] }
  0x38   :  { %3151 = vmatprep.subr.bf16.mxu1 %v3150_v55  ;;  %v169_v55 = vld [vmem:[%s5619_s1 + $0x420] sm:$0xff]  ;;  %v3202_v58 = vpack.c.bf16 %v218_v50, %v217_v49  ;;  %v206_v20 = vld [vmem:[%s5619_s1 + $0x548] sm:$0xff]  ;;  %v175_v28 = vld [vmem:[%s5619_s1 + $0x450] sm:$0xff] }
  0x39   :  { %3121 = vmatpush3.bf16.msra.mxu0 %v3120_v61  ;;  %v188_v61 = vld [vmem:[%s5619_s1 + $0x4b8] sm:$0xff]  ;;  %v3172_v0 = vpack.c.bf16 %v170_v56, %v169_v55  ;;  %v3212_v26 = vpack.c.bf16 %v206_v20, %v205_v18  ;;  %v207_v30 = vld [vmem:[%s5619_s1 + $0x550] sm:$0xff]  ;;  %v226_v37 = vld [vmem:[%s5619_s1 + $0x5e8] sm:$0xff] }
  0x3a   :  { %3123 = vmatprep.subr.bf16.mxu0 %v3122_v63  ;;  %v220_v63 = vld [vmem:[%s5619_s1 + $0x5b8] sm:$0xff]  ;;  %v3174_v2 = vpack.c.bf16 %v188_v61, %v187_v60  ;;  %v3216_v39 = vpack.c.bf16 %v208_v32, %v207_v30  ;;  %v178_v43 = vld [vmem:[%s5619_s1 + $0x468] sm:$0xff]  ;;  %v195_v48 = vld [vmem:[%s5619_s1 + $0x4f0] sm:$0xff] }
  0x3b   :  { %3153 = vmatpush3.bf16.msra.mxu1 %v3152_v62  ;;  %v219_v62 = vld [vmem:[%s5619_s1 + $0x5b0] sm:$0xff]  ;;  %v210_v47 = vld [vmem:[%s5619_s1 + $0x568] sm:$0xff]  ;;  %v196_v49 = vld [vmem:[%s5619_s1 + $0x4f8] sm:$0xff] }
  0x3c   :  { %3155 = vmatprep.subr.bf16.mxu1 %v3154_v3  ;;  %v171_v3 = vld [vmem:[%s5619_s1 + $0x430] sm:$0xff]  ;;  %v3206_v6 = vpack.c.bf16 %v220_v63, %v219_v62  ;;  %v3190_v55 = vpack.c.bf16 %v196_v49, %v195_v48  ;;  %v180_v57 = vld [vmem:[%s5619_s1 + $0x478] sm:$0xff]  ;;  %v245_v60 = vld [vmem:[%s5619_s1 + $0x680] sm:$0xff] }
  0x3d   :  { %3125 = vmatpush3.bf16.msra.mxu0 %v3124_v9  ;;  %v190_v9 = vld [vmem:[%s5619_s1 + $0x4c8] sm:$0xff]  ;;  %v3176_v12 = vpack.c.bf16 %v172_v4, %v171_v3  ;;  %v227_v50 = vld [vmem:[%s5619_s1 + $0x5f0] sm:$0xff]  ;;  %v212_v59 = vld [vmem:[%s5619_s1 + $0x578] sm:$0xff] }
  0x3e   :  { %3127 = vmatprep.subr.bf16.mxu0 %v3126_v11  ;;  %v222_v11 = vld [vmem:[%s5619_s1 + $0x5c8] sm:$0xff]  ;;  %v3178_v15 = vpack.c.bf16 %v190_v9, %v189_v8  ;;  %v179_v56 = vld [vmem:[%s5619_s1 + $0x470] sm:$0xff]  ;;  %v277_v62 = vld [vmem:[%s5619_s1 + $0x780] sm:$0xff] }
  0x3f   :  { %3157 = vmatpush3.bf16.msra.mxu1 %v3156_v10  ;;  %v221_v10 = vld [vmem:[%s5619_s1 + $0x5c0] sm:$0xff]  ;;  %v246_v61 = vld [vmem:[%s5619_s1 + $0x688] sm:$0xff]  ;;  %v247_v9 = vld [vmem:[%s5619_s1 + $0x690] sm:$0xff] }
  0x40   :  { %3159 = vmatprep.subr.bf16.mxu1 %v3158_v16  ;;  %v173_v16 = vld [vmem:[%s5619_s1 + $0x440] sm:$0xff]  ;;  %v3210_v19 = vpack.c.bf16 %v222_v11, %v221_v10  ;;  %v278_v63 = vld [vmem:[%s5619_s1 + $0x788] sm:$0xff]  ;;  %v3226_v3 = vpack.c.bf16 %v246_v61, %v245_v60  ;;  %v248_v10 = vld [vmem:[%s5619_s1 + $0x698] sm:$0xff] }
  0x41   :  { %3129 = vmatpush3.bf16.msra.mxu0 %v3128_v22  ;;  %v192_v22 = vld [vmem:[%s5619_s1 + $0x4d8] sm:$0xff]  ;;  %v229_v4 = vld [vmem:[%s5619_s1 + $0x600] sm:$0xff]  ;;  %v230_v5 = vld [vmem:[%s5619_s1 + $0x608] sm:$0xff]  ;;  %v3258_v7 = vpack.c.bf16 %v278_v63, %v277_v62  ;;  %v3230_v18 = vpack.c.bf16 %v248_v10, %v247_v9 }
  0x42   :  { %3163 = vmatprep.subr.bf16.mxu0 %v3162_v25  ;;  %v3180_v25 = vpack.c.bf16 %v174_v17, %v173_v16  ;;  %v3182_v27 = vpack.c.bf16 %v192_v22, %v191_v21  ;;  %v262_v8 = vld [vmem:[%s5619_s1 + $0x708] sm:$0xff]  ;;  %v3228_v16 = vpack.c.bf16 %v230_v5, %v229_v4  ;;  %v232_v20 = vld [vmem:[%s5619_s1 + $0x618] sm:$0xff]  ;;  %v263_v21 = vld [vmem:[%s5619_s1 + $0x710] sm:$0xff] }
  0x43   :  { %3161 = vmatpush3.bf16.msra.mxu1 %v3160_v24  ;;  %v224_v24 = vld [vmem:[%s5619_s1 + $0x5d8] sm:$0xff]  ;;  %v267_v48 = vld [vmem:[%s5619_s1 + $0x730] sm:$0xff]  ;;  %v270_v61 = vld [vmem:[%s5619_s1 + $0x748] sm:$0xff] }
  0x44   :  { %3195 = vmatprep.subr.bf16.mxu1 %v3194_v29  ;;  %1036 = vmatmul.mubr.f32.vlgmr.msra.gmra.mrb[2].mxu0 %v4020_v33  ;;  %v3200_v33 = vpack.c.bf16 %v200_v46, %v199_v41  ;;  %v176_v29 = vld [vmem:[%s5619_s1 + $0x458] sm:$0xff]  ;;  %v3214_v31 = vpack.c.bf16 %v224_v24, %v223_v23  ;;  %v177_v41 = vld [vmem:[%s5619_s1 + $0x460] sm:$0xff]  ;;  %v255_v62 = vld [vmem:[%s5619_s1 + $0x6d0] sm:$0xff] }
  0x45   :  { %3165 = vmatpush3.bf16.msra.mxu0 %v3164_v35  ;;  %1175 = vmatprep.mubr.f32.mxu0 %v681_v51  ;;  %v194_v35 = vld [vmem:[%s5619_s1 + $0x4e8] sm:$0xff]  ;;  %v228_v51 = vld [vmem:[%s5619_s1 + $0x5f8] sm:$0xff]  ;;  %v249_v24 = vld [vmem:[%s5619_s1 + $0x6a0] sm:$0xff] }
  0x46   :  { %1106 = vmatmul.mubr.f32.vlgmr.msra.gmra.mrb[2].mxu1 %v4043_v45  ;;  %3167 = vmatprep.subr.bf16.mxu0 %v3166_v38  ;;  %v682_v45 = vcombine.high %v4183_v52, %v4183_v52  ;;  %v3184_v38 = vpack.c.bf16 %v176_v29, %v175_v28  ;;  %v3186_v40 = vpack.c.bf16 %v194_v35, %v193_v34  ;;  %v264_v23 = vld [vmem:[%s5619_s1 + $0x718] sm:$0xff]  ;;  %v282_v28 = vld [vmem:[%s5619_s1 + $0x7a8] sm:$0xff]  ;;  %v265_v35 = vld [vmem:[%s5619_s1 + $0x720] sm:$0xff] }
  0x47   :  { %3197 = vmatpush3.bf16.msra.mxu1 %v3196_v36  ;;  %v225_v36 = vld [vmem:[%s5619_s1 + $0x5e0] sm:$0xff]  ;;  %v234_v34 = vld [vmem:[%s5619_s1 + $0x628] sm:$0xff]  ;;  %v256_v63 = vld [vmem:[%s5619_s1 + $0x6d8] sm:$0xff] }
  0x48   :  { %3199 = vmatprep.subr.bf16.mxu1 %v3198_v44  ;;  %1245 = vmatprep.mubr.f32.mxu1 %v682_v45  ;;  %v209_v44 = vld [vmem:[%s5619_s1 + $0x560] sm:$0xff]  ;;  %v3218_v46 = vpack.c.bf16 %v226_v37, %v225_v36  ;;  %v211_v45 = vld [vmem:[%s5619_s1 + $0x570] sm:$0xff]  ;;  %v3246_v4 = vpack.c.bf16 %v256_v63, %v255_v62  ;;  %v272_v9 = vld [vmem:[%s5619_s1 + $0x758] sm:$0xff] }
  0x49   :  { %3169 = vmatpush3.bf16.msra.mxu0 %v3168_v53  ;;  %v3188_v53 = vpack.c.bf16 %v178_v43, %v177_v41  ;;  %v251_v37 = vld [vmem:[%s5619_s1 + $0x6b0] sm:$0xff]  ;;  %v257_v10 = vld [vmem:[%s5619_s1 + $0x6e0] sm:$0xff] }
  0x4a   :  { %3171 = vmatprep.subr.bf16.mxu0 %v3170_v54  ;;  %v3220_v54 = vpack.c.bf16 %v210_v47, %v209_v44  ;;  %v236_v47 = vld [vmem:[%s5619_s1 + $0x638] sm:$0xff]  ;;  %v239_v5 = vld [vmem:[%s5619_s1 + $0x650] sm:$0xff] }
  0x4b   :  { %3201 = vmatpush3.bf16.msra.mxu1 %v3200_v33  ;;  %v30_v33 = vld [vmem:[%s5618_s0 + $0x18] sm:$0xff]  ;;  %v327_v62 = vld [vmem:[%s5619_s1 + $0x910] sm:$0xff] }
  0x4c   :  { %3203 = vmatprep.subr.bf16.mxu1 %v3202_v58  ;;  %v3222_v58 = vpack.c.bf16 %v228_v51, %v227_v50  ;;  %v4354_v11 = vrot.slane %v30_v33, %v3859_v13  ;;  %v268_v50 = vld [vmem:[%s5619_s1 + $0x738] sm:$0xff]  ;;  %v253_v51 = vld [vmem:[%s5619_s1 + $0x6c0] sm:$0xff] }
  0x4d   :  { %3173 = vmatpush3.bf16.msra.mxu0 %v3172_v0  ;;  %v683_v0 = vcombine.high %v30_v33, %v30_v33  ;;  %v285_v33 = vld [vmem:[%s5619_s1 + $0x7c0] sm:$0xff] }
  0x4e   :  { %3175 = vmatprep.subr.bf16.mxu0 %v3174_v2  ;;  %v3224_v2 = vpack.c.bf16 %v212_v59, %v211_v45  ;;  %v237_v45 = vld [vmem:[%s5619_s1 + $0x640] sm:$0xff] }
  0x4f   :  { %3205 = vmatpush3.bf16.msra.mxu1 %v3204_v1  ;;  %v3192_v1 = vpack.c.bf16 %v180_v57, %v179_v56  ;;  %v3272_v56 = vpack.c.bf16 %v268_v50, %v267_v48  ;;  %v269_v59 = vld [vmem:[%s5619_s1 + $0x740] sm:$0xff]  ;;  %v294_v48 = vld [vmem:[%s5619_s1 + $0x808] sm:$0xff] }
  0x50   :  { %3207 = vmatprep.subr.bf16.mxu1 %v3206_v6  ;;  %v261_v6 = vld [vmem:[%s5619_s1 + $0x700] sm:$0xff] }
  0x51   :  { %3177 = vmatpush3.bf16.msra.mxu0 %v3176_v12  ;;  %v279_v12 = vld [vmem:[%s5619_s1 + $0x790] sm:$0xff]  ;;  %v3260_v17 = vpack.c.bf16 %v262_v8, %v261_v6  ;;  %v240_v6 = vld [vmem:[%s5619_s1 + $0x658] sm:$0xff] }
  0x52   :  { %3179 = vmatprep.subr.bf16.mxu0 %v3178_v15  ;;  %v4363_v15 = vrot.slane %v683_v0, %v3859_v13  ;;  %v287_v0 = vld [vmem:[%s5619_s1 + $0x7d0] sm:$0xff] }
  0x53   :  { %3209 = vmatpush3.bf16.msra.mxu1 %v3208_v14  ;;  %v280_v14 = vld [vmem:[%s5619_s1 + $0x798] sm:$0xff] }
  0x54   :  { %3211 = vmatprep.subr.bf16.mxu1 %v3210_v19  ;;  %v231_v19 = vld [vmem:[%s5619_s1 + $0x610] sm:$0xff]  ;;  %v3262_v22 = vpack.c.bf16 %v280_v14, %v279_v12  ;;  %v699_v29 = vcombine.high %v4363_v15, %v4363_v15  ;;  %v258_v12 = vld [vmem:[%s5619_s1 + $0x6e8] sm:$0xff]  ;;  %v289_v14 = vld [vmem:[%s5619_s1 + $0x7e0] sm:$0xff] }
  0x55   :  { %3181 = vmatpush3.bf16.msra.mxu0 %v3180_v25  ;;  %v250_v25 = vld [vmem:[%s5619_s1 + $0x6a8] sm:$0xff]  ;;  %v3232_v30 = vpack.c.bf16 %v232_v20, %v231_v19  ;;  %v3250_v19 = vpack.c.bf16 %v258_v12, %v257_v10  ;;  %v241_v20 = vld [vmem:[%s5619_s1 + $0x660] sm:$0xff] }
  0x56   :  { %3183 = vmatprep.subr.bf16.mxu0 %v3182_v27  ;;  %v281_v27 = vld [vmem:[%s5619_s1 + $0x7a0] sm:$0xff]  ;;  %v3234_v32 = vpack.c.bf16 %v250_v25, %v249_v24  ;;  %v274_v24 = vld [vmem:[%s5619_s1 + $0x768] sm:$0xff]  ;;  %v259_v25 = vld [vmem:[%s5619_s1 + $0x6f0] sm:$0xff] }
  0x57   :  { %3213 = vmatpush3.bf16.msra.mxu1 %v3212_v26  ;;  %v698_v26 = vcombine.high %v4354_v11, %v4354_v11  ;;  %v3266_v36 = vpack.c.bf16 %v282_v28, %v281_v27  ;;  %v291_v27 = vld [vmem:[%s5619_s1 + $0x7f0] sm:$0xff]  ;;  %v292_v28 = vld [vmem:[%s5619_s1 + $0x7f8] sm:$0xff]  ;;  %v298_v10 = vld [vmem:[%s5619_s1 + $0x828] sm:$0xff] }
  0x58   :  { %3215 = vmatprep.subr.bf16.mxu1 %v3214_v31  ;;  %v3264_v31 = vpack.c.bf16 %v264_v23, %v263_v21  ;;  %v242_v21 = vld [vmem:[%s5619_s1 + $0x668] sm:$0xff]  ;;  %v329_v12 = vld [vmem:[%s5619_s1 + $0x920] sm:$0xff] }
  0x59   :  { %3185 = vmatpush3.bf16.msra.mxu0 %v3184_v38  ;;  %v252_v38 = vld [vmem:[%s5619_s1 + $0x6b8] sm:$0xff] }
  0x5a   :  { %3187 = vmatprep.subr.bf16.mxu0 %v3186_v40  ;;  %v284_v40 = vld [vmem:[%s5619_s1 + $0x7b8] sm:$0xff]  ;;  %v3238_v44 = vpack.c.bf16 %v252_v38, %v251_v37  ;;  %v309_v37 = vld [vmem:[%s5619_s1 + $0x880] sm:$0xff]  ;;  %v310_v38 = vld [vmem:[%s5619_s1 + $0x888] sm:$0xff] }
  0x5b   :  { %3217 = vmatpush3.bf16.msra.mxu1 %v3216_v39  ;;  %v283_v39 = vld [vmem:[%s5619_s1 + $0x7b0] sm:$0xff] }
  0x5c   :  { %3219 = vmatprep.subr.bf16.mxu1 %v3218_v46  ;;  %v235_v46 = vld [vmem:[%s5619_s1 + $0x630] sm:$0xff]  ;;  %v3270_v49 = vpack.c.bf16 %v284_v40, %v283_v39  ;;  %v341_v39 = vld [vmem:[%s5619_s1 + $0x980] sm:$0xff]  ;;  %v342_v40 = vld [vmem:[%s5619_s1 + $0x988] sm:$0xff] }
  0x5d   :  { %3189 = vmatpush3.bf16.msra.mxu0 %v3188_v53  ;;  %v254_v53 = vld [vmem:[%s5619_s1 + $0x6c8] sm:$0xff]  ;;  %v3322_v50 = vpack.c.bf16 %v342_v40, %v341_v39  ;;  %v319_v39 = vld [vmem:[%s5619_s1 + $0x8d0] sm:$0xff]  ;;  %v320_v40 = vld [vmem:[%s5619_s1 + $0x8d8] sm:$0xff] }
  0x5e   :  { %3191 = vmatprep.subr.bf16.mxu0 %v3190_v55  ;;  %v3240_v55 = vpack.c.bf16 %v236_v47, %v235_v46  ;;  %v3242_v57 = vpack.c.bf16 %v254_v53, %v253_v51  ;;  %v3290_v46 = vpack.c.bf16 %v310_v38, %v309_v37  ;;  %v293_v47 = vld [vmem:[%s5619_s1 + $0x800] sm:$0xff]  ;;  %v326_v51 = vld [vmem:[%s5619_s1 + $0x908] sm:$0xff]  ;;  %v311_v53 = vld [vmem:[%s5619_s1 + $0x890] sm:$0xff] }
  0x5f   :  { %3221 = vmatpush3.bf16.msra.mxu1 %v3220_v54  ;;  %v286_v54 = vld [vmem:[%s5619_s1 + $0x7c8] sm:$0xff] }
  0x60   :  { %3223 = vmatprep.subr.bf16.mxu1 %v3222_v58  ;;  %v238_v58 = vld [vmem:[%s5619_s1 + $0x648] sm:$0xff]  ;;  %v3274_v60 = vpack.c.bf16 %v286_v54, %v285_v33  ;;  %v312_v33 = vld [vmem:[%s5619_s1 + $0x898] sm:$0xff] }
  0x61   :  { %3193 = vmatpush3.bf16.msra.mxu0 %v3192_v1  ;;  %v288_v1 = vld [vmem:[%s5619_s1 + $0x7d8] sm:$0xff]  ;;  %v334_v38 = vld [vmem:[%s5619_s1 + $0x948] sm:$0xff] }
  0x62   :  { %3227 = vmatprep.subr.bf16.mxu0 %v3226_v3  ;;  %v3276_v3 = vpack.c.bf16 %v270_v61, %v269_v59  ;;  %v3278_v8 = vpack.c.bf16 %v288_v1, %v287_v0  ;;  %v3294_v59 = vpack.c.bf16 %v312_v33, %v311_v53  ;;  %v296_v61 = vld [vmem:[%s5619_s1 + $0x818] sm:$0xff]  ;;  %v313_v1 = vld [vmem:[%s5619_s1 + $0x8a0] sm:$0xff] }
  0x63   :  { %3225 = vmatpush3.bf16.msra.mxu1 %v3224_v2  ;;  %v3244_v2 = vpack.c.bf16 %v238_v58, %v237_v45  ;;  %v3292_v45 = vpack.c.bf16 %v294_v48, %v293_v47  ;;  %v328_v0 = vld [vmem:[%s5619_s1 + $0x918] sm:$0xff]  ;;  %v3310_v47 = vpack.c.bf16 %v320_v40, %v319_v39  ;;  %v303_v48 = vld [vmem:[%s5619_s1 + $0x850] sm:$0xff]  ;;  %v321_v33 = vld [vmem:[%s5619_s1 + $0x8e0] sm:$0xff] }
  0x64   :  { %3259 = vmatprep.subr.bf16.mxu1 %v3258_v7  ;;  %1176 = vmatmul.mubr.f32.vlgmr.msra.gmra.mrb[4].mxu0 %v4162_v42  ;;  %v233_v42 = vld [vmem:[%s5619_s1 + $0x620] sm:$0xff]  ;;  %v271_v7 = vld [vmem:[%s5619_s1 + $0x750] sm:$0xff]  ;;  %v336_v53 = vld [vmem:[%s5619_s1 + $0x958] sm:$0xff] }
  0x65   :  { %3229 = vmatpush3.bf16.msra.mxu0 %v3228_v16  ;;  %1315 = vmatprep.mubr.f32.mxu0 %v698_v26  ;;  %v3236_v41 = vpack.c.bf16 %v234_v34, %v233_v42  ;;  %v290_v16 = vld [vmem:[%s5619_s1 + $0x7e8] sm:$0xff]  ;;  %v260_v26 = vld [vmem:[%s5619_s1 + $0x6f8] sm:$0xff]  ;;  %v243_v42 = vld [vmem:[%s5619_s1 + $0x670] sm:$0xff] }
  0x66   :  { %1246 = vmatmul.mubr.f32.vlgmr.msra.gmra.mrb[4].mxu1 %v4183_v52  ;;  %3231 = vmatprep.subr.bf16.mxu0 %v3230_v18  ;;  %v266_v52 = vld [vmem:[%s5619_s1 + $0x728] sm:$0xff]  ;;  %v3280_v18 = vpack.c.bf16 %v272_v9, %v271_v7  ;;  %v3282_v23 = vpack.c.bf16 %v290_v16, %v289_v14  ;;  %v244_v34 = vld [vmem:[%s5619_s1 + $0x678] sm:$0xff]  ;;  %v315_v16 = vld [vmem:[%s5619_s1 + $0x8b0] sm:$0xff] }
  0x67   :  { %3261 = vmatpush3.bf16.msra.mxu1 %v3260_v17  ;;  %1385 = vmatprep.mubr.f32.mxu1 %v699_v29  ;;  %v3268_v43 = vpack.c.bf16 %v266_v52, %v265_v35  ;;  %v3248_v17 = vpack.c.bf16 %v240_v6, %v239_v5  ;;  %v3252_v29 = vpack.c.bf16 %v242_v21, %v241_v20  ;;  %v275_v35 = vld [vmem:[%s5619_s1 + $0x770] sm:$0xff]  ;;  %v276_v52 = vld [vmem:[%s5619_s1 + $0x778] sm:$0xff]  ;;  %v346_v5 = vld [vmem:[%s5619_s1 + $0x9a8] sm:$0xff] }
  0x68   :  { %3263 = vmatprep.subr.bf16.mxu1 %v3262_v22  ;;  %v273_v22 = vld [vmem:[%s5619_s1 + $0x760] sm:$0xff]  ;;  %v391_v39 = vld [vmem:[%s5619_s1 + $0xb10] sm:$0xff] }
  0x69   :  { %3233 = vmatpush3.bf16.msra.mxu0 %v3232_v30  ;;  %v31_v30 = vld [vmem:[%s5618_s0 + $0x20] sm:$0xff] }
  0x6a   :  { %3235 = vmatprep.subr.bf16.mxu0 %v3234_v32  ;;  %v3254_v32 = vpack.c.bf16 %v260_v26, %v259_v25  ;;  %v4561_v54 = vrot.slane %v31_v30, %v3859_v13  ;;  %v331_v25 = vld [vmem:[%s5619_s1 + $0x930] sm:$0xff] }
  0x6b   :  { %3265 = vmatpush3.bf16.msra.mxu1 %v3264_v31  ;;  %v3284_v31 = vpack.c.bf16 %v274_v24, %v273_v22  ;;  %v300_v24 = vld [vmem:[%s5619_s1 + $0x838] sm:$0xff] }
  0x6c   :  { %3267 = vmatprep.subr.bf16.mxu1 %v3266_v36  ;;  %v3286_v36 = vpack.c.bf16 %v292_v28, %v291_v27  ;;  %v332_v27 = vld [vmem:[%s5619_s1 + $0x938] sm:$0xff]  ;;  %v317_v28 = vld [vmem:[%s5619_s1 + $0x8c0] sm:$0xff] }
  0x6d   :  { %3237 = vmatpush3.bf16.msra.mxu0 %v3236_v41  ;;  %v700_v41 = vcombine.high %v31_v30, %v31_v30  ;;  %v349_v30 = vld [vmem:[%s5619_s1 + $0x9c0] sm:$0xff] }
  0x6e   :  { %3239 = vmatprep.subr.bf16.mxu0 %v3238_v44  ;;  %v3288_v44 = vpack.c.bf16 %v276_v52, %v275_v35  ;;  %v301_v35 = vld [vmem:[%s5619_s1 + $0x840] sm:$0xff] }
  0x6f   :  { %3269 = vmatpush3.bf16.msra.mxu1 %v3268_v43  ;;  %v3256_v43 = vpack.c.bf16 %v244_v34, %v243_v42  ;;  %v3336_v42 = vpack.c.bf16 %v332_v27, %v331_v25  ;;  %v333_v52 = vld [vmem:[%s5619_s1 + $0x940] sm:$0xff]  ;;  %v358_v25 = vld [vmem:[%s5619_s1 + $0xa08] sm:$0xff] }
  0x70   :  { %3271 = vmatprep.subr.bf16.mxu1 %v3270_v49  ;;  %v325_v49 = vld [vmem:[%s5619_s1 + $0x900] sm:$0xff] }
  0x71   :  { %3241 = vmatpush3.bf16.msra.mxu0 %v3240_v55  ;;  %v343_v55 = vld [vmem:[%s5619_s1 + $0x990] sm:$0xff]  ;;  %v3324_v58 = vpack.c.bf16 %v326_v51, %v325_v49  ;;  %v304_v49 = vld [vmem:[%s5619_s1 + $0x858] sm:$0xff] }
  0x72   :  { %3243 = vmatprep.subr.bf16.mxu0 %v3242_v57  ;;  %v4570_v57 = vrot.slane %v700_v41, %v3859_v13  ;;  %v351_v41 = vld [vmem:[%s5619_s1 + $0x9d0] sm:$0xff] }
  0x73   :  { %3273 = vmatpush3.bf16.msra.mxu1 %v3272_v56  ;;  %v344_v56 = vld [vmem:[%s5619_s1 + $0x998] sm:$0xff] }
  0x74   :  { %3275 = vmatprep.subr.bf16.mxu1 %v3274_v60  ;;  %v295_v60 = vld [vmem:[%s5619_s1 + $0x810] sm:$0xff]  ;;  %v3326_v63 = vpack.c.bf16 %v344_v56, %v343_v55  ;;  %v716_v6 = vcombine.high %v4570_v57, %v4570_v57  ;;  %v322_v55 = vld [vmem:[%s5619_s1 + $0x8e8] sm:$0xff]  ;;  %v353_v56 = vld [vmem:[%s5619_s1 + $0x9e0] sm:$0xff] }
  0x75   :  { %3245 = vmatpush3.bf16.msra.mxu0 %v3244_v2  ;;  %v314_v2 = vld [vmem:[%s5619_s1 + $0x8a8] sm:$0xff]  ;;  %v3296_v7 = vpack.c.bf16 %v296_v61, %v295_v60  ;;  %v3314_v60 = vpack.c.bf16 %v322_v55, %v321_v33  ;;  %v305_v61 = vld [vmem:[%s5619_s1 + $0x860] sm:$0xff] }
  0x76   :  { %3247 = vmatprep.subr.bf16.mxu0 %v3246_v4  ;;  %v345_v4 = vld [vmem:[%s5619_s1 + $0x9a0] sm:$0xff]  ;;  %v3298_v9 = vpack.c.bf16 %v314_v2, %v313_v1  ;;  %v338_v1 = vld [vmem:[%s5619_s1 + $0x968] sm:$0xff]  ;;  %v323_v2 = vld [vmem:[%s5619_s1 + $0x8f0] sm:$0xff] }
  0x77   :  { %3277 = vmatpush3.bf16.msra.mxu1 %v3276_v3  ;;  %v715_v3 = vcombine.high %v4561_v54, %v4561_v54  ;;  %v3330_v14 = vpack.c.bf16 %v346_v5, %v345_v4  ;;  %v355_v4 = vld [vmem:[%s5619_s1 + $0x9f0] sm:$0xff]  ;;  %v356_v5 = vld [vmem:[%s5619_s1 + $0x9f8] sm:$0xff]  ;;  %v362_v33 = vld [vmem:[%s5619_s1 + $0xa28] sm:$0xff] }
  0x78   :  { %3279 = vmatprep.subr.bf16.mxu1 %v3278_v8  ;;  %v3328_v8 = vpack.c.bf16 %v328_v0, %v327_v62  ;;  %v306_v62 = vld [vmem:[%s5619_s1 + $0x868] sm:$0xff]  ;;  %v393_v55 = vld [vmem:[%s5619_s1 + $0xb20] sm:$0xff] }
  0x79   :  { %3249 = vmatpush3.bf16.msra.mxu0 %v3248_v17  ;;  %v316_v17 = vld [vmem:[%s5619_s1 + $0x8b8] sm:$0xff] }
  0x7a   :  { %3251 = vmatprep.subr.bf16.mxu0 %v3250_v19  ;;  %v348_v19 = vld [vmem:[%s5619_s1 + $0x9b8] sm:$0xff]  ;;  %v3302_v22 = vpack.c.bf16 %v316_v17, %v315_v16  ;;  %v373_v16 = vld [vmem:[%s5619_s1 + $0xa80] sm:$0xff]  ;;  %v374_v17 = vld [vmem:[%s5619_s1 + $0xa88] sm:$0xff] }
  0x7b   :  { %3281 = vmatpush3.bf16.msra.mxu1 %v3280_v18  ;;  %v347_v18 = vld [vmem:[%s5619_s1 + $0x9b0] sm:$0xff] }
  0x7c   :  { %3283 = vmatprep.subr.bf16.mxu1 %v3282_v23  ;;  %v299_v23 = vld [vmem:[%s5619_s1 + $0x830] sm:$0xff]  ;;  %v3334_v26 = vpack.c.bf16 %v348_v19, %v347_v18  ;;  %v405_v18 = vld [vmem:[%s5619_s1 + $0xb80] sm:$0xff]  ;;  %v406_v19 = vld [vmem:[%s5619_s1 + $0xb88] sm:$0xff] }
  0x7d   :  { %3253 = vmatpush3.bf16.msra.mxu0 %v3252_v29  ;;  %v318_v29 = vld [vmem:[%s5619_s1 + $0x8c8] sm:$0xff]  ;;  %v3386_v27 = vpack.c.bf16 %v406_v19, %v405_v18  ;;  %v383_v18 = vld [vmem:[%s5619_s1 + $0xad0] sm:$0xff]  ;;  %v384_v19 = vld [vmem:[%s5619_s1 + $0xad8] sm:$0xff] }
  0x7e   :  { %3255 = vmatprep.subr.bf16.mxu0 %v3254_v32  ;;  %v3304_v32 = vpack.c.bf16 %v300_v24, %v299_v23  ;;  %v3306_v34 = vpack.c.bf16 %v318_v29, %v317_v28  ;;  %v3354_v23 = vpack.c.bf16 %v374_v17, %v373_v16  ;;  %v357_v24 = vld [vmem:[%s5619_s1 + $0xa00] sm:$0xff]  ;;  %v390_v28 = vld [vmem:[%s5619_s1 + $0xb08] sm:$0xff]  ;;  %v375_v29 = vld [vmem:[%s5619_s1 + $0xa90] sm:$0xff] }
  0x7f   :  { %3285 = vmatpush3.bf16.msra.mxu1 %v3284_v31  ;;  %v350_v31 = vld [vmem:[%s5619_s1 + $0x9c8] sm:$0xff] }
  0x80   :  { %3287 = vmatprep.subr.bf16.mxu1 %v3286_v36  ;;  %v302_v36 = vld [vmem:[%s5619_s1 + $0x848] sm:$0xff]  ;;  %v3338_v37 = vpack.c.bf16 %v350_v31, %v349_v30  ;;  %v376_v30 = vld [vmem:[%s5619_s1 + $0xa98] sm:$0xff] }
  0x81   :  { %3257 = vmatpush3.bf16.msra.mxu0 %v3256_v43  ;;  %v352_v43 = vld [vmem:[%s5619_s1 + $0x9d8] sm:$0xff]  ;;  %v398_v17 = vld [vmem:[%s5619_s1 + $0xb48] sm:$0xff] }
  0x82   :  { %3291 = vmatprep.subr.bf16.mxu0 %v3290_v46  ;;  %v3340_v46 = vpack.c.bf16 %v334_v38, %v333_v52  ;;  %v3342_v51 = vpack.c.bf16 %v352_v43, %v351_v41  ;;  %v3358_v52 = vpack.c.bf16 %v376_v30, %v375_v29  ;;  %v360_v38 = vld [vmem:[%s5619_s1 + $0xa18] sm:$0xff]  ;;  %v377_v43 = vld [vmem:[%s5619_s1 + $0xaa0] sm:$0xff] }
  0x83   :  { %3289 = vmatpush3.bf16.msra.mxu1 %v3288_v44  ;;  %v3308_v44 = vpack.c.bf16 %v302_v36, %v301_v35  ;;  %v3356_v35 = vpack.c.bf16 %v358_v25, %v357_v24  ;;  %v392_v41 = vld [vmem:[%s5619_s1 + $0xb18] sm:$0xff]  ;;  %v3374_v24 = vpack.c.bf16 %v384_v19, %v383_v18  ;;  %v367_v25 = vld [vmem:[%s5619_s1 + $0xa50] sm:$0xff]  ;;  %v385_v30 = vld [vmem:[%s5619_s1 + $0xae0] sm:$0xff] }
  0x84   :  { %3323 = vmatprep.subr.bf16.mxu1 %v3322_v50  ;;  %1316 = vmatmul.mubr.f32.vlgmr.msra.gmra.mrb[6].mxu0 %v4354_v11  ;;  %v297_v11 = vld [vmem:[%s5619_s1 + $0x820] sm:$0xff]  ;;  %v335_v50 = vld [vmem:[%s5619_s1 + $0x950] sm:$0xff]  ;;  %v400_v29 = vld [vmem:[%s5619_s1 + $0xb58] sm:$0xff] }
  0x85   :  { %3293 = vmatpush3.bf16.msra.mxu0 %v3292_v45  ;;  %1455 = vmatprep.mubr.f32.mxu0 %v715_v3  ;;  %v3300_v20 = vpack.c.bf16 %v298_v10, %v297_v11  ;;  %v354_v45 = vld [vmem:[%s5619_s1 + $0x9e8] sm:$0xff]  ;;  %v324_v3 = vld [vmem:[%s5619_s1 + $0x8f8] sm:$0xff]  ;;  %v307_v11 = vld [vmem:[%s5619_s1 + $0x870] sm:$0xff] }
  0x86   :  { %1386 = vmatmul.mubr.f32.vlgmr.msra.gmra.mrb[6].mxu1 %v4363_v15  ;;  %3295 = vmatprep.subr.bf16.mxu0 %v3294_v59  ;;  %v330_v15 = vld [vmem:[%s5619_s1 + $0x928] sm:$0xff]  ;;  %v3344_v59 = vpack.c.bf16 %v336_v53, %v335_v50  ;;  %v3346_v0 = vpack.c.bf16 %v354_v45, %v353_v56  ;;  %v308_v10 = vld [vmem:[%s5619_s1 + $0x878] sm:$0xff]  ;;  %v379_v45 = vld [vmem:[%s5619_s1 + $0xab0] sm:$0xff] }
  0x87   :  { %3325 = vmatpush3.bf16.msra.mxu1 %v3324_v58  ;;  %1525 = vmatprep.mubr.f32.mxu1 %v716_v6  ;;  %v3332_v21 = vpack.c.bf16 %v330_v15, %v329_v12  ;;  %v3312_v58 = vpack.c.bf16 %v304_v49, %v303_v48  ;;  %v3316_v6 = vpack.c.bf16 %v306_v62, %v305_v61  ;;  %v339_v12 = vld [vmem:[%s5619_s1 + $0x970] sm:$0xff]  ;;  %v340_v15 = vld [vmem:[%s5619_s1 + $0x978] sm:$0xff]  ;;  %v410_v48 = vld [vmem:[%s5619_s1 + $0xba8] sm:$0xff] }
  0x88   :  { %3327 = vmatprep.subr.bf16.mxu1 %v3326_v63  ;;  %v337_v63 = vld [vmem:[%s5619_s1 + $0x960] sm:$0xff]  ;;  %v455_v18 = vld [vmem:[%s5619_s1 + $0xd10] sm:$0xff] }
  0x89   :  { %3297 = vmatpush3.bf16.msra.mxu0 %v3296_v7  ;;  %v32_v7 = vld [vmem:[%s5618_s0 + $0x28] sm:$0xff] }
  0x8a   :  { %3299 = vmatprep.subr.bf16.mxu0 %v3298_v9  ;;  %v3318_v9 = vpack.c.bf16 %v324_v3, %v323_v2  ;;  %v4768_v31 = vrot.slane %v32_v7, %v3859_v13  ;;  %v395_v2 = vld [vmem:[%s5619_s1 + $0xb30] sm:$0xff] }
  0x8b   :  { %3329 = vmatpush3.bf16.msra.mxu1 %v3328_v8  ;;  %v3348_v8 = vpack.c.bf16 %v338_v1, %v337_v63  ;;  %v364_v1 = vld [vmem:[%s5619_s1 + $0xa38] sm:$0xff] }
  0x8c   :  { %3331 = vmatprep.subr.bf16.mxu1 %v3330_v14  ;;  %v3350_v14 = vpack.c.bf16 %v356_v5, %v355_v4  ;;  %v396_v4 = vld [vmem:[%s5619_s1 + $0xb38] sm:$0xff]  ;;  %v381_v5 = vld [vmem:[%s5619_s1 + $0xac0] sm:$0xff] }
  0x8d   :  { %3301 = vmatpush3.bf16.msra.mxu0 %v3300_v20  ;;  %v717_v20 = vcombine.high %v32_v7, %v32_v7  ;;  %v413_v7 = vld [vmem:[%s5619_s1 + $0xbc0] sm:$0xff] }
  0x8e   :  { %3303 = vmatprep.subr.bf16.mxu0 %v3302_v22  ;;  %v3352_v22 = vpack.c.bf16 %v340_v15, %v339_v12  ;;  %v365_v12 = vld [vmem:[%s5619_s1 + $0xa40] sm:$0xff] }
  0x8f   :  { %3333 = vmatpush3.bf16.msra.mxu1 %v3332_v21  ;;  %v3320_v21 = vpack.c.bf16 %v308_v10, %v307_v11  ;;  %v3400_v11 = vpack.c.bf16 %v396_v4, %v395_v2  ;;  %v397_v15 = vld [vmem:[%s5619_s1 + $0xb40] sm:$0xff]  ;;  %v422_v2 = vld [vmem:[%s5619_s1 + $0xc08] sm:$0xff] }
  0x90   :  { %3335 = vmatprep.subr.bf16.mxu1 %v3334_v26  ;;  %v389_v26 = vld [vmem:[%s5619_s1 + $0xb00] sm:$0xff] }
  0x91   :  { %3305 = vmatpush3.bf16.msra.mxu0 %v3304_v32  ;;  %v407_v32 = vld [vmem:[%s5619_s1 + $0xb90] sm:$0xff]  ;;  %v3388_v36 = vpack.c.bf16 %v390_v28, %v389_v26  ;;  %v368_v26 = vld [vmem:[%s5619_s1 + $0xa58] sm:$0xff] }
  0x92   :  { %3307 = vmatprep.subr.bf16.mxu0 %v3306_v34  ;;  %v4777_v34 = vrot.slane %v717_v20, %v3859_v13  ;;  %v415_v20 = vld [vmem:[%s5619_s1 + $0xbd0] sm:$0xff] }
  0x93   :  { %3337 = vmatpush3.bf16.msra.mxu1 %v3336_v42  ;;  %v408_v42 = vld [vmem:[%s5619_s1 + $0xb98] sm:$0xff] }
  0x94   :  { %3339 = vmatprep.subr.bf16.mxu1 %v3338_v37  ;;  %v359_v37 = vld [vmem:[%s5619_s1 + $0xa10] sm:$0xff]  ;;  %v3390_v40 = vpack.c.bf16 %v408_v42, %v407_v32  ;;  %v733_v49 = vcombine.high %v4777_v34, %v4777_v34  ;;  %v386_v32 = vld [vmem:[%s5619_s1 + $0xae8] sm:$0xff]  ;;  %v417_v42 = vld [vmem:[%s5619_s1 + $0xbe0] sm:$0xff] }
  0x95   :  { %3309 = vmatpush3.bf16.msra.mxu0 %v3308_v44  ;;  %v378_v44 = vld [vmem:[%s5619_s1 + $0xaa8] sm:$0xff]  ;;  %v3360_v50 = vpack.c.bf16 %v360_v38, %v359_v37  ;;  %v3378_v37 = vpack.c.bf16 %v386_v32, %v385_v30  ;;  %v369_v38 = vld [vmem:[%s5619_s1 + $0xa60] sm:$0xff] }
  0x96   :  { %3311 = vmatprep.subr.bf16.mxu0 %v3310_v47  ;;  %v409_v47 = vld [vmem:[%s5619_s1 + $0xba0] sm:$0xff]  ;;  %v3362_v53 = vpack.c.bf16 %v378_v44, %v377_v43  ;;  %v402_v43 = vld [vmem:[%s5619_s1 + $0xb68] sm:$0xff]  ;;  %v387_v44 = vld [vmem:[%s5619_s1 + $0xaf0] sm:$0xff] }
  0x97   :  { %3341 = vmatpush3.bf16.msra.mxu1 %v3340_v46  ;;  %v732_v46 = vcombine.high %v4768_v31, %v4768_v31  ;;  %v3394_v56 = vpack.c.bf16 %v410_v48, %v409_v47  ;;  %v419_v47 = vld [vmem:[%s5619_s1 + $0xbf0] sm:$0xff]  ;;  %v420_v48 = vld [vmem:[%s5619_s1 + $0xbf8] sm:$0xff] }
  0x98   :  { %3343 = vmatprep.subr.bf16.mxu1 %v3342_v51  ;;  %v3392_v51 = vpack.c.bf16 %v392_v41, %v391_v39  ;;  %v370_v39 = vld [vmem:[%s5619_s1 + $0xa68] sm:$0xff] }
  0x99   :  { %3313 = vmatpush3.bf16.msra.mxu0 %v3312_v58  ;;  %v380_v58 = vld [vmem:[%s5619_s1 + $0xab8] sm:$0xff] }
  0x9a   :  { %3315 = vmatprep.subr.bf16.mxu0 %v3314_v60  ;;  %v412_v60 = vld [vmem:[%s5619_s1 + $0xbb8] sm:$0xff]  ;;  %v3366_v63 = vpack.c.bf16 %v380_v58, %v379_v45  ;;  %v437_v45 = vld [vmem:[%s5619_s1 + $0xc80] sm:$0xff]  ;;  %v438_v58 = vld [vmem:[%s5619_s1 + $0xc88] sm:$0xff] }
  0x9b   :  { %3345 = vmatpush3.bf16.msra.mxu1 %v3344_v59  ;;  %v411_v59 = vld [vmem:[%s5619_s1 + $0xbb0] sm:$0xff] }
  0x9c   :  { %3347 = vmatprep.subr.bf16.mxu1 %v3346_v0  ;;  %v363_v0 = vld [vmem:[%s5619_s1 + $0xa30] sm:$0xff]  ;;  %v3398_v3 = vpack.c.bf16 %v412_v60, %v411_v59  ;;  %v469_v59 = vld [vmem:[%s5619_s1 + $0xd80] sm:$0xff]  ;;  %v470_v60 = vld [vmem:[%s5619_s1 + $0xd88] sm:$0xff] }
  0x9d   :  { %3317 = vmatpush3.bf16.msra.mxu0 %v3316_v6  ;;  %v382_v6 = vld [vmem:[%s5619_s1 + $0xac8] sm:$0xff]  ;;  %v3450_v4 = vpack.c.bf16 %v470_v60, %v469_v59 }
  0x9e   :  { %3319 = vmatprep.subr.bf16.mxu0 %v3318_v9  ;;  %v3368_v9 = vpack.c.bf16 %v364_v1, %v363_v0  ;;  %v3370_v10 = vpack.c.bf16 %v382_v6, %v381_v5  ;;  %v3418_v0 = vpack.c.bf16 %v438_v58, %v437_v45  ;;  %v421_v1 = vld [vmem:[%s5619_s1 + $0xc00] sm:$0xff]  ;;  %v454_v5 = vld [vmem:[%s5619_s1 + $0xd08] sm:$0xff]  ;;  %v439_v6 = vld [vmem:[%s5619_s1 + $0xc90] sm:$0xff] }
  0x9f   :  { %3349 = vmatpush3.bf16.msra.mxu1 %v3348_v8  ;;  %v414_v8 = vld [vmem:[%s5619_s1 + $0xbc8] sm:$0xff] }
  0xa0   :  { %3351 = vmatprep.subr.bf16.mxu1 %v3350_v14  ;;  %v366_v14 = vld [vmem:[%s5619_s1 + $0xa48] sm:$0xff]  ;;  %v3402_v16 = vpack.c.bf16 %v414_v8, %v413_v7  ;;  %v440_v7 = vld [vmem:[%s5619_s1 + $0xc98] sm:$0xff] }
  0xa1   :  { %3321 = vmatpush3.bf16.msra.mxu0 %v3320_v21  ;;  %v416_v21 = vld [vmem:[%s5619_s1 + $0xbd8] sm:$0xff] }
  0xa2   :  { %3355 = vmatprep.subr.bf16.mxu0 %v3354_v23  ;;  %v3404_v23 = vpack.c.bf16 %v398_v17, %v397_v15  ;;  %v3406_v28 = vpack.c.bf16 %v416_v21, %v415_v20  ;;  %v3422_v15 = vpack.c.bf16 %v440_v7, %v439_v6  ;;  %v424_v17 = vld [vmem:[%s5619_s1 + $0xc18] sm:$0xff]  ;;  %v441_v21 = vld [vmem:[%s5619_s1 + $0xca0] sm:$0xff] }
  0xa3   :  { %3353 = vmatpush3.bf16.msra.mxu1 %v3352_v22  ;;  %v3372_v22 = vpack.c.bf16 %v366_v14, %v365_v12  ;;  %v3420_v12 = vpack.c.bf16 %v422_v2, %v421_v1  ;;  %v456_v20 = vld [vmem:[%s5619_s1 + $0xd18] sm:$0xff] }
  0xa4   :  { %3387 = vmatprep.subr.bf16.mxu1 %v3386_v27  ;;  %1456 = vmatmul.mubr.f32.vlgmr.msra.gmra.mrb[8].mxu0 %v4561_v54  ;;  %v361_v54 = vld [vmem:[%s5619_s1 + $0xa20] sm:$0xff]  ;;  %v399_v27 = vld [vmem:[%s5619_s1 + $0xb50] sm:$0xff] }
  0xa5   :  { %3357 = vmatpush3.bf16.msra.mxu0 %v3356_v35  ;;  %1595 = vmatprep.mubr.f32.mxu0 %v732_v46  ;;  %v3364_v61 = vpack.c.bf16 %v362_v33, %v361_v54  ;;  %v418_v35 = vld [vmem:[%s5619_s1 + $0xbe8] sm:$0xff]  ;;  %v388_v46 = vld [vmem:[%s5619_s1 + $0xaf8] sm:$0xff]  ;;  %v371_v54 = vld [vmem:[%s5619_s1 + $0xa70] sm:$0xff] }
  0xa6   :  { %1526 = vmatmul.mubr.f32.vlgmr.msra.gmra.mrb[8].mxu1 %v4570_v57  ;;  %3359 = vmatprep.subr.bf16.mxu0 %v3358_v52  ;;  %v394_v57 = vld [vmem:[%s5619_s1 + $0xb28] sm:$0xff]  ;;  %v3408_v52 = vpack.c.bf16 %v400_v29, %v399_v27  ;;  %v3410_v41 = vpack.c.bf16 %v418_v35, %v417_v42  ;;  %v372_v33 = vld [vmem:[%s5619_s1 + $0xa78] sm:$0xff] }
  0xa7   :  { %3389 = vmatpush3.bf16.msra.mxu1 %v3388_v36  ;;  %1665 = vmatprep.mubr.f32.mxu1 %v733_v49  ;;  %v3396_v62 = vpack.c.bf16 %v394_v57, %v393_v55  ;;  %v3376_v36 = vpack.c.bf16 %v368_v26, %v367_v25  ;;  %v3380_v49 = vpack.c.bf16 %v370_v39, %v369_v38  ;;  %v403_v55 = vld [vmem:[%s5619_s1 + $0xb70] sm:$0xff]  ;;  %v404_v57 = vld [vmem:[%s5619_s1 + $0xb78] sm:$0xff]  ;;  %v474_v25 = vld [vmem:[%s5619_s1 + $0xda8] sm:$0xff] }
  0xa8   :  { %3391 = vmatprep.subr.bf16.mxu1 %v3390_v40  ;;  %v401_v40 = vld [vmem:[%s5619_s1 + $0xb60] sm:$0xff] }
  0xa9   :  { %3361 = vmatpush3.bf16.msra.mxu0 %v3360_v50  ;;  %v33_v50 = vld [vmem:[%s5618_s0 + $0x30] sm:$0xff] }
  0xaa   :  { %3363 = vmatprep.subr.bf16.mxu0 %v3362_v53  ;;  %v3382_v53 = vpack.c.bf16 %v388_v46, %v387_v44  ;;  %v4975_v8 = vrot.slane %v33_v50, %v3859_v13 }
  0xab   :  { %3393 = vmatpush3.bf16.msra.mxu1 %v3392_v51  ;;  %v3412_v51 = vpack.c.bf16 %v402_v43, %v401_v40 }
  0xac   :  { %3395 = vmatprep.subr.bf16.mxu1 %v3394_v56  ;;  %v3414_v56 = vpack.c.bf16 %v420_v48, %v419_v47 }
  0xad   :  { %3365 = vmatpush3.bf16.msra.mxu0 %v3364_v61  ;;  %v734_v61 = vcombine.high %v33_v50, %v33_v50 }
  0xae   :  { %3367 = vmatprep.subr.bf16.mxu0 %v3366_v63  ;;  %v3416_v63 = vpack.c.bf16 %v404_v57, %v403_v55 }
  0xaf   :  { %3397 = vmatpush3.bf16.msra.mxu1 %v3396_v62  ;;  %v3384_v62 = vpack.c.bf16 %v372_v33, %v371_v54 }
  0xb0   :  { %3399 = vmatprep.subr.bf16.mxu1 %v3398_v3  ;;  %v453_v3 = vld [vmem:[%s5619_s1 + $0xd00] sm:$0xff] }
  0xb1   :  { %3369 = vmatpush3.bf16.msra.mxu0 %v3368_v9  ;;  %v471_v9 = vld [vmem:[%s5619_s1 + $0xd90] sm:$0xff]  ;;  %v3452_v14 = vpack.c.bf16 %v454_v5, %v453_v3 }
  0xb2   :  { %3371 = vmatprep.subr.bf16.mxu0 %v3370_v10  ;;  %v4984_v10 = vrot.slane %v734_v61, %v3859_v13 }
  0xb3   :  { %3401 = vmatpush3.bf16.msra.mxu1 %v3400_v11  ;;  %v472_v11 = vld [vmem:[%s5619_s1 + $0xd98] sm:$0xff] }
  0xb4   :  { %3403 = vmatprep.subr.bf16.mxu1 %v3402_v16  ;;  %v423_v16 = vld [vmem:[%s5619_s1 + $0xc10] sm:$0xff]  ;;  %v3454_v19 = vpack.c.bf16 %v472_v11, %v471_v9  ;;  %v750_v26 = vcombine.high %v4984_v10, %v4984_v10 }
  0xb5   :  { %3373 = vmatpush3.bf16.msra.mxu0 %v3372_v22  ;;  %v442_v22 = vld [vmem:[%s5619_s1 + $0xca8] sm:$0xff]  ;;  %v3424_v27 = vpack.c.bf16 %v424_v17, %v423_v16 }
  0xb6   :  { %3375 = vmatprep.subr.bf16.mxu0 %v3374_v24  ;;  %v473_v24 = vld [vmem:[%s5619_s1 + $0xda0] sm:$0xff] }
  0xb7   :  { %3405 = vmatpush3.bf16.msra.mxu1 %v3404_v23  ;;  %v749_v23 = vcombine.high %v4975_v8, %v4975_v8 }
  0xb8   :  { %3407 = vmatprep.subr.bf16.mxu1 %v3406_v28 }
  0xb9   :  { %3377 = vmatpush3.bf16.msra.mxu0 %v3376_v36 }
  0xba   :  { %3379 = vmatprep.subr.bf16.mxu0 %v3378_v37 }
  0xbb   :  { %3409 = vmatpush3.bf16.msra.mxu1 %v3408_v52 }
  0xbc   :  { %3411 = vmatprep.subr.bf16.mxu1 %v3410_v41 }
  0xbd   :  { %3381 = vmatpush3.bf16.msra.mxu0 %v3380_v49 }
  0xbe   :  { %3383 = vmatprep.subr.bf16.mxu0 %v3382_v53 }
  0xbf   :  { %3413 = vmatpush3.bf16.msra.mxu1 %v3412_v51 }
  0xc0   :  { %3415 = vmatprep.subr.bf16.mxu1 %v3414_v56 }
  0xc1   :  { %3385 = vmatpush3.bf16.msra.mxu0 %v3384_v62 }
  0xc2   :  { %3419 = vmatprep.subr.bf16.mxu0 %v3418_v0 }
  0xc3   :  { %3417 = vmatpush3.bf16.msra.mxu1 %v3416_v63 }
  0xc4   :  { %3451 = vmatprep.subr.bf16.mxu1 %v3450_v4  ;;  %1596 = vmatmul.mubr.f32.vlgmr.msra.gmra.mrb[10].mxu0 %v4768_v31 }
  0xc5   :  { %3421 = vmatpush3.bf16.msra.mxu0 %v3420_v12 }
  0xc6   :  { %1666 = vmatmul.mubr.f32.vlgmr.msra.gmra.mrb[10].mxu1 %v4777_v34 }
  0xc7   :  { %12 = vsyncpa [#allocation3], 0  ;;  %3453 = vmatpush3.bf16.msra.mxu1 %v3452_v14  ;;  %3423 = vmatprep.subr.bf16.mxu0 %v3422_v15  ;;  %v3456_v28 = vpack.c.bf16 %v456_v20, %v455_v18  ;;  %v3426_v31 = vpack.c.bf16 %v442_v22, %v441_v21  ;;  %v425_v29 = vld [vmem:[%s5619_s1 + $0xc20] sm:$0xff]  ;;  %v426_v30 = vld [vmem:[%s5619_s1 + $0xc28] sm:$0xff]  ;;  %v3458_v34 = vpack.c.bf16 %v474_v25, %v473_v24  ;;  %vm828_vm0 = vcmask 130048  }
  0xc8   :  { %v457_v32 = vld [vmem:[%s5619_s1 + $0xd20] sm:$0xff]  ;;  %3455 = vmatprep.subr.bf16.mxu1 %v3454_v19  ;;  %v458_v42 = vld [vmem:[%s5619_s1 + $0xd28] sm:$0xff]  ;;  %v443_v35 = vld [vmem:[%s5619_s1 + $0xcb0] sm:$0xff]  ;;  %1735 = vmatprep.mubr.f32.mxu0 %v749_v23  ;;  %v3428_v38 = vpack.c.bf16 %v426_v30, %v425_v29  ;;  %vm3666_vm1 = vmmov 0   ;;  %vm2173_vm2 = vcmask 261120   ;;  %vm2262_vm3 = vcmask 1045504  }
  0xc9   :  { %v444_v36 = vld [vmem:[%s5619_s1 + $0xcb8] sm:$0xff]  ;;  %v475_v52 = vld [vmem:[%s5619_s1 + $0xdb0] sm:$0xff]  ;;  %1805 = vmatprep.mubr.f32.mxu1 %v750_v26  ;;  %3425 = vmatpush3.bf16.msra.mxu0 %v3424_v27  ;;  %v3460_v39 = vpack.c.bf16 %v458_v42, %v457_v32  ;;  %v445_v48 = vld [vmem:[%s5619_s1 + $0xcc0] sm:$0xff]  ;;  %vm2258_vm4 = vcmask 179200   ;;  %vm2341_vm5 = vcmask 33792  }
  0xca   :  { %v476_v37 = vld [vmem:[%s5619_s1 + $0xdb8] sm:$0xff]  ;;  %3427 = vmatprep.subr.bf16.mxu0 %v3426_v31  ;;  %v3430_v40 = vpack.c.bf16 %v444_v36, %v443_v35  ;;  %v427_v41 = vld [vmem:[%s5619_s1 + $0xc30] sm:$0xff]  ;;  %v446_v49 = vld [vmem:[%s5619_s1 + $0xcc8] sm:$0xff] }
  0xcb   :  { %3457 = vmatpush3.bf16.msra.mxu1 %v3456_v28  ;;  %v428_v43 = vld [vmem:[%s5619_s1 + $0xc38] sm:$0xff]  ;;  %v459_v44 = vld [vmem:[%s5619_s1 + $0xd30] sm:$0xff]  ;;  %v3462_v46 = vpack.c.bf16 %v476_v37, %v475_v52  ;;  %v477_v50 = vld [vmem:[%s5619_s1 + $0xdc0] sm:$0xff]  ;;  %v3434_v33 = vpack.c.bf16 %v446_v49, %v445_v48 }
  0xcc   :  { %3459 = vmatprep.subr.bf16.mxu1 %v3458_v34  ;;  %v460_v47 = vld [vmem:[%s5619_s1 + $0xd38] sm:$0xff]  ;;  %v478_v51 = vld [vmem:[%s5619_s1 + $0xdc8] sm:$0xff]  ;;  %v3432_v53 = vpack.c.bf16 %v428_v43, %v427_v41  ;;  %v429_v55 = vld [vmem:[%s5619_s1 + $0xc40] sm:$0xff] }
  0xcd   :  { %3429 = vmatpush3.bf16.msra.mxu0 %v3428_v38  ;;  %v3464_v54 = vpack.c.bf16 %v460_v47, %v459_v44  ;;  %v430_v56 = vld [vmem:[%s5619_s1 + $0xc48] sm:$0xff]  ;;  %v461_v57 = vld [vmem:[%s5619_s1 + $0xd40] sm:$0xff]  ;;  %v3466_v45 = vpack.c.bf16 %v478_v51, %v477_v50  ;;  %v447_v59 = vld [vmem:[%s5619_s1 + $0xcd0] sm:$0xff] }
  0xce   :  { %3431 = vmatprep.subr.bf16.mxu0 %v3430_v40  ;;  %v462_v58 = vld [vmem:[%s5619_s1 + $0xd48] sm:$0xff]  ;;  %v448_v60 = vld [vmem:[%s5619_s1 + $0xcd8] sm:$0xff]  ;;  %v479_v61 = vld [vmem:[%s5619_s1 + $0xdd0] sm:$0xff]  ;;  %v3436_v63 = vpack.c.bf16 %v430_v56, %v429_v55 }
  0xcf   :  { %3461 = vmatpush3.bf16.msra.mxu1 %v3460_v39  ;;  %v480_v62 = vld [vmem:[%s5619_s1 + $0xdd8] sm:$0xff]  ;;  %v3468_v0 = vpack.c.bf16 %v462_v58, %v461_v57  ;;  %v3438_v1 = vpack.c.bf16 %v448_v60, %v447_v59  ;;  %v431_v2 = vld [vmem:[%s5619_s1 + $0xc50] sm:$0xff]  ;;  %v449_v7 = vld [vmem:[%s5619_s1 + $0xce0] sm:$0xff] }
  0xd0   :  { %3463 = vmatprep.subr.bf16.mxu1 %v3462_v46  ;;  %v432_v3 = vld [vmem:[%s5619_s1 + $0xc58] sm:$0xff]  ;;  %v463_v4 = vld [vmem:[%s5619_s1 + $0xd50] sm:$0xff]  ;;  %v3470_v5 = vpack.c.bf16 %v480_v62, %v479_v61  ;;  %v450_v9 = vld [vmem:[%s5619_s1 + $0xce8] sm:$0xff] }
  0xd1   :  { %3433 = vmatpush3.bf16.msra.mxu0 %v3432_v53  ;;  %v464_v6 = vld [vmem:[%s5619_s1 + $0xd58] sm:$0xff]  ;;  %v481_v11 = vld [vmem:[%s5619_s1 + $0xde0] sm:$0xff]  ;;  %v482_v12 = vld [vmem:[%s5619_s1 + $0xde8] sm:$0xff]  ;;  %v3440_v14 = vpack.c.bf16 %v432_v3, %v431_v2  ;;  %v3442_v16 = vpack.c.bf16 %v450_v9, %v449_v7 }
  0xd2   :  { %3435 = vmatprep.subr.bf16.mxu0 %v3434_v33  ;;  %v3472_v15 = vpack.c.bf16 %v464_v6, %v463_v4  ;;  %v433_v17 = vld [vmem:[%s5619_s1 + $0xc60] sm:$0xff]  ;;  %v434_v18 = vld [vmem:[%s5619_s1 + $0xc68] sm:$0xff]  ;;  %v3474_v20 = vpack.c.bf16 %v482_v12, %v481_v11  ;;  %v451_v22 = vld [vmem:[%s5619_s1 + $0xcf0] sm:$0xff] }
  0xd3   :  { %3465 = vmatpush3.bf16.msra.mxu1 %v3464_v54  ;;  %v465_v19 = vld [vmem:[%s5619_s1 + $0xd60] sm:$0xff]  ;;  %v466_v21 = vld [vmem:[%s5619_s1 + $0xd68] sm:$0xff]  ;;  %v452_v23 = vld [vmem:[%s5619_s1 + $0xcf8] sm:$0xff]  ;;  %v3444_v26 = vpack.c.bf16 %v434_v18, %v433_v17 }
  0xd4   :  { %3467 = vmatprep.subr.bf16.mxu1 %v3466_v45  ;;  %v483_v24 = vld [vmem:[%s5619_s1 + $0xdf0] sm:$0xff]  ;;  %v484_v25 = vld [vmem:[%s5619_s1 + $0xdf8] sm:$0xff]  ;;  %v3476_v28 = vpack.c.bf16 %v466_v21, %v465_v19  ;;  %v3446_v31 = vpack.c.bf16 %v452_v23, %v451_v22  ;;  %v501_v35 = vld [vmem:[%s5619_s1 + $0xe80] sm:$0xff] }
  0xd5   :  { %3437 = vmatpush3.bf16.msra.mxu0 %v3436_v63  ;;  %v34_v27 = vld [vmem:[%s5618_s0 + $0x38] sm:$0xff]  ;;  %v435_v29 = vld [vmem:[%s5619_s1 + $0xc70] sm:$0xff]  ;;  %v3478_v34 = vpack.c.bf16 %v484_v25, %v483_v24  ;;  %v502_v36 = vld [vmem:[%s5619_s1 + $0xe88] sm:$0xff] }
  0xd6   :  { %3439 = vmatprep.subr.bf16.mxu0 %v3438_v1  ;;  %v436_v30 = vld [vmem:[%s5619_s1 + $0xc78] sm:$0xff]  ;;  %v467_v32 = vld [vmem:[%s5619_s1 + $0xd70] sm:$0xff]  ;;  %v533_v52 = vld [vmem:[%s5619_s1 + $0xf80] sm:$0xff]  ;;  %v751_v38 = vcombine.high %v34_v27, %v34_v27  ;;  %v3482_v41 = vpack.c.bf16 %v502_v36, %v501_v35  ;;  %v5182_v51 = vrot.slane %v34_v27, %v3859_v13 }
  0xd7   :  { %3469 = vmatpush3.bf16.msra.mxu1 %v3468_v0  ;;  %v468_v42 = vld [vmem:[%s5619_s1 + $0xd78] sm:$0xff]  ;;  %v534_v37 = vld [vmem:[%s5619_s1 + $0xf88] sm:$0xff]  ;;  %v3448_v39 = vpack.c.bf16 %v436_v30, %v435_v29  ;;  %v485_v43 = vld [vmem:[%s5619_s1 + $0xe00] sm:$0xff] }
  0xd8   :  { %3471 = vmatprep.subr.bf16.mxu1 %v3470_v5  ;;  %v3480_v40 = vpack.c.bf16 %v468_v42, %v467_v32  ;;  %v486_v44 = vld [vmem:[%s5619_s1 + $0xe08] sm:$0xff]  ;;  %v517_v46 = vld [vmem:[%s5619_s1 + $0xf00] sm:$0xff]  ;;  %v3514_v47 = vpack.c.bf16 %v534_v37, %v533_v52  ;;  %v503_v49 = vld [vmem:[%s5619_s1 + $0xe90] sm:$0xff]  ;;  %v5191_v33 = vrot.slane %v751_v38, %v3859_v13  ;;  %v766_v0 = vcombine.high %v5182_v51, %v5182_v51 }
  0xd9   :  { %3441 = vmatpush3.bf16.msra.mxu0 %v3440_v14  ;;  %v518_v48 = vld [vmem:[%s5619_s1 + $0xf08] sm:$0xff]  ;;  %v504_v50 = vld [vmem:[%s5619_s1 + $0xe98] sm:$0xff]  ;;  %v535_v53 = vld [vmem:[%s5619_s1 + $0xf90] sm:$0xff]  ;;  %v3484_v55 = vpack.c.bf16 %v486_v44, %v485_v43 }
  0xda   :  { %3443 = vmatprep.subr.bf16.mxu0 %v3442_v16  ;;  %v536_v54 = vld [vmem:[%s5619_s1 + $0xf98] sm:$0xff]  ;;  %v3516_v56 = vpack.c.bf16 %v518_v48, %v517_v46  ;;  %v3486_v57 = vpack.c.bf16 %v504_v50, %v503_v49  ;;  %v487_v45 = vld [vmem:[%s5619_s1 + $0xe10] sm:$0xff]  ;;  %v505_v62 = vld [vmem:[%s5619_s1 + $0xea0] sm:$0xff]  ;;  %v767_v3 = vcombine.high %v5191_v33, %v5191_v33 }
  0xdb   :  { %3473 = vmatpush3.bf16.msra.mxu1 %v3472_v15  ;;  %v488_v58 = vld [vmem:[%s5619_s1 + $0xe18] sm:$0xff]  ;;  %v519_v59 = vld [vmem:[%s5619_s1 + $0xf10] sm:$0xff]  ;;  %v3518_v60 = vpack.c.bf16 %v536_v54, %v535_v53  ;;  %v506_v63 = vld [vmem:[%s5619_s1 + $0xea8] sm:$0xff] }
  0xdc   :  { %3475 = vmatprep.subr.bf16.mxu1 %v3474_v20  ;;  %v520_v61 = vld [vmem:[%s5619_s1 + $0xf18] sm:$0xff]  ;;  %v537_v1 = vld [vmem:[%s5619_s1 + $0xfa0] sm:$0xff]  ;;  %v538_v2 = vld [vmem:[%s5619_s1 + $0xfa8] sm:$0xff]  ;;  %v3488_v4 = vpack.c.bf16 %v488_v58, %v487_v45  ;;  %v3490_v6 = vpack.c.bf16 %v506_v63, %v505_v62 }
  0xdd   :  { %3445 = vmatpush3.bf16.msra.mxu0 %v3444_v26  ;;  %v3520_v5 = vpack.c.bf16 %v520_v61, %v519_v59  ;;  %v490_v7 = vld [vmem:[%s5619_s1 + $0xe28] sm:$0xff]  ;;  %v521_v9 = vld [vmem:[%s5619_s1 + $0xf20] sm:$0xff]  ;;  %v3522_v11 = vpack.c.bf16 %v538_v2, %v537_v1  ;;  %v507_v12 = vld [vmem:[%s5619_s1 + $0xeb0] sm:$0xff] }
  0xde   :  { %3447 = vmatprep.subr.bf16.mxu0 %v3446_v31  ;;  %v508_v14 = vld [vmem:[%s5619_s1 + $0xeb8] sm:$0xff]  ;;  %v539_v15 = vld [vmem:[%s5619_s1 + $0xfb0] sm:$0xff]  ;;  %v509_v25 = vld [vmem:[%s5619_s1 + $0xec0] sm:$0xff] }
  0xdf   :  { %3477 = vmatpush3.bf16.msra.mxu1 %v3476_v28  ;;  %v540_v16 = vld [vmem:[%s5619_s1 + $0xfb8] sm:$0xff]  ;;  %v3494_v19 = vpack.c.bf16 %v508_v14, %v507_v12  ;;  %v491_v20 = vld [vmem:[%s5619_s1 + $0xe30] sm:$0xff]  ;;  %v510_v26 = vld [vmem:[%s5619_s1 + $0xec8] sm:$0xff] }
  0xe0   :  { %3479 = vmatprep.subr.bf16.mxu1 %v3478_v34  ;;  %v492_v21 = vld [vmem:[%s5619_s1 + $0xe38] sm:$0xff]  ;;  %v523_v22 = vld [vmem:[%s5619_s1 + $0xf30] sm:$0xff]  ;;  %v3526_v23 = vpack.c.bf16 %v540_v16, %v539_v15  ;;  %v541_v27 = vld [vmem:[%s5619_s1 + $0xfc0] sm:$0xff]  ;;  %v3498_v30 = vpack.c.bf16 %v510_v26, %v509_v25 }
  0xe1   :  { %3449 = vmatpush3.bf16.msra.mxu0 %v3448_v39  ;;  %v524_v24 = vld [vmem:[%s5619_s1 + $0xf38] sm:$0xff]  ;;  %v542_v28 = vld [vmem:[%s5619_s1 + $0xfc8] sm:$0xff]  ;;  %v3496_v31 = vpack.c.bf16 %v492_v21, %v491_v20  ;;  %v493_v32 = vld [vmem:[%s5619_s1 + $0xe40] sm:$0xff] }
  0xe2   :  { %3483 = vmatprep.subr.bf16.mxu0 %v3482_v41  ;;  %v3528_v29 = vpack.c.bf16 %v524_v24, %v523_v22  ;;  %v494_v34 = vld [vmem:[%s5619_s1 + $0xe48] sm:$0xff]  ;;  %v525_v42 = vld [vmem:[%s5619_s1 + $0xf40] sm:$0xff]  ;;  %v3530_v35 = vpack.c.bf16 %v542_v28, %v541_v27  ;;  %v511_v52 = vld [vmem:[%s5619_s1 + $0xed0] sm:$0xff] }
  0xe3   :  { %3481 = vmatpush3.bf16.msra.mxu1 %v3480_v40  ;;  %v526_v36 = vld [vmem:[%s5619_s1 + $0xf48] sm:$0xff]  ;;  %v512_v37 = vld [vmem:[%s5619_s1 + $0xed8] sm:$0xff]  ;;  %v543_v38 = vld [vmem:[%s5619_s1 + $0xfd0] sm:$0xff]  ;;  %v3500_v40 = vpack.c.bf16 %v494_v34, %v493_v32 }
  0xe4   :  { %3515 = vmatprep.subr.bf16.mxu1 %v3514_v47  ;;  %1736 = vmatmul.mubr.f32.vlgmr.msra.gmra.mrb[12].mxu0 %v4975_v8  ;;  %v489_v8 = vld [vmem:[%s5619_s1 + $0xe20] sm:$0xff]  ;;  %v544_v39 = vld [vmem:[%s5619_s1 + $0xfd8] sm:$0xff]  ;;  %v3532_v41 = vpack.c.bf16 %v526_v36, %v525_v42  ;;  %v3502_v43 = vpack.c.bf16 %v512_v37, %v511_v52  ;;  %v495_v44 = vld [vmem:[%s5619_s1 + $0xe50] sm:$0xff] }
  0xe5   :  { %3485 = vmatpush3.bf16.msra.mxu0 %v3484_v55  ;;  %1875 = vmatprep.mubr.f32.mxu0 %v766_v0  ;;  %v3492_v17 = vpack.c.bf16 %v490_v7, %v489_v8  ;;  %v496_v46 = vld [vmem:[%s5619_s1 + $0xe58] sm:$0xff]  ;;  %v527_v47 = vld [vmem:[%s5619_s1 + $0xf50] sm:$0xff]  ;;  %v3534_v48 = vpack.c.bf16 %v544_v39, %v543_v38  ;;  %v513_v50 = vld [vmem:[%s5619_s1 + $0xee0] sm:$0xff] }
  0xe6   :  { %1806 = vmatmul.mubr.f32.vlgmr.msra.gmra.mrb[12].mxu1 %v4984_v10  ;;  %3487 = vmatprep.subr.bf16.mxu0 %v3486_v57  ;;  %v522_v10 = vld [vmem:[%s5619_s1 + $0xf28] sm:$0xff]  ;;  %v528_v49 = vld [vmem:[%s5619_s1 + $0xf58] sm:$0xff]  ;;  %v545_v54 = vld [vmem:[%s5619_s1 + $0xfe0] sm:$0xff] }
  0xe7   :  { %3517 = vmatpush3.bf16.msra.mxu1 %v3516_v56  ;;  %1945 = vmatprep.mubr.f32.mxu1 %v767_v3  ;;  %v3524_v18 = vpack.c.bf16 %v522_v10, %v521_v9  ;;  %v514_v53 = vld [vmem:[%s5619_s1 + $0xee8] sm:$0xff]  ;;  %v3504_v56 = vpack.c.bf16 %v496_v46, %v495_v44  ;;  %v3536_v57 = vpack.c.bf16 %v528_v49, %v527_v47  ;;  %v497_v58 = vld [vmem:[%s5619_s1 + $0xe60] sm:$0xff]  ;;  %v515_v0 = vld [vmem:[%s5619_s1 + $0xef0] sm:$0xff] }
  0xe8   :  { %3519 = vmatprep.subr.bf16.mxu1 %v3518_v60  ;;  %v546_v55 = vld [vmem:[%s5619_s1 + $0xfe8] sm:$0xff]  ;;  %v3506_v45 = vpack.c.bf16 %v514_v53, %v513_v50  ;;  %v529_v60 = vld [vmem:[%s5619_s1 + $0xf60] sm:$0xff]  ;;  %v516_v1 = vld [vmem:[%s5619_s1 + $0xef8] sm:$0xff] }
  0xe9   :  { %3489 = vmatpush3.bf16.msra.mxu0 %v3488_v4  ;;  %v498_v59 = vld [vmem:[%s5619_s1 + $0xe68] sm:$0xff]  ;;  %v3538_v62 = vpack.c.bf16 %v546_v55, %v545_v54  ;;  %v2357_v2 = vld [vmem:[%s5620_s2] ss:$0 sm:$0xff]  ;;  %v3510_v14 = vpack.c.bf16 %v516_v1, %v515_v0  ;;  %v499_v15 = vld [vmem:[%s5619_s1 + $0xe70] sm:$0xff] }
  0xea   :  { %3491 = vmatprep.subr.bf16.mxu0 %v3490_v6  ;;  %v530_v63 = vld [vmem:[%s5619_s1 + $0xf68] sm:$0xff]  ;;  %v548_v6 = vld [vmem:[%s5619_s1 + $0xff8] sm:$0xff]  ;;  %v3508_v9 = vpack.c.bf16 %v498_v59, %v497_v58  ;;  %v565_v21 = vld [vmem:[%s5619_s1 + $0x1080] sm:$0xff] }
  0xeb   :  { %3521 = vmatpush3.bf16.msra.mxu1 %v3520_v5  ;;  %v547_v5 = vld [vmem:[%s5619_s1 + $0xff0] sm:$0xff]  ;;  %v3540_v12 = vpack.c.bf16 %v530_v63, %v529_v60  ;;  %v500_v16 = vld [vmem:[%s5619_s1 + $0xe78] sm:$0xff]  ;;  %v566_v22 = vld [vmem:[%s5619_s1 + $0x1088] sm:$0xff] }
  0xec   :  { %3523 = vmatprep.subr.bf16.mxu1 %v3522_v11  ;;  %v35_v11 = vld [vmem:[%s5618_s0 + $0x40] sm:$0xff]  ;;  %v532_v20 = vld [vmem:[%s5619_s1 + $0xf78] sm:$0xff]  ;;  %v598_v24 = vld [vmem:[%s5619_s1 + $0x1188] sm:$0xff]  ;;  %v3512_v27 = vpack.c.bf16 %v500_v16, %v499_v15 }
  0xed   :  { %3493 = vmatpush3.bf16.msra.mxu0 %v3492_v17  ;;  %v531_v17 = vld [vmem:[%s5619_s1 + $0xf70] sm:$0xff]  ;;  %v768_v25 = vcombine.high %v35_v11, %v35_v11  ;;  %v581_v32 = vld [vmem:[%s5619_s1 + $0x1100] sm:$0xff]  ;;  %v582_v42 = vld [vmem:[%s5619_s1 + $0x1108] sm:$0xff]  ;;  %v5394_v52 = vrot.slane %v35_v11, %v3859_v13 }
  0xee   :  { %3495 = vmatprep.subr.bf16.mxu0 %v3494_v19  ;;  %v3542_v19 = vpack.c.bf16 %v548_v6, %v547_v5  ;;  %v3544_v28 = vpack.c.bf16 %v532_v20, %v531_v17  ;;  %v568_v36 = vld [vmem:[%s5619_s1 + $0x1098] sm:$0xff]  ;;  %v599_v37 = vld [vmem:[%s5619_s1 + $0x1190] sm:$0xff]  ;;  %v569_v49 = vld [vmem:[%s5619_s1 + $0x10a0] sm:$0xff] }
  0xef   :  { %3525 = vmatpush3.bf16.msra.mxu1 %v3524_v18  ;;  %v600_v38 = vld [vmem:[%s5619_s1 + $0x1198] sm:$0xff]  ;;  %v5403_v39 = vrot.slane %v768_v25, %v3859_v13  ;;  %v551_v44 = vld [vmem:[%s5619_s1 + $0x1010] sm:$0xff]  ;;  %v570_v50 = vld [vmem:[%s5619_s1 + $0x10a8] sm:$0xff]  ;;  %v783_v53 = vcombine.high %v5394_v52, %v5394_v52 }
  0xf0   :  { %3527 = vmatprep.subr.bf16.mxu1 %v3526_v23  ;;  %v597_v23 = vld [vmem:[%s5619_s1 + $0x1180] sm:$0xff]  ;;  %v552_v46 = vld [vmem:[%s5619_s1 + $0x1018] sm:$0xff]  ;;  %v583_v47 = vld [vmem:[%s5619_s1 + $0x1110] sm:$0xff]  ;;  %v3582_v13 = vpack.c.bf16 %v600_v38, %v599_v37  ;;  %v3554_v58 = vpack.c.bf16 %v570_v50, %v569_v49 }
  0xf1   :  { %3497 = vmatpush3.bf16.msra.mxu0 %v3496_v31  ;;  %v3546_v31 = vpack.c.bf16 %v566_v22, %v565_v21  ;;  %v3578_v34 = vpack.c.bf16 %v598_v24, %v597_v23  ;;  %v601_v54 = vld [vmem:[%s5619_s1 + $0x11a0] sm:$0xff]  ;;  %v602_v55 = vld [vmem:[%s5619_s1 + $0x11a8] sm:$0xff]  ;;  %v572_v63 = vld [vmem:[%s5619_s1 + $0x10b8] sm:$0xff] }
  0xf2   :  { %3499 = vmatprep.subr.bf16.mxu0 %v3498_v30  ;;  %v550_v30 = vld [vmem:[%s5619_s1 + $0x1008] sm:$0xff]  ;;  %v585_v60 = vld [vmem:[%s5619_s1 + $0x1120] sm:$0xff]  ;;  %v603_v0 = vld [vmem:[%s5619_s1 + $0x11b0] sm:$0xff] }
  0xf3   :  { %3529 = vmatpush3.bf16.msra.mxu1 %v3528_v29  ;;  %v549_v29 = vld [vmem:[%s5619_s1 + $0x1000] sm:$0xff]  ;;  %v554_v59 = vld [vmem:[%s5619_s1 + $0x1028] sm:$0xff]  ;;  %v604_v1 = vld [vmem:[%s5619_s1 + $0x11b8] sm:$0xff] }
  0xf4   :  { %3531 = vmatprep.subr.bf16.mxu1 %v3530_v35  ;;  %v567_v35 = vld [vmem:[%s5619_s1 + $0x1090] sm:$0xff]  ;;  %v556_v6 = vld [vmem:[%s5619_s1 + $0x1038] sm:$0xff]  ;;  %v573_v11 = vld [vmem:[%s5619_s1 + $0x10c0] sm:$0xff] }
  0xf5   :  { %3501 = vmatpush3.bf16.msra.mxu0 %v3500_v40  ;;  %v3548_v40 = vpack.c.bf16 %v550_v30, %v549_v29  ;;  %v555_v5 = vld [vmem:[%s5619_s1 + $0x1030] sm:$0xff]  ;;  %v589_v20 = vld [vmem:[%s5619_s1 + $0x1140] sm:$0xff]  ;;  %v590_v22 = vld [vmem:[%s5619_s1 + $0x1148] sm:$0xff] }
  0xf6   :  { %3503 = vmatprep.subr.bf16.mxu0 %v3502_v43  ;;  %v3550_v43 = vpack.c.bf16 %v568_v36, %v567_v35  ;;  %v3560_v15 = vpack.c.bf16 %v556_v6, %v555_v5  ;;  %v575_v23 = vld [vmem:[%s5619_s1 + $0x10d0] sm:$0xff]  ;;  %v576_v24 = vld [vmem:[%s5619_s1 + $0x10d8] sm:$0xff]  ;;  %v577_v36 = vld [vmem:[%s5619_s1 + $0x10e0] sm:$0xff] }
  0xf7   :  { %3533 = vmatpush3.bf16.msra.mxu1 %v3532_v41  ;;  %v2397_v61 = vpop.f32.mrb[0].mxu0  ;;  %v3580_v41 = vpack.c.bf16 %v582_v42, %v581_v32  ;;  %v607_v25 = vld [vmem:[%s5619_s1 + $0x11d0] sm:$0xff]  ;;  %v3566_v29 = vpack.c.bf16 %v576_v24, %v575_v23  ;;  %v560_v32 = vld [vmem:[%s5619_s1 + $0x1058] sm:$0xff]  ;;  %v578_v37 = vld [vmem:[%s5619_s1 + $0x10e8] sm:$0xff] }
  0xf8   :  { %3535 = vmatprep.subr.bf16.mxu1 %v3534_v48  ;;  %v2398_v3 = vpop.f32.mrb[1].mxu0  ;;  %v584_v48 = vld [vmem:[%s5619_s1 + $0x1118] sm:$0xff]  ;;  %v559_v30 = vld [vmem:[%s5619_s1 + $0x1050] sm:$0xff]  ;;  %v609_v38 = vld [vmem:[%s5619_s1 + $0x11e0] sm:$0xff] }
  0xf9   :  { %v2432_v4 = vpop.f32.mrb[0].mxu1  ;;  %v2399_v8 = vadd.f32 %v2398_v3, %v2397_v61  ;;  %3505 = vmatpush3.bf16.msra.mxu0 %v3504_v56  ;;  %v784_v56 = vcombine.high %v5403_v39, %v5403_v39  ;;  %v3586_v61 = vpack.c.bf16 %v602_v55, %v601_v54  ;;  %v592_v35 = vld [vmem:[%s5619_s1 + $0x1158] sm:$0xff]  ;;  %v594_v50 = vld [vmem:[%s5619_s1 + $0x1168] sm:$0xff] }
  0xfa   :  { %v2433_v7 = vpop.f32.mrb[1].mxu1  ;;  %3507 = vmatprep.subr.bf16.mxu0 %v3506_v45  ;;  %v3584_v45 = vpack.c.bf16 %v584_v48, %v583_v47  ;;  %v562_v47 = vld [vmem:[%s5619_s1 + $0x1068] sm:$0xff]  ;;  %v580_v54 = vld [vmem:[%s5619_s1 + $0x10f8] sm:$0xff] }
  0xfb   :  { %v2434_v10 = vadd.f32 %v2433_v7, %v2432_v4  ;;  %3537 = vmatpush3.bf16.msra.mxu1 %v3536_v57  ;;  %v898_v18 = vadd.f32 %v2399_v8, %v2357_v2  ;;  %v3552_v57 = vpack.c.bf16 %v552_v46, %v551_v44  ;;  %v587_v8 = vld [vmem:[%s5619_s1 + $0x1130] sm:$0xff]  ;;  %v3590_v7 = vpack.c.bf16 %v604_v1, %v603_v0  ;;  %v561_v46 = vld [vmem:[%s5619_s1 + $0x1060] sm:$0xff] }
  0xfc   :  { %3539 = vmatprep.subr.bf16.mxu1 %v3538_v62  ;;  %v571_v62 = vld [vmem:[%s5619_s1 + $0x10b0] sm:$0xff]  ;;  %v3570_v44 = vpack.c.bf16 %v578_v37, %v577_v36 }
  0xfd   :  { %v5373_v26 = vadd.f32 %v2434_v10, %v898_v18  ;;  %3509 = vmatpush3.bf16.msra.mxu0 %v3508_v9  ;;  %v3558_v4 = vpack.c.bf16 %v572_v63, %v571_v62  ;;  %v588_v9 = vld [vmem:[%s5619_s1 + $0x1138] sm:$0xff]  ;;  %v574_v10 = vld [vmem:[%s5619_s1 + $0x10c8] sm:$0xff]  ;;  %v557_v18 = vld [vmem:[%s5619_s1 + $0x1040] sm:$0xff] }
  0xfe   :  { %3511 = vmatprep.subr.bf16.mxu0 %v3510_v14  ;;  %v606_v14 = vld [vmem:[%s5619_s1 + $0x11c8] sm:$0xff]  ;;  %v3592_v16 = vpack.c.bf16 %v588_v9, %v587_v8  ;;  %v3562_v17 = vpack.c.bf16 %v574_v10, %v573_v11  ;;  %v563_v62 = vld [vmem:[%s5619_s1 + $0x1070] sm:$0xff]  ;;  %v564_v63 = vld [vmem:[%s5619_s1 + $0x1078] sm:$0xff]  ;;  %v3665_v9 = vmov 0.0|0.0   ;;  %v3667_v10 = vmov 0.0  }
  0xff   :  { %3541 = vmatpush3.bf16.msra.mxu1 %v3540_v12  ;;  %v605_v12 = vld [vmem:[%s5619_s1 + $0x11c0] sm:$0xff]  ;;  %v3576_v5 = vpack.c.bf16 %v564_v63, %v563_v62  ;;  %v614_v8 = vld [vmem:[%s5619_s1 + $0x1208] sm:$0xff] }
 0x100   :  { %3543 = vmatprep.subr.bf16.mxu1 %v3542_v19  ;;  %v558_v19 = vld [vmem:[%s5619_s1 + $0x1048] sm:$0xff]  ;;  %v3594_v21 = vpack.c.bf16 %v606_v14, %v605_v12 }
 0x101   :  { %3513 = vmatpush3.bf16.msra.mxu0 %v3512_v27  ;;  %v608_v27 = vld [vmem:[%s5619_s1 + $0x11d8] sm:$0xff]  ;;  %v2358_v11 = vld.sshfl [vmem:[%s5618_s0 + $0x48] sm:$0x3 pattern:$0x76325410] }
 0x102   :  { %3547 = vmatprep.subr.bf16.mxu0 %v3546_v31  ;;  %v3596_v31 = vpack.c.bf16 %v590_v22, %v589_v20  ;;  %v3598_v42 = vpack.c.bf16 %v608_v27, %v607_v25 }
 0x103   :  { %3545 = vmatpush3.bf16.msra.mxu1 %v3544_v28  ;;  %v3564_v28 = vpack.c.bf16 %v558_v19, %v557_v18 }
 0x104   :  { %3579 = vmatprep.subr.bf16.mxu1 %v3578_v34  ;;  %1876 = vmatmul.mubr.f32.vlgmr.msra.gmra.mrb[14].mxu0 %v5182_v51  ;;  %v553_v51 = vld [vmem:[%s5619_s1 + $0x1020] sm:$0xff]  ;;  %v591_v34 = vld [vmem:[%s5619_s1 + $0x1150] sm:$0xff] }
 0x105   :  { %3549 = vmatpush3.bf16.msra.mxu0 %v3548_v40  ;;  %2015 = vmatprep.mubr.f32.mxu0 %v783_v53  ;;  %v3556_v2 = vpack.c.bf16 %v554_v59, %v553_v51  ;;  %v610_v40 = vld [vmem:[%s5619_s1 + $0x11e8] sm:$0xff]  ;;  %v579_v53 = vld [vmem:[%s5619_s1 + $0x10f0] sm:$0xff]  ;;  %v3572_v59 = vpack.c.bf16 %v562_v47, %v561_v46 }
 0x106   :  { %1946 = vmatmul.mubr.f32.vlgmr.msra.gmra.mrb[14].mxu1 %v5191_v33  ;;  %3551 = vmatprep.subr.bf16.mxu0 %v3550_v43  ;;  %v586_v33 = vld [vmem:[%s5619_s1 + $0x1128] sm:$0xff]  ;;  %v3600_v43 = vpack.c.bf16 %v592_v35, %v591_v34  ;;  %v3602_v49 = vpack.c.bf16 %v610_v40, %v609_v38  ;;  %v2162_v34 = vld [vmem:[%s5621_s3] sm:$0xff]  ;;  %v2164_v40 = vld [vmem:[%s5621_s3 + $0x10] sm:$0xff] }
 0x107   :  { %3581 = vmatpush3.bf16.msra.mxu1 %v3580_v41  ;;  %2085 = vmatprep.mubr.f32.mxu1 %v784_v56  ;;  %v3588_v3 = vpack.c.bf16 %v586_v33, %v585_v60  ;;  %v3568_v41 = vpack.c.bf16 %v560_v32, %v559_v30  ;;  %v3574_v33 = vpack.c.bf16 %v580_v54, %v579_v53  ;;  %v2249_v46 = vld [vmem:[%s5623_s5 + $0x8] sm:$0xff] }
 0x108   :  { %3583 = vmatprep.subr.bf16.mxu1 %v3582_v13  ;;  %v593_v13 = vld [vmem:[%s5619_s1 + $0x1160] sm:$0xff] }
 0x109   :  { %3553 = vmatpush3.bf16.msra.mxu0 %v3552_v57  ;;  %v611_v57 = vld [vmem:[%s5619_s1 + $0x11f0] sm:$0xff] }
 0x10a   :  { %3555 = vmatprep.subr.bf16.mxu0 %v3554_v58 }
 0x10b   :  { %3585 = vmatpush3.bf16.msra.mxu1 %v3584_v45  ;;  %v612_v45 = vld [vmem:[%s5619_s1 + $0x11f8] sm:$0xff] }
 0x10c   :  { %3587 = vmatprep.subr.bf16.mxu1 %v3586_v61  ;;  %v3604_v61 = vpack.c.bf16 %v594_v50, %v593_v13  ;;  %v3606_v1 = vpack.c.bf16 %v612_v45, %v611_v57 }
 0x10d   :  { %3557 = vmatpush3.bf16.msra.mxu0 %v3556_v2  ;;  %v595_v2 = vld [vmem:[%s5619_s1 + $0x1170] sm:$0xff] }
 0x10e   :  { %3559 = vmatprep.subr.bf16.mxu0 %v3558_v4 }
 0x10f   :  { %3589 = vmatpush3.bf16.msra.mxu1 %v3588_v3  ;;  %v596_v3 = vld [vmem:[%s5619_s1 + $0x1178] sm:$0xff] }
 0x110   :  { %3591 = vmatprep.subr.bf16.mxu1 %v3590_v7  ;;  %v3608_v6 = vpack.c.bf16 %v596_v3, %v595_v2 }
 0x111   :  { %3561 = vmatpush3.bf16.msra.mxu0 %v3560_v15 }
 0x112   :  { %3563 = vmatprep.subr.bf16.mxu0 %v3562_v17 }
 0x113   :  { %3593 = vmatpush3.bf16.msra.mxu1 %v3592_v16 }
 0x114   :  { %3595 = vmatprep.subr.bf16.mxu1 %v3594_v21 }
 0x115   :  { %3565 = vmatpush3.bf16.msra.mxu0 %v3564_v28 }
 0x116   :  { %3567 = vmatprep.subr.bf16.mxu0 %v3566_v29 }
 0x117   :  { %3597 = vmatpush3.bf16.msra.mxu1 %v3596_v31  ;;  %v2467_v48 = vpop.f32.mrb[2].mxu0 }
 0x118   :  { %3599 = vmatprep.subr.bf16.mxu1 %v3598_v42  ;;  %v2468_v55 = vpop.f32.mrb[3].mxu0  ;;  %v2163_v42 = vld [vmem:[%s5621_s3 + $0x8] sm:$0xff] }
 0x119   :  { %v2502_v56 = vpop.f32.mrb[2].mxu1  ;;  %v2469_v58 = vadd.f32 %v2468_v55, %v2467_v48  ;;  %3569 = vmatpush3.bf16.msra.mxu0 %v3568_v41  ;;  %v3614_v36 = vpack.c.bf16 %v2163_v42, %v2162_v34  ;;  %v2165_v41 = vld [vmem:[%s5621_s3 + $0x18] sm:$0xff] }
 0x11a   :  { %v2503_v51 = vpop.f32.mrb[3].mxu1  ;;  %3571 = vmatprep.subr.bf16.mxu0 %v3570_v44  ;;  %v2248_v44 = vld [vmem:[%s5623_s5] sm:$0xff] }
 0x11b   :  { %v2504_v60 = vadd.f32 %v2503_v51, %v2502_v56  ;;  %3601 = vmatpush3.bf16.msra.mxu1 %v3600_v43  ;;  %v1038_v0 = vadd.f32 %v2469_v58, %v5373_v26  ;;  %v613_v26 = vld [vmem:[%s5619_s1 + $0x1200] sm:$0xff]  ;;  %v3617_v43 = vpack.c.bf16 %v2165_v41, %v2164_v40  ;;  %v3620_v47 = vpack.c.bf16 %v2249_v46, %v2248_v44 }
 0x11c   :  { %3603 = vmatprep.subr.bf16.mxu1 %v3602_v49  ;;  %v3611_v7 = vpack.c.bf16 %v614_v8, %v613_v26 }
 0x11d   :  { %v1108_v4 = vadd.f32 %v2504_v60, %v1038_v0  ;;  %3573 = vmatpush3.bf16.msra.mxu0 %v3572_v59 }
 0x11e   :  { %3575 = vmatprep.subr.bf16.mxu0 %v3574_v33 }
 0x11f   :  { %3605 = vmatpush3.bf16.msra.mxu1 %v3604_v61 }
 0x120   :  { %3607 = vmatprep.subr.bf16.mxu1 %v3606_v1 }
 0x121   :  { %3577 = vmatpush3.bf16.msra.mxu0 %v3576_v5 }
 0x122   :  { %3610 = vmatprep.subr.bf16.mxu0 %v3665_v9 }
 0x123   :  { %3609 = vmatpush3.bf16.msra.mxu1 %v3608_v6 }
 0x124   :  { %3613 = vmatprep.subr.bf16.mxu1 %v3665_v9  ;;  %2016 = vmatmul.mubr.f32.vlgmr.msra.gmra.mrb[16].mxu0 %v5394_v52 }
 0x125   :  { %3612 = vmatpush3.bf16.msra.mxu0 %v3611_v7  ;;  %3011 = vmatprep.mubr.msk.f32.mxu0 %vm3666_vm1, %v3667_v10 }
 0x126   :  { %2086 = vmatmul.mubr.f32.vlgmr.msra.gmra.mrb[16].mxu1 %v5403_v39  ;;  %3619 = vmatprep.subr.bf16.mxu0 %v3665_v9 }
 0x127   :  { %3022 = vmatprep.mubr.msk.f32.mxu1 %vm3666_vm1, %v3667_v10  ;;  %3615 = vmatpush3.bf16.msra.mxu1 %v3614_v36 }
 0x128   :  { %3012 = vmatmul.mubr.msk.f32.vlgmr.msra.gmra.mrb[18].mxu0 %vm828_vm0, %v2358_v11  ;;  %3616 = vmatprep.subr.bf16.mxu1 %v3665_v9 }
 0x129   :  { %3031 = vmatprep.mubr.msk.f32.mxu0 %vm3666_vm1, %v3667_v10  ;;  %3621 = vmatpush3.bf16.msra.mxu0 %v3620_v47 }
 0x12a   :  { %3029 = vmatprep.subr.mxu0 %v3667_v10 }
 0x12b   :  { %3618 = vmatpush3.bf16.msra.mxu1 %v3617_v43 }
 0x137   :  { %v2537_v12 = vpop.f32.mrb[4].mxu0 }
 0x138   :  { %v2538_v14 = vpop.f32.mrb[5].mxu0 }
 0x139   :  { %v2572_v15 = vpop.f32.mrb[4].mxu1  ;;  %v2539_v16 = vadd.f32 %v2538_v14, %v2537_v12 }
 0x13a   :  { %v2573_v52 = vpop.f32.mrb[5].mxu1 }
 0x13b   :  { %v2574_v17 = vadd.f32 %v2573_v52, %v2572_v15  ;;  %v1178_v39 = vadd.f32 %v2539_v16, %v1108_v4 }
 0x13d   :  { %v1248_v18 = vadd.f32 %v2574_v17, %v1178_v39  ;;  %v2250_v17 = vld [vmem:[%s5623_s5 + $0x10] sm:$0x3f]  ;;  %v2360_v39 = vld [vmem:[%s5622_s4] ss:$0 sm:$0xff]  ;;  %s3668_s4 = smov [#allocation2]  }
 0x13e   :  { %3030 = vmatpush3.msk.msra.mxu0 %vm2262_vm3, %v2250_v17  ;;  %s2349_s5 = sshll.u32 %s3668_s4, 4  ;;  %s2350_s5 = int_to_ptr.vmem [resolvable:$true] %s2349_s5 }
 0x13f   :  { %s3640_s14 = scalar_lea.vmem %s2350_s5, 32  ;;  %p3645_p1 = scmp.lt.s32.totalorder %s2350_s5, %s2350_s5 }
 0x140   :  { %p3641_p0 = scmp.ne.s32.totalorder %s2350_s5, %s3640_s14  ;;  %p3646_p2 = scmp.lt.s32.totalorder %s3640_s14, %s3640_s14 }
 0x142   :  { %p3647_p3 = por %p3646_p2, %p3645_p1 }
 0x144   :  { %p3648_p4 = pnand %p3647_p3, %p3641_p0 }
 0x157   :  { %v2607_v19 = vpop.f32.mrb[6].mxu0 }
 0x158   :  { %v2608_v20 = vpop.f32.mrb[7].mxu0 }
 0x159   :  { %v2642_v21 = vpop.f32.mrb[6].mxu1  ;;  %v2609_v22 = vadd.f32 %v2608_v20, %v2607_v19 }
 0x15a   :  { %v2643_v23 = vpop.f32.mrb[7].mxu1 }
 0x15b   :  { %v2644_v24 = vadd.f32 %v2643_v23, %v2642_v21  ;;  %v1318_v25 = vadd.f32 %v2609_v22, %v1248_v18  ;;  %v2362_v22 = vld [vmem:[%s5624_s6] ss:$0 sm:$0xff] }
 0x15d   :  { %v1388_v27 = vadd.f32 %v2644_v24, %v1318_v25 }
 0x177   :  { %v2677_v28 = vpop.f32.mrb[8].mxu0 }
 0x178   :  { %v2678_v31 = vpop.f32.mrb[9].mxu0 }
 0x179   :  { %v2712_v29 = vpop.f32.mrb[8].mxu1  ;;  %v2679_v30 = vadd.f32 %v2678_v31, %v2677_v28 }
 0x17a   :  { %v2713_v32 = vpop.f32.mrb[9].mxu1 }
 0x17b   :  { %v2714_v35 = vadd.f32 %v2713_v32, %v2712_v29  ;;  %v1458_v37 = vadd.f32 %v2679_v30, %v1388_v27 }
 0x17d   :  { %v1528_v38 = vadd.f32 %v2714_v35, %v1458_v37 }
 0x197   :  { %v2747_v13 = vpop.f32.mrb[10].mxu0 }
 0x198   :  { %v2748_v48 = vpop.f32.mrb[11].mxu0 }
 0x199   :  { %v2782_v49 = vpop.f32.mrb[10].mxu1  ;;  %v2749_v50 = vadd.f32 %v2748_v48, %v2747_v13 }
 0x19a   :  { %v2783_v53 = vpop.f32.mrb[11].mxu1 }
 0x19b   :  { %v2784_v54 = vadd.f32 %v2783_v53, %v2782_v49  ;;  %v1598_v55 = vadd.f32 %v2749_v50, %v1528_v38 }
 0x19d   :  { %v1668_v56 = vadd.f32 %v2784_v54, %v1598_v55 }
 0x1b7   :  { %v2817_v57 = vpop.f32.mrb[12].mxu0 }
 0x1b8   :  { %v2818_v45 = vpop.f32.mrb[13].mxu0 }
 0x1b9   :  { %v2852_v58 = vpop.f32.mrb[12].mxu1  ;;  %v2819_v51 = vadd.f32 %v2818_v45, %v2817_v57 }
 0x1ba   :  { %v2853_v59 = vpop.f32.mrb[13].mxu1 }
 0x1bb   :  { %v2854_v60 = vadd.f32 %v2853_v59, %v2852_v58  ;;  %v1738_v61 = vadd.f32 %v2819_v51, %v1668_v56 }
 0x1bd   :  { %v1808_v33 = vadd.f32 %v2854_v60, %v1738_v61 }
 0x1d7   :  { %v2887_v62 = vpop.f32.mrb[14].mxu0 }
 0x1d8   :  { %v2888_v63 = vpop.f32.mrb[15].mxu0 }
 0x1d9   :  { %v2922_v0 = vpop.f32.mrb[14].mxu1  ;;  %v2889_v1 = vadd.f32 %v2888_v63, %v2887_v62 }
 0x1da   :  { %v2923_v2 = vpop.f32.mrb[15].mxu1 }
 0x1db   :  { %v2924_v3 = vadd.f32 %v2923_v2, %v2922_v0  ;;  %v1878_v4 = vadd.f32 %v2889_v1, %v1808_v33 }
 0x1dd   :  { %v1948_v5 = vadd.f32 %v2924_v3, %v1878_v4 }
 0x1f7   :  { %v2957_v6 = vpop.f32.mrb[16].mxu0 }
 0x1f8   :  { %v2958_v26 = vpop.f32.mrb[17].mxu0 }
 0x1f9   :  { %v2992_v8 = vpop.f32.mrb[16].mxu1  ;;  %v2959_v7 = vadd.f32 %v2958_v26, %v2957_v6 }
 0x1fa   :  { %v2993_v9 = vpop.f32.mrb[17].mxu1 }
 0x1fb   :  { %v2994_v11 = vadd.f32 %v2993_v9, %v2992_v8  ;;  %v2018_v10 = vadd.f32 %v2959_v7, %v1948_v5  ;;  %v2157_v12 = vpop.f32.mrb[18].mxu0 }
 0x1fc   :  { %v3013_v14 = vpop.f32.mrb[19].mxu0 }
 0x1fd   :  { %v2088_v15 = vadd.f32 %v2994_v11, %v2018_v10 }
 0x1ff   :  { %v2158_v16 = vadd.f32 %v2157_v12, %v2088_v15 }
 0x201   :  { %v2161_v52 = vmax.f32 %v2158_v16, 0.0 }
 0x203   :  { %3023 = vmatmul.mubr.msk.f32.vlgmr.msra.gmra.mrb[18].mxu1 %vm2173_vm2, %v2161_v52 }
 0x2d6   :  { %v2243_v18 = vpop.f32.mrb[18].mxu1 }
 0x2d7   :  { %v2244_v19 = vadd.f32 %v2360_v39, %v2243_v18  ;;  %v3024_v20 = vpop.f32.mrb[19].mxu1 }
 0x2d9   :  { %v2247_v21 = vmax.f32 %v2244_v19, 0.0 }
 0x2db   :  { %3032 = vmatmul.mubr.msk.f32.vlgmr.msra.gmra.mrb[20].mxu0 %vm2258_vm4, %v2247_v21 }
 0x3ae   :  { %v2332_v23 = vpop.f32.mrb[20].mxu0 }
 0x3af   :  { %v2333_v24 = vadd.f32 %v2362_v22, %v2332_v23  ;;  %v3033_v25 = vpop.f32.mrb[21].mxu0 }
 0x3b1   :  { %v2336_v27 = vsub.f32 0.0, %v2333_v24 }
 0x3b3   :  { %v2337_v28 = vmul.f32 1.442695, %v2336_v27 }
 0x3b5   :  { %3636 = vpow2.f32 %v2337_v28 }
 0x3bf   :  { %v3637_v31 = vpop.eup %3636 }
 0x3c0   :  { %v2339_v29 = vadd.f32 1.0, %v3637_v31 }
 0x3c2   :  { %3638 = vrcp.f32 %v2339_v29 }
 0x3cc   :  { %v3639_v30 = vpop.eup %3638 }
 0x3cd   :  { %2342 = vst.msk [vmem:[#allocation2] sm:$0x3] %vm2341_vm5, %v3639_v30 }
 0x3ce   :  { %3651 = shalt.err (!%p3648_p4)
}
 0x3cf   :  { %s3652_s16 = scalar_lea.hbm %s5625_s7, 32 }
 0x3d0   :  { %p3653_p5 = scmp.ne.s32.totalorder %s5625_s7, %s3652_s16  ;;  %p3656_p6 = scmp.lt.u32.totalorder %s3652_s16, %s5625_s7 }
 0x3d2   :  { %p3658_p7 = pnand %p3656_p6, %p3653_p5 }
 0x3d4   :  { %3661 = shalt.err (!%p3658_p7)
}
 0x3d5   :  { %2352 = dma.vmem_to_hbm [thread:$0]  %s2350_s5, 32, %s5625_s7, [#allocation3]  }
 0x3d6   :  { %3662 = dma.done.wait [#allocation3], 32  }
 0x3d7   :  { %3663 = vsyncadd [#allocation3], 4294967264 }
 0x3d8   :  { %2356 = vsyncpa [#allocation3], 1 }

</bundles_post_ra>
